<compile_context>
chip_gen: v5e
topology: v5e:2x2
jax: 0.10.0
libtpu: 0.0.40
codegen_flags: <defaults>
</compile_context>

<pallas_src>
import functools

import jax
import jax.numpy as jnp
from jax.experimental import pallas as pl
from jax.experimental.pallas import tpu as pltpu


# ----------------------------------------------------------------------------
# Fused forward kernel (one grid step = one tile of `tile_n` pairs = Bt images)
# ----------------------------------------------------------------------------
def _fused_aux_kernel(
    # inputs
    patches_ref,                   # [4*36*Bt, 16] bf16  conv1 im2col (parity-ordered rows)
    w1_ref, b1_ref,                # [16, 64] bf16, [1, 64] f32
    w2_ref, b2_ref,                # [576, 128] bf16, [1, 128] f32
    wf1_ref, bf1_ref,              # [512, 128] bf16, [1, 128] f32
    wf2_ref, bf2_ref,              # [128, 128] bf16, [1, 128] f32
    wf3_ref, bf3_ref,              # [128, 128] bf16, [1, 128] f32
    wf4_ref, bf4_ref,              # [256, 128] bf16, [1, 128] f32
    # outputs (lane dense)
    out_ref,                       # [tile_n, 128] f32   (cols 0:2  = fc4 logits)
    ch_ref,                        # [Bt, 128]     f32   (cols 0:10 = fc3 "channel" logits)
    # scratch
    p1_scr,                        # [36*Bt, 64] bf16   pool1 activations, row=(io*6+jo)*Bt+b
    *, tile_n):
    f32 = jnp.float32
    bf16 = jnp.bfloat16
    bt = 2 * tile_n                # both siamese branches of this tile's pairs

    # ---- conv1 (1->64, k=3): one batched MXU matmul over all 4 pool parities ----
    # Patch row ordering (built host-side): (dh, dw, io, jo, image); so both pool
    # reductions are dense maxes of contiguous quarter blocks.
    y1 = jnp.dot(patches_ref[...], w1_ref[...],
                 preferred_element_type=f32)                      # [4*36*bt, 64]
    q = 36 * bt
    m = jnp.maximum(jnp.maximum(y1[0:q, :], y1[q:2 * q, :]),
                    jnp.maximum(y1[2 * q:3 * q, :], y1[3 * q:4 * q, :]))
    p1_scr[...] = jnp.maximum(m + b1_ref[...], 0.0).astype(bf16)  # pool1 + bias + ReLU

    # ---- conv2 (64->128, k=3): 9 accumulated tap matmuls, no im2col scratch ----
    # LHS per tap = 4 aligned contiguous [4*bt, 64] slabs gathered from p1_scr.
    c2 = None
    for kh in range(3):
        for kw in range(3):
            lhs = jnp.concatenate(
                [p1_scr[pl.ds(((oh + kh) * 6 + kw) * bt, 4 * bt), :]
                 for oh in range(4)], axis=0)                     # [16*bt, 64] bf16
            part = jnp.dot(lhs, w2_ref[pl.ds((kh * 3 + kw) * 64, 64), :],
                           preferred_element_type=f32)
            c2 = part if c2 is None else c2 + part
    c2 = c2 + b2_ref[...]                                         # [16*bt, 128] f32
    # c2 row = (oh*4 + ow)*bt + b

    # ---- maxpool 2x2 + ReLU fused into fc1 (512->100, lane padded to 128) ------
    acc = None
    for ph in range(2):
        for pw in range(2):
            r = ph * 2 + pw                                       # pooled index h*2+w
            blks = [c2[((2 * ph + dh) * 4 + (2 * pw + dw)) * bt:
                       ((2 * ph + dh) * 4 + (2 * pw + dw) + 1) * bt, :]
                    for dh in range(2) for dw in range(2)]        # 4 dense [bt,128]
            pooled = jnp.maximum(jnp.maximum(blks[0], blks[1]),
                                 jnp.maximum(blks[2], blks[3]))
            pooled = jnp.maximum(pooled, 0.0).astype(bf16)        # [bt, 128]
            part = jnp.dot(pooled, wf1_ref[pl.ds(r * 128, 128), :],
                           preferred_element_type=f32)
            acc = part if acc is None else acc + part
    h1 = jnp.maximum(acc + bf1_ref[...], 0.0).astype(bf16)        # [bt, 128]

    # ---- fc2 (100->40) + ReLU, fc3 (40->10) + ReLU (all lane padded) -----------
    h2 = jnp.maximum(jnp.dot(h1, wf2_ref[...], preferred_element_type=f32)
                     + bf2_ref[...], 0.0)
    ch = jnp.maximum(jnp.dot(h2.astype(bf16), wf3_ref[...],
                             preferred_element_type=f32)
                     + bf3_ref[...], 0.0)                         # [bt, 128] f32
    ch_ref[...] = ch                                              # lane-dense store

    # ---- fc4 (20->2): both branches merged into ONE [tile_n,256]x[256,128] -----
    z = jnp.concatenate([ch[0:tile_n, :], ch[tile_n:bt, :]], axis=1).astype(bf16)
    out_ref[...] = (jnp.dot(z, wf4_ref[...], preferred_element_type=f32)
                    + bf4_ref[...])                               # lane-dense store


# ----------------------------------------------------------------------------
# pallas_call wrapper
# ----------------------------------------------------------------------------
def _round_up(x, m):
    return (x + m - 1) // m * m


@functools.partial(jax.jit, static_argnames=("tile_pairs",))
def aux_model_forward(params, x, tile_pairs=64):
    """x: [N, 2, 14, 14] f32 (NCHW like PyTorch).  Returns (output, channel1, channel2).

    tile_pairs pairs (=2*tile_pairs images) are processed per grid step; at 64 pairs the
    per-step VMEM footprint is ~15 MiB, well within v7x's 64 MiB and the 40 MiB limit set
    below.  Raise it on v5e/v6e (128 MiB VMEM) for larger batches if desired.
    """
    n = x.shape[0]
    tile_n = min(_round_up(n, 8), _round_up(tile_pairs, 8))   # pairs per grid step
    n_pad = _round_up(n, tile_n)
    num_tiles = n_pad // tile_n
    bt = 2 * tile_n                                           # images per grid step

    a = x[:, 0, :, :].astype(jnp.float32)
    b = x[:, 1, :, :].astype(jnp.float32)
    if n_pad != n:
        pad = ((0, n_pad - n), (0, 0), (0, 0))
        a = jnp.pad(a, pad)
        b = jnp.pad(b, pad)
    a = a.reshape(num_tiles, tile_n, 14, 14)
    b = b.reshape(num_tiles, tile_n, 14, 14)
    imgs = jnp.concatenate([a, b], axis=1)                    # [T, bt, 14, 14]

    # Host-side conv1 im2col with (h-parity, w-parity, io, jo, image) row ordering so
    # both 2x2 pool reductions become dense quarter maxes inside the kernel.
    pat = jnp.stack([imgs[:, :, kh:kh + 12, kw:kw + 12]
                     for kh in range(3) for kw in range(3)], axis=-1)   # [T,bt,12,12,9]
    pat = pat.reshape(num_tiles, bt, 6, 2, 6, 2, 9)           # (T, b, io, dh, jo, dw, k)
    pat = pat.transpose(0, 3, 5, 2, 4, 1, 6)                  # (T, dh, dw, io, jo, b, k)
    pat = pat.reshape(num_tiles * 4 * 36 * bt, 9)
    patches = jnp.pad(pat, ((0, 0), (0, 7))).astype(jnp.bfloat16)        # [T*144*bt, 16]

    rows_per_tile = 4 * 36 * bt
    kernel = functools.partial(_fused_aux_kernel, tile_n=tile_n)

    # Advisory cost estimate.
    n_imgs = num_tiles * bt
    per_image_flops = 2 * (144 * 16 * 64 + 16 * 576 * 128 + 512 * 128
                           + 128 * 128 + 128 * 128) + 256 * 128
    weight_bytes = sum(int(v.size) * v.dtype.itemsize for v in params.values())
    bytes_accessed = int(patches.size) * 2 + weight_bytes + \
        (num_tiles * tile_n * 128 + num_tiles * bt * 128) * 4
    cost = pl.CostEstimate(flops=n_imgs * per_image_flops, transcendentals=0,
                           bytes_accessed=bytes_accessed)

    grid_spec = pltpu.PrefetchScalarGridSpec(
        num_scalar_prefetch=0,
        grid=(num_tiles,),
        in_specs=[
            pl.BlockSpec((rows_per_tile, 16), lambda t: (t, 0)),   # patches: tiled
            # weights / biases: constant index_map -> VMEM-resident, never re-DMA'd
            pl.BlockSpec((16, 64), lambda t: (0, 0)),
            pl.BlockSpec((1, 64), lambda t: (0, 0)),
            pl.BlockSpec((576, 128), lambda t: (0, 0)),
            pl.BlockSpec((1, 128), lambda t: (0, 0)),
            pl.BlockSpec((512, 128), lambda t: (0, 0)),
            pl.BlockSpec((1, 128), lambda t: (0, 0)),
            pl.BlockSpec((128, 128), lambda t: (0, 0)),
            pl.BlockSpec((1, 128), lambda t: (0, 0)),
            pl.BlockSpec((128, 128), lambda t: (0, 0)),
            pl.BlockSpec((1, 128), lambda t: (0, 0)),
            pl.BlockSpec((256, 128), lambda t: (0, 0)),
            pl.BlockSpec((1, 128), lambda t: (0, 0)),
        ],
        out_specs=(
            pl.BlockSpec((tile_n, 128), lambda t: (t, 0)),         # fc4 slab
            pl.BlockSpec((bt, 128), lambda t: (t, 0)),             # fc3 slab (both branches)
        ),
        scratch_shapes=[pltpu.VMEM((36 * bt, 64), jnp.bfloat16)],  # pool1 activations
    )

    out_pad, ch_pad = pl.pallas_call(
        kernel,
        out_shape=(jax.ShapeDtypeStruct((num_tiles * tile_n, 128), jnp.float32),
                   jax.ShapeDtypeStruct((num_tiles * bt, 128), jnp.float32)),
        grid_spec=grid_spec,
        compiler_params=pltpu.CompilerParams(
            dimension_semantics=("parallel",),
            vmem_limit_bytes=40 * 1024 * 1024),
        cost_estimate=cost,
    )(patches,
      params["w_cl1"], params["b_cl1"],
      params["w_cl2"], params["b_cl2"],
      params["w_f1"], params["b_f1"],
      params["w_f2"], params["b_f2"],
      params["w_f3"], params["b_f3"],
      params["w_f4"], params["b_f4"])

    # Slice the lane-dense slabs down to the logical widths in XLA (not in-kernel).
    ch_pad = ch_pad.reshape(num_tiles, 2, tile_n, 128)
    channel1 = ch_pad[:, 0].reshape(n_pad, 128)[:n, :10]
    channel2 = ch_pad[:, 1].reshape(n_pad, 128)[:n, :10]
    output = out_pad.reshape(n_pad, 128)[:n, :2]
    return output, channel1, channel2


# ----------------------------------------------------------------------------
# Synthetic parameters (kernel layout; pad regions MUST be zero)
#   w_cl1[kh*3+kw, cout]            = conv1.weight[cout, 0, kh, kw]     (rows 9..15 zero)
#   w_cl2[(kh*3+kw)*64 + cin, cout] = conv2.weight[cout, cin, kh, kw]
#   w_f1[(h*2+w)*128 + c, j]        = full1.weight[j, c*4 + h*2 + w]    (cols >=100 zero)
#   w_f2 / w_f3                     = full2.weight.T / full3.weight.T   (zero pad to 128x128)
#   w_f4[i, o]      = full4.weight[o, i]      for i < 10   (channel1 part)
#   w_f4[128+i, o]  = full4.weight[o, 10+i]   for i < 10   (channel2 part)
# ----------------------------------------------------------------------------
def init_params(key, nb_hidden=100):
    assert nb_hidden <= 128
    ks = jax.random.split(key, 12)
    s = 0.05
    f32, bf16 = jnp.float32, jnp.bfloat16

    def pad2(arr, rows, cols):
        z = jnp.zeros((rows, cols), f32)
        return z.at[:arr.shape[0], :arr.shape[1]].set(arr)

    w_cl1 = jax.random.normal(ks[0], (9, 64), f32) * s
    w_cl2 = jax.random.normal(ks[1], (9 * 64, 128), f32) * s
    w_f1 = jax.random.normal(ks[2], (512, nb_hidden), f32) * s
    w_f2 = jax.random.normal(ks[3], (nb_hidden, 40), f32) * s
    w_f3 = jax.random.normal(ks[4], (40, 10), f32) * s
    w_f4 = jax.random.normal(ks[5], (20, 2), f32) * s

    b_cl1 = jax.random.normal(ks[6], (1, 64), f32) * s
    b_cl2 = jax.random.normal(ks[7], (1, 128), f32) * s
    b_f1 = pad2(jax.random.normal(ks[8], (1, nb_hidden), f32) * s, 1, 128)
    b_f2 = pad2(jax.random.normal(ks[9], (1, 40), f32) * s, 1, 128)
    b_f3 = pad2(jax.random.normal(ks[10], (1, 10), f32) * s, 1, 128)
    b_f4 = pad2(jax.random.normal(ks[11], (1, 2), f32) * s, 1, 128)

    w_f4m = jnp.zeros((256, 128), f32)
    w_f4m = w_f4m.at[0:10, 0:2].set(w_f4[:10])
    w_f4m = w_f4m.at[128:138, 0:2].set(w_f4[10:])

    return {
        "w_cl1": pad2(w_cl1, 16, 64).astype(bf16),
        "b_cl1": b_cl1,
        "w_cl2": w_cl2.astype(bf16),
        "b_cl2": b_cl2,
        "w_f1": pad2(w_f1, 512, 128).astype(bf16),
        "b_f1": b_f1,
        "w_f2": pad2(w_f2, 128, 128).astype(bf16),
        "b_f2": b_f2,
        "w_f3": pad2(w_f3, 128, 128).astype(bf16),
        "b_f3": b_f3,
        "w_f4": w_f4m.astype(bf16),
        "b_f4": b_f4,
    }


# ----------------------------------------------------------------------------
# Pure-JAX (XLA) reference forward, f32, for an in-script correctness check.
# ----------------------------------------------------------------------------
def reference_forward(params, x):
    f32 = jnp.float32
    hi = jax.lax.Precision.HIGHEST
    n = x.shape[0]
    imgs = jnp.concatenate([x[:, 0, :, :], x[:, 1, :, :]], axis=0).astype(f32)  # [2n,14,14]

    w1 = params["w_cl1"].astype(f32)[:9]                                   # [9,64]
    pat = jnp.stack([imgs[:, kh:kh + 12, kw:kw + 12]
                     for kh in range(3) for kw in range(3)], axis=-1)      # [2n,12,12,9]
    c1 = jnp.einsum("bhwk,kc->bhwc", pat, w1, precision=hi) \
        + params["b_cl1"].astype(f32).reshape(1, 1, 1, 64)
    p1 = jax.nn.relu(c1.reshape(2 * n, 6, 2, 6, 2, 64).max(axis=(2, 4)))   # [2n,6,6,64]

    w2 = params["w_cl2"].astype(f32).reshape(9, 64, 128)
    pat2 = jnp.stack([p1[:, kh:kh + 4, kw:kw + 4, :]
                      for kh in range(3) for kw in range(3)], axis=3)      # [2n,4,4,9,64]
    c2 = jnp.einsum("bhwkc,kcd->bhwd", pat2, w2, precision=hi) \
        + params["b_cl2"].astype(f32).reshape(1, 1, 1, 128)
    p2 = jax.nn.relu(c2.reshape(2 * n, 2, 2, 2, 2, 128).max(axis=(2, 4)))  # [2n,2,2,128]

    flat = p2.reshape(2 * n, 512)            # index = (h*2+w)*128 + c, matches w_f1 rows
    h1 = jax.nn.relu(jnp.dot(flat, params["w_f1"].astype(f32), precision=hi)
                     + params["b_f1"])
    h2 = jax.nn.relu(jnp.dot(h1, params["w_f2"].astype(f32), precision=hi)
                     + params["b_f2"])
    ch = jax.nn.relu(jnp.dot(h2, params["w_f3"].astype(f32), precision=hi)
                     + params["b_f3"])
    z = jnp.concatenate([ch[:n], ch[n:]], axis=1)                          # [n,256]
    out = jnp.dot(z, params["w_f4"].astype(f32), precision=hi) + params["b_f4"]
    return out[:, :2], ch[:n, :10], ch[n:, :10]


# ----------------------------------------------------------------------------
if __name__ == "__main__":
    key = jax.random.PRNGKey(0)
    k_param, k_data = jax.random.split(key)

    params = init_params(k_param, nb_hidden=100)
    x = jax.random.normal(k_data, (2, 2, 14, 14), jnp.float32)   # [N=2, 2, 14, 14]

    output, channel1, channel2 = jax.block_until_ready(aux_model_forward(params, x))

    assert output.shape == (2, 2)
    assert channel1.shape == (2, 10)
    assert channel2.shape == (2, 10)
    assert bool(jnp.all(jnp.isfinite(output)))

    # Correctness check vs. pure-JAX f32 reference (kernel uses bf16 MXU inputs).
    ref_out, ref_c1, ref_c2 = reference_forward(params, x)
    err = max(float(jnp.max(jnp.abs(output - ref_out))),
              float(jnp.max(jnp.abs(channel1 - ref_c1))),
              float(jnp.max(jnp.abs(channel2 - ref_c2))))
    assert err < 5e-2, f"kernel/reference mismatch: max abs err = {err}"

    print("KERNEL_OK")
</pallas_src>

<mosaic_0001>
module attributes {stable_mosaic.version = 11 : i64} {
  func.func @_fused_aux_kernel(%arg0: i32, %arg1: memref<2304x16xbf16, #tpu.memory_space<vmem>>, %arg2: memref<16x64xbf16, #tpu.memory_space<vmem>>, %arg3: memref<1x64xf32, #tpu.memory_space<vmem>>, %arg4: memref<576x128xbf16, #tpu.memory_space<vmem>>, %arg5: memref<1x128xf32, #tpu.memory_space<vmem>>, %arg6: memref<512x128xbf16, #tpu.memory_space<vmem>>, %arg7: memref<1x128xf32, #tpu.memory_space<vmem>>, %arg8: memref<128x128xbf16, #tpu.memory_space<vmem>>, %arg9: memref<1x128xf32, #tpu.memory_space<vmem>>, %arg10: memref<128x128xbf16, #tpu.memory_space<vmem>>, %arg11: memref<1x128xf32, #tpu.memory_space<vmem>>, %arg12: memref<256x128xbf16, #tpu.memory_space<vmem>>, %arg13: memref<1x128xf32, #tpu.memory_space<vmem>>, %arg14: memref<8x128xf32, #tpu.memory_space<vmem>>, %arg15: memref<16x128xf32, #tpu.memory_space<vmem>>, %arg16: memref<576x64xbf16, #tpu.memory_space<vmem>>) attributes {dimension_semantics = [#tpu.dimension_semantics<parallel>], iteration_bounds = array<i64: 1>, scalar_prefetch = 0 : i64, scratch_operands = 1 : i64, tpu.core_type = #tpu.core_type<tc>, window_params = [{transform_indices = @transform_0, window_bounds = array<i64: 2304, 16>}, {pipeline_mode = #tpu.pipeline_mode<synchronous>, transform_indices = @transform_1, window_bounds = array<i64: 16, 64>}, {pipeline_mode = #tpu.pipeline_mode<synchronous>, transform_indices = @transform_2, window_bounds = array<i64: 1, 64>}, {pipeline_mode = #tpu.pipeline_mode<synchronous>, transform_indices = @transform_3, window_bounds = array<i64: 576, 128>}, {pipeline_mode = #tpu.pipeline_mode<synchronous>, transform_indices = @transform_4, window_bounds = array<i64: 1, 128>}, {pipeline_mode = #tpu.pipeline_mode<synchronous>, transform_indices = @transform_5, window_bounds = array<i64: 512, 128>}, {pipeline_mode = #tpu.pipeline_mode<synchronous>, transform_indices = @transform_6, window_bounds = array<i64: 1, 128>}, {pipeline_mode = #tpu.pipeline_mode<synchronous>, transform_indices = @transform_7, window_bounds = array<i64: 128, 128>}, {pipeline_mode = #tpu.pipeline_mode<synchronous>, transform_indices = @transform_8, window_bounds = array<i64: 1, 128>}, {pipeline_mode = #tpu.pipeline_mode<synchronous>, transform_indices = @transform_9, window_bounds = array<i64: 128, 128>}, {pipeline_mode = #tpu.pipeline_mode<synchronous>, transform_indices = @transform_10, window_bounds = array<i64: 1, 128>}, {pipeline_mode = #tpu.pipeline_mode<synchronous>, transform_indices = @transform_11, window_bounds = array<i64: 256, 128>}, {pipeline_mode = #tpu.pipeline_mode<synchronous>, transform_indices = @transform_12, window_bounds = array<i64: 1, 128>}, {transform_indices = @transform_13, window_bounds = array<i64: 8, 128>}, {transform_indices = @transform_14, window_bounds = array<i64: 16, 128>}]} {
    %c0 = arith.constant 0 : index
    %c0_0 = arith.constant 0 : index
    %0 = vector.load %arg1[%c0, %c0_0] : memref<2304x16xbf16, #tpu.memory_space<vmem>>, vector<2304x16xbf16>
    %c0_1 = arith.constant 0 : index
    %c0_2 = arith.constant 0 : index
    %1 = vector.load %arg2[%c0_1, %c0_2] : memref<16x64xbf16, #tpu.memory_space<vmem>>, vector<16x64xbf16>
    %cst = arith.constant dense<0.000000e+00> : vector<2304x64xf32>
    %2 = tpu.matmul %0, %1, %cst {dimension_numbers = #tpu.dot_dimension_numbers<[1], [0], [0], [1], [0, 0, 1, 1], [], []>} : vector<2304x16xbf16>, vector<16x64xbf16>, vector<2304x64xf32> -> vector<2304x64xf32>
    %3 = vector.extract_strided_slice %2 {offsets = [0, 0], sizes = [576, 64], strides = [1, 1]} : vector<2304x64xf32> to vector<576x64xf32>
    %4 = vector.extract_strided_slice %2 {offsets = [576, 0], sizes = [576, 64], strides = [1, 1]} : vector<2304x64xf32> to vector<576x64xf32>
    %5 = arith.maximumf %3, %4 : vector<576x64xf32>
    %6 = vector.extract_strided_slice %2 {offsets = [1152, 0], sizes = [576, 64], strides = [1, 1]} : vector<2304x64xf32> to vector<576x64xf32>
    %7 = vector.extract_strided_slice %2 {offsets = [1728, 0], sizes = [576, 64], strides = [1, 1]} : vector<2304x64xf32> to vector<576x64xf32>
    %8 = arith.maximumf %6, %7 : vector<576x64xf32>
    %9 = arith.maximumf %5, %8 : vector<576x64xf32>
    %c0_3 = arith.constant 0 : index
    %c0_4 = arith.constant 0 : index
    %10 = vector.load %arg3[%c0_3, %c0_4] : memref<1x64xf32, #tpu.memory_space<vmem>>, vector<1x64xf32>
    %11 = vector.broadcast %10 : vector<1x64xf32> to vector<576x64xf32>
    %12 = arith.addf %9, %11 : vector<576x64xf32>
    %cst_5 = arith.constant 0.000000e+00 : f32
    %13 = vector.broadcast %cst_5 : f32 to vector<576x64xf32>
    %14 = arith.maximumf %12, %13 : vector<576x64xf32>
    %15 = arith.truncf %14 : vector<576x64xf32> to vector<576x64xbf16>
    %c0_6 = arith.constant 0 : index
    %c0_7 = arith.constant 0 : index
    %16 = vector.load %arg16[%c0_6, %c0_7] : memref<576x64xbf16, #tpu.memory_space<vmem>>, vector<576x64xbf16>
    tpu.vector_store %arg16[%c0_6, %c0_7], %15 {strides = array<i32>} : memref<576x64xbf16, #tpu.memory_space<vmem>>, vector<576x64xbf16>,
    %c0_8 = arith.constant 0 : index
    %c0_9 = arith.constant 0 : index
    %17 = vector.load %arg16[%c0_8, %c0_9] : memref<576x64xbf16, #tpu.memory_space<vmem>>, vector<64x64xbf16>
    %c96 = arith.constant 96 : index
    %c0_10 = arith.constant 0 : index
    %18 = vector.load %arg16[%c96, %c0_10] : memref<576x64xbf16, #tpu.memory_space<vmem>>, vector<64x64xbf16>
    %c192 = arith.constant 192 : index
    %c0_11 = arith.constant 0 : index
    %19 = vector.load %arg16[%c192, %c0_11] : memref<576x64xbf16, #tpu.memory_space<vmem>>, vector<64x64xbf16>
    %c288 = arith.constant 288 : index
    %c0_12 = arith.constant 0 : index
    %20 = vector.load %arg16[%c288, %c0_12] : memref<576x64xbf16, #tpu.memory_space<vmem>>, vector<64x64xbf16>
    %21 = tpu.concatenate %17, %18, %19, %20 in 0 : vector<64x64xbf16>, vector<64x64xbf16>, vector<64x64xbf16>, vector<64x64xbf16> -> vector<256x64xbf16>
    %c0_13 = arith.constant 0 : index
    %c0_14 = arith.constant 0 : index
    %22 = vector.load %arg4[%c0_13, %c0_14] : memref<576x128xbf16, #tpu.memory_space<vmem>>, vector<64x128xbf16>
    %cst_15 = arith.constant dense<0.000000e+00> : vector<256x128xf32>
    %23 = tpu.matmul %21, %22, %cst_15 {dimension_numbers = #tpu.dot_dimension_numbers<[1], [0], [0], [1], [0, 0, 1, 1], [], []>} : vector<256x64xbf16>, vector<64x128xbf16>, vector<256x128xf32> -> vector<256x128xf32>
    %c16 = arith.constant 16 : index
    %c0_16 = arith.constant 0 : index
    %24 = vector.load %arg16[%c16, %c0_16] : memref<576x64xbf16, #tpu.memory_space<vmem>>, vector<64x64xbf16>
    %c112 = arith.constant 112 : index
    %c0_17 = arith.constant 0 : index
    %25 = vector.load %arg16[%c112, %c0_17] : memref<576x64xbf16, #tpu.memory_space<vmem>>, vector<64x64xbf16>
    %c208 = arith.constant 208 : index
    %c0_18 = arith.constant 0 : index
    %26 = vector.load %arg16[%c208, %c0_18] : memref<576x64xbf16, #tpu.memory_space<vmem>>, vector<64x64xbf16>
    %c304 = arith.constant 304 : index
    %c0_19 = arith.constant 0 : index
    %27 = vector.load %arg16[%c304, %c0_19] : memref<576x64xbf16, #tpu.memory_space<vmem>>, vector<64x64xbf16>
    %28 = tpu.concatenate %24, %25, %26, %27 in 0 : vector<64x64xbf16>, vector<64x64xbf16>, vector<64x64xbf16>, vector<64x64xbf16> -> vector<256x64xbf16>
    %c64 = arith.constant 64 : index
    %c0_20 = arith.constant 0 : index
    %29 = vector.load %arg4[%c64, %c0_20] : memref<576x128xbf16, #tpu.memory_space<vmem>>, vector<64x128xbf16>
    %cst_21 = arith.constant dense<0.000000e+00> : vector<256x128xf32>
    %30 = tpu.matmul %28, %29, %cst_21 {dimension_numbers = #tpu.dot_dimension_numbers<[1], [0], [0], [1], [0, 0, 1, 1], [], []>} : vector<256x64xbf16>, vector<64x128xbf16>, vector<256x128xf32> -> vector<256x128xf32>
    %31 = arith.addf %23, %30 : vector<256x128xf32>
    %c32 = arith.constant 32 : index
    %c0_22 = arith.constant 0 : index
    %32 = vector.load %arg16[%c32, %c0_22] : memref<576x64xbf16, #tpu.memory_space<vmem>>, vector<64x64xbf16>
    %c128 = arith.constant 128 : index
    %c0_23 = arith.constant 0 : index
    %33 = vector.load %arg16[%c128, %c0_23] : memref<576x64xbf16, #tpu.memory_space<vmem>>, vector<64x64xbf16>
    %c224 = arith.constant 224 : index
    %c0_24 = arith.constant 0 : index
    %34 = vector.load %arg16[%c224, %c0_24] : memref<576x64xbf16, #tpu.memory_space<vmem>>, vector<64x64xbf16>
    %c320 = arith.constant 320 : index
    %c0_25 = arith.constant 0 : index
    %35 = vector.load %arg16[%c320, %c0_25] : memref<576x64xbf16, #tpu.memory_space<vmem>>, vector<64x64xbf16>
    %36 = tpu.concatenate %32, %33, %34, %35 in 0 : vector<64x64xbf16>, vector<64x64xbf16>, vector<64x64xbf16>, vector<64x64xbf16> -> vector<256x64xbf16>
    %c128_26 = arith.constant 128 : index
    %c0_27 = arith.constant 0 : index
    %37 = vector.load %arg4[%c128_26, %c0_27] : memref<576x128xbf16, #tpu.memory_space<vmem>>, vector<64x128xbf16>
    %cst_28 = arith.constant dense<0.000000e+00> : vector<256x128xf32>
    %38 = tpu.matmul %36, %37, %cst_28 {dimension_numbers = #tpu.dot_dimension_numbers<[1], [0], [0], [1], [0, 0, 1, 1], [], []>} : vector<256x64xbf16>, vector<64x128xbf16>, vector<256x128xf32> -> vector<256x128xf32>
    %39 = arith.addf %31, %38 : vector<256x128xf32>
    %c96_29 = arith.constant 96 : index
    %c0_30 = arith.constant 0 : index
    %40 = vector.load %arg16[%c96_29, %c0_30] : memref<576x64xbf16, #tpu.memory_space<vmem>>, vector<64x64xbf16>
    %c192_31 = arith.constant 192 : index
    %c0_32 = arith.constant 0 : index
    %41 = vector.load %arg16[%c192_31, %c0_32] : memref<576x64xbf16, #tpu.memory_space<vmem>>, vector<64x64xbf16>
    %c288_33 = arith.constant 288 : index
    %c0_34 = arith.constant 0 : index
    %42 = vector.load %arg16[%c288_33, %c0_34] : memref<576x64xbf16, #tpu.memory_space<vmem>>, vector<64x64xbf16>
    %c384 = arith.constant 384 : index
    %c0_35 = arith.constant 0 : index
    %43 = vector.load %arg16[%c384, %c0_35] : memref<576x64xbf16, #tpu.memory_space<vmem>>, vector<64x64xbf16>
    %44 = tpu.concatenate %40, %41, %42, %43 in 0 : vector<64x64xbf16>, vector<64x64xbf16>, vector<64x64xbf16>, vector<64x64xbf16> -> vector<256x64xbf16>
    %c192_36 = arith.constant 192 : index
    %c0_37 = arith.constant 0 : index
    %45 = vector.load %arg4[%c192_36, %c0_37] : memref<576x128xbf16, #tpu.memory_space<vmem>>, vector<64x128xbf16>
    %cst_38 = arith.constant dense<0.000000e+00> : vector<256x128xf32>
    %46 = tpu.matmul %44, %45, %cst_38 {dimension_numbers = #tpu.dot_dimension_numbers<[1], [0], [0], [1], [0, 0, 1, 1], [], []>} : vector<256x64xbf16>, vector<64x128xbf16>, vector<256x128xf32> -> vector<256x128xf32>
    %47 = arith.addf %39, %46 : vector<256x128xf32>
    %c112_39 = arith.constant 112 : index
    %c0_40 = arith.constant 0 : index
    %48 = vector.load %arg16[%c112_39, %c0_40] : memref<576x64xbf16, #tpu.memory_space<vmem>>, vector<64x64xbf16>
    %c208_41 = arith.constant 208 : index
    %c0_42 = arith.constant 0 : index
    %49 = vector.load %arg16[%c208_41, %c0_42] : memref<576x64xbf16, #tpu.memory_space<vmem>>, vector<64x64xbf16>
    %c304_43 = arith.constant 304 : index
    %c0_44 = arith.constant 0 : index
    %50 = vector.load %arg16[%c304_43, %c0_44] : memref<576x64xbf16, #tpu.memory_space<vmem>>, vector<64x64xbf16>
    %c400 = arith.constant 400 : index
    %c0_45 = arith.constant 0 : index
    %51 = vector.load %arg16[%c400, %c0_45] : memref<576x64xbf16, #tpu.memory_space<vmem>>, vector<64x64xbf16>
    %52 = tpu.concatenate %48, %49, %50, %51 in 0 : vector<64x64xbf16>, vector<64x64xbf16>, vector<64x64xbf16>, vector<64x64xbf16> -> vector<256x64xbf16>
    %c256 = arith.constant 256 : index
    %c0_46 = arith.constant 0 : index
    %53 = vector.load %arg4[%c256, %c0_46] : memref<576x128xbf16, #tpu.memory_space<vmem>>, vector<64x128xbf16>
    %cst_47 = arith.constant dense<0.000000e+00> : vector<256x128xf32>
    %54 = tpu.matmul %52, %53, %cst_47 {dimension_numbers = #tpu.dot_dimension_numbers<[1], [0], [0], [1], [0, 0, 1, 1], [], []>} : vector<256x64xbf16>, vector<64x128xbf16>, vector<256x128xf32> -> vector<256x128xf32>
    %55 = arith.addf %47, %54 : vector<256x128xf32>
    %c128_48 = arith.constant 128 : index
    %c0_49 = arith.constant 0 : index
    %56 = vector.load %arg16[%c128_48, %c0_49] : memref<576x64xbf16, #tpu.memory_space<vmem>>, vector<64x64xbf16>
    %c224_50 = arith.constant 224 : index
    %c0_51 = arith.constant 0 : index
    %57 = vector.load %arg16[%c224_50, %c0_51] : memref<576x64xbf16, #tpu.memory_space<vmem>>, vector<64x64xbf16>
    %c320_52 = arith.constant 320 : index
    %c0_53 = arith.constant 0 : index
    %58 = vector.load %arg16[%c320_52, %c0_53] : memref<576x64xbf16, #tpu.memory_space<vmem>>, vector<64x64xbf16>
    %c416 = arith.constant 416 : index
    %c0_54 = arith.constant 0 : index
    %59 = vector.load %arg16[%c416, %c0_54] : memref<576x64xbf16, #tpu.memory_space<vmem>>, vector<64x64xbf16>
    %60 = tpu.concatenate %56, %57, %58, %59 in 0 : vector<64x64xbf16>, vector<64x64xbf16>, vector<64x64xbf16>, vector<64x64xbf16> -> vector<256x64xbf16>
    %c320_55 = arith.constant 320 : index
    %c0_56 = arith.constant 0 : index
    %61 = vector.load %arg4[%c320_55, %c0_56] : memref<576x128xbf16, #tpu.memory_space<vmem>>, vector<64x128xbf16>
    %cst_57 = arith.constant dense<0.000000e+00> : vector<256x128xf32>
    %62 = tpu.matmul %60, %61, %cst_57 {dimension_numbers = #tpu.dot_dimension_numbers<[1], [0], [0], [1], [0, 0, 1, 1], [], []>} : vector<256x64xbf16>, vector<64x128xbf16>, vector<256x128xf32> -> vector<256x128xf32>
    %63 = arith.addf %55, %62 : vector<256x128xf32>
    %c192_58 = arith.constant 192 : index
    %c0_59 = arith.constant 0 : index
    %64 = vector.load %arg16[%c192_58, %c0_59] : memref<576x64xbf16, #tpu.memory_space<vmem>>, vector<64x64xbf16>
    %c288_60 = arith.constant 288 : index
    %c0_61 = arith.constant 0 : index
    %65 = vector.load %arg16[%c288_60, %c0_61] : memref<576x64xbf16, #tpu.memory_space<vmem>>, vector<64x64xbf16>
    %c384_62 = arith.constant 384 : index
    %c0_63 = arith.constant 0 : index
    %66 = vector.load %arg16[%c384_62, %c0_63] : memref<576x64xbf16, #tpu.memory_space<vmem>>, vector<64x64xbf16>
    %c480 = arith.constant 480 : index
    %c0_64 = arith.constant 0 : index
    %67 = vector.load %arg16[%c480, %c0_64] : memref<576x64xbf16, #tpu.memory_space<vmem>>, vector<64x64xbf16>
    %68 = tpu.concatenate %64, %65, %66, %67 in 0 : vector<64x64xbf16>, vector<64x64xbf16>, vector<64x64xbf16>, vector<64x64xbf16> -> vector<256x64xbf16>
    %c384_65 = arith.constant 384 : index
    %c0_66 = arith.constant 0 : index
    %69 = vector.load %arg4[%c384_65, %c0_66] : memref<576x128xbf16, #tpu.memory_space<vmem>>, vector<64x128xbf16>
    %cst_67 = arith.constant dense<0.000000e+00> : vector<256x128xf32>
    %70 = tpu.matmul %68, %69, %cst_67 {dimension_numbers = #tpu.dot_dimension_numbers<[1], [0], [0], [1], [0, 0, 1, 1], [], []>} : vector<256x64xbf16>, vector<64x128xbf16>, vector<256x128xf32> -> vector<256x128xf32>
    %71 = arith.addf %63, %70 : vector<256x128xf32>
    %c208_68 = arith.constant 208 : index
    %c0_69 = arith.constant 0 : index
    %72 = vector.load %arg16[%c208_68, %c0_69] : memref<576x64xbf16, #tpu.memory_space<vmem>>, vector<64x64xbf16>
    %c304_70 = arith.constant 304 : index
    %c0_71 = arith.constant 0 : index
    %73 = vector.load %arg16[%c304_70, %c0_71] : memref<576x64xbf16, #tpu.memory_space<vmem>>, vector<64x64xbf16>
    %c400_72 = arith.constant 400 : index
    %c0_73 = arith.constant 0 : index
    %74 = vector.load %arg16[%c400_72, %c0_73] : memref<576x64xbf16, #tpu.memory_space<vmem>>, vector<64x64xbf16>
    %c496 = arith.constant 496 : index
    %c0_74 = arith.constant 0 : index
    %75 = vector.load %arg16[%c496, %c0_74] : memref<576x64xbf16, #tpu.memory_space<vmem>>, vector<64x64xbf16>
    %76 = tpu.concatenate %72, %73, %74, %75 in 0 : vector<64x64xbf16>, vector<64x64xbf16>, vector<64x64xbf16>, vector<64x64xbf16> -> vector<256x64xbf16>
    %c448 = arith.constant 448 : index
    %c0_75 = arith.constant 0 : index
    %77 = vector.load %arg4[%c448, %c0_75] : memref<576x128xbf16, #tpu.memory_space<vmem>>, vector<64x128xbf16>
    %cst_76 = arith.constant dense<0.000000e+00> : vector<256x128xf32>
    %78 = tpu.matmul %76, %77, %cst_76 {dimension_numbers = #tpu.dot_dimension_numbers<[1], [0], [0], [1], [0, 0, 1, 1], [], []>} : vector<256x64xbf16>, vector<64x128xbf16>, vector<256x128xf32> -> vector<256x128xf32>
    %79 = arith.addf %71, %78 : vector<256x128xf32>
    %c224_77 = arith.constant 224 : index
    %c0_78 = arith.constant 0 : index
    %80 = vector.load %arg16[%c224_77, %c0_78] : memref<576x64xbf16, #tpu.memory_space<vmem>>, vector<64x64xbf16>
    %c320_79 = arith.constant 320 : index
    %c0_80 = arith.constant 0 : index
    %81 = vector.load %arg16[%c320_79, %c0_80] : memref<576x64xbf16, #tpu.memory_space<vmem>>, vector<64x64xbf16>
    %c416_81 = arith.constant 416 : index
    %c0_82 = arith.constant 0 : index
    %82 = vector.load %arg16[%c416_81, %c0_82] : memref<576x64xbf16, #tpu.memory_space<vmem>>, vector<64x64xbf16>
    %c512 = arith.constant 512 : index
    %c0_83 = arith.constant 0 : index
    %83 = vector.load %arg16[%c512, %c0_83] : memref<576x64xbf16, #tpu.memory_space<vmem>>, vector<64x64xbf16>
    %84 = tpu.concatenate %80, %81, %82, %83 in 0 : vector<64x64xbf16>, vector<64x64xbf16>, vector<64x64xbf16>, vector<64x64xbf16> -> vector<256x64xbf16>
    %c512_84 = arith.constant 512 : index
    %c0_85 = arith.constant 0 : index
    %85 = vector.load %arg4[%c512_84, %c0_85] : memref<576x128xbf16, #tpu.memory_space<vmem>>, vector<64x128xbf16>
    %cst_86 = arith.constant dense<0.000000e+00> : vector<256x128xf32>
    %86 = tpu.matmul %84, %85, %cst_86 {dimension_numbers = #tpu.dot_dimension_numbers<[1], [0], [0], [1], [0, 0, 1, 1], [], []>} : vector<256x64xbf16>, vector<64x128xbf16>, vector<256x128xf32> -> vector<256x128xf32>
    %87 = arith.addf %79, %86 : vector<256x128xf32>
    %c0_87 = arith.constant 0 : index
    %c0_88 = arith.constant 0 : index
    %88 = vector.load %arg5[%c0_87, %c0_88] : memref<1x128xf32, #tpu.memory_space<vmem>>, vector<1x128xf32>
    %89 = vector.broadcast %88 : vector<1x128xf32> to vector<256x128xf32>
    %90 = arith.addf %87, %89 : vector<256x128xf32>
    %91 = vector.extract_strided_slice %90 {offsets = [0, 0], sizes = [16, 128], strides = [1, 1]} : vector<256x128xf32> to vector<16x128xf32>
    %92 = vector.extract_strided_slice %90 {offsets = [16, 0], sizes = [16, 128], strides = [1, 1]} : vector<256x128xf32> to vector<16x128xf32>
    %93 = vector.extract_strided_slice %90 {offsets = [64, 0], sizes = [16, 128], strides = [1, 1]} : vector<256x128xf32> to vector<16x128xf32>
    %94 = vector.extract_strided_slice %90 {offsets = [80, 0], sizes = [16, 128], strides = [1, 1]} : vector<256x128xf32> to vector<16x128xf32>
    %95 = arith.maximumf %91, %92 : vector<16x128xf32>
    %96 = arith.maximumf %93, %94 : vector<16x128xf32>
    %97 = arith.maximumf %95, %96 : vector<16x128xf32>
    %cst_89 = arith.constant 0.000000e+00 : f32
    %98 = vector.broadcast %cst_89 : f32 to vector<16x128xf32>
    %99 = arith.maximumf %97, %98 : vector<16x128xf32>
    %100 = arith.truncf %99 : vector<16x128xf32> to vector<16x128xbf16>
    %c0_90 = arith.constant 0 : index
    %c0_91 = arith.constant 0 : index
    %101 = vector.load %arg6[%c0_90, %c0_91] : memref<512x128xbf16, #tpu.memory_space<vmem>>, vector<128x128xbf16>
    %cst_92 = arith.constant dense<0.000000e+00> : vector<16x128xf32>
    %102 = tpu.matmul %100, %101, %cst_92 {dimension_numbers = #tpu.dot_dimension_numbers<[1], [0], [0], [1], [0, 0, 1, 1], [], []>} : vector<16x128xbf16>, vector<128x128xbf16>, vector<16x128xf32> -> vector<16x128xf32>
    %103 = vector.extract_strided_slice %90 {offsets = [32, 0], sizes = [16, 128], strides = [1, 1]} : vector<256x128xf32> to vector<16x128xf32>
    %104 = vector.extract_strided_slice %90 {offsets = [48, 0], sizes = [16, 128], strides = [1, 1]} : vector<256x128xf32> to vector<16x128xf32>
    %105 = vector.extract_strided_slice %90 {offsets = [96, 0], sizes = [16, 128], strides = [1, 1]} : vector<256x128xf32> to vector<16x128xf32>
    %106 = vector.extract_strided_slice %90 {offsets = [112, 0], sizes = [16, 128], strides = [1, 1]} : vector<256x128xf32> to vector<16x128xf32>
    %107 = arith.maximumf %103, %104 : vector<16x128xf32>
    %108 = arith.maximumf %105, %106 : vector<16x128xf32>
    %109 = arith.maximumf %107, %108 : vector<16x128xf32>
    %cst_93 = arith.constant 0.000000e+00 : f32
    %110 = vector.broadcast %cst_93 : f32 to vector<16x128xf32>
    %111 = arith.maximumf %109, %110 : vector<16x128xf32>
    %112 = arith.truncf %111 : vector<16x128xf32> to vector<16x128xbf16>
    %c128_94 = arith.constant 128 : index
    %c0_95 = arith.constant 0 : index
    %113 = vector.load %arg6[%c128_94, %c0_95] : memref<512x128xbf16, #tpu.memory_space<vmem>>, vector<128x128xbf16>
    %cst_96 = arith.constant dense<0.000000e+00> : vector<16x128xf32>
    %114 = tpu.matmul %112, %113, %cst_96 {dimension_numbers = #tpu.dot_dimension_numbers<[1], [0], [0], [1], [0, 0, 1, 1], [], []>} : vector<16x128xbf16>, vector<128x128xbf16>, vector<16x128xf32> -> vector<16x128xf32>
    %115 = arith.addf %102, %114 : vector<16x128xf32>
    %116 = vector.extract_strided_slice %90 {offsets = [128, 0], sizes = [16, 128], strides = [1, 1]} : vector<256x128xf32> to vector<16x128xf32>
    %117 = vector.extract_strided_slice %90 {offsets = [144, 0], sizes = [16, 128], strides = [1, 1]} : vector<256x128xf32> to vector<16x128xf32>
    %118 = vector.extract_strided_slice %90 {offsets = [192, 0], sizes = [16, 128], strides = [1, 1]} : vector<256x128xf32> to vector<16x128xf32>
    %119 = vector.extract_strided_slice %90 {offsets = [208, 0], sizes = [16, 128], strides = [1, 1]} : vector<256x128xf32> to vector<16x128xf32>
    %120 = arith.maximumf %116, %117 : vector<16x128xf32>
    %121 = arith.maximumf %118, %119 : vector<16x128xf32>
    %122 = arith.maximumf %120, %121 : vector<16x128xf32>
    %cst_97 = arith.constant 0.000000e+00 : f32
    %123 = vector.broadcast %cst_97 : f32 to vector<16x128xf32>
    %124 = arith.maximumf %122, %123 : vector<16x128xf32>
    %125 = arith.truncf %124 : vector<16x128xf32> to vector<16x128xbf16>
    %c256_98 = arith.constant 256 : index
    %c0_99 = arith.constant 0 : index
    %126 = vector.load %arg6[%c256_98, %c0_99] : memref<512x128xbf16, #tpu.memory_space<vmem>>, vector<128x128xbf16>
    %cst_100 = arith.constant dense<0.000000e+00> : vector<16x128xf32>
    %127 = tpu.matmul %125, %126, %cst_100 {dimension_numbers = #tpu.dot_dimension_numbers<[1], [0], [0], [1], [0, 0, 1, 1], [], []>} : vector<16x128xbf16>, vector<128x128xbf16>, vector<16x128xf32> -> vector<16x128xf32>
    %128 = arith.addf %115, %127 : vector<16x128xf32>
    %129 = vector.extract_strided_slice %90 {offsets = [160, 0], sizes = [16, 128], strides = [1, 1]} : vector<256x128xf32> to vector<16x128xf32>
    %130 = vector.extract_strided_slice %90 {offsets = [176, 0], sizes = [16, 128], strides = [1, 1]} : vector<256x128xf32> to vector<16x128xf32>
    %131 = vector.extract_strided_slice %90 {offsets = [224, 0], sizes = [16, 128], strides = [1, 1]} : vector<256x128xf32> to vector<16x128xf32>
    %132 = vector.extract_strided_slice %90 {offsets = [240, 0], sizes = [16, 128], strides = [1, 1]} : vector<256x128xf32> to vector<16x128xf32>
    %133 = arith.maximumf %129, %130 : vector<16x128xf32>
    %134 = arith.maximumf %131, %132 : vector<16x128xf32>
    %135 = arith.maximumf %133, %134 : vector<16x128xf32>
    %cst_101 = arith.constant 0.000000e+00 : f32
    %136 = vector.broadcast %cst_101 : f32 to vector<16x128xf32>
    %137 = arith.maximumf %135, %136 : vector<16x128xf32>
    %138 = arith.truncf %137 : vector<16x128xf32> to vector<16x128xbf16>
    %c384_102 = arith.constant 384 : index
    %c0_103 = arith.constant 0 : index
    %139 = vector.load %arg6[%c384_102, %c0_103] : memref<512x128xbf16, #tpu.memory_space<vmem>>, vector<128x128xbf16>
    %cst_104 = arith.constant dense<0.000000e+00> : vector<16x128xf32>
    %140 = tpu.matmul %138, %139, %cst_104 {dimension_numbers = #tpu.dot_dimension_numbers<[1], [0], [0], [1], [0, 0, 1, 1], [], []>} : vector<16x128xbf16>, vector<128x128xbf16>, vector<16x128xf32> -> vector<16x128xf32>
    %141 = arith.addf %128, %140 : vector<16x128xf32>
    %c0_105 = arith.constant 0 : index
    %c0_106 = arith.constant 0 : index
    %142 = vector.load %arg7[%c0_105, %c0_106] : memref<1x128xf32, #tpu.memory_space<vmem>>, vector<1x128xf32>
    %143 = vector.broadcast %142 : vector<1x128xf32> to vector<16x128xf32>
    %144 = arith.addf %141, %143 : vector<16x128xf32>
    %cst_107 = arith.constant 0.000000e+00 : f32
    %145 = vector.broadcast %cst_107 : f32 to vector<16x128xf32>
    %146 = arith.maximumf %144, %145 : vector<16x128xf32>
    %147 = arith.truncf %146 : vector<16x128xf32> to vector<16x128xbf16>
    %c0_108 = arith.constant 0 : index
    %c0_109 = arith.constant 0 : index
    %148 = vector.load %arg8[%c0_108, %c0_109] : memref<128x128xbf16, #tpu.memory_space<vmem>>, vector<128x128xbf16>
    %cst_110 = arith.constant dense<0.000000e+00> : vector<16x128xf32>
    %149 = tpu.matmul %147, %148, %cst_110 {dimension_numbers = #tpu.dot_dimension_numbers<[1], [0], [0], [1], [0, 0, 1, 1], [], []>} : vector<16x128xbf16>, vector<128x128xbf16>, vector<16x128xf32> -> vector<16x128xf32>
    %c0_111 = arith.constant 0 : index
    %c0_112 = arith.constant 0 : index
    %150 = vector.load %arg9[%c0_111, %c0_112] : memref<1x128xf32, #tpu.memory_space<vmem>>, vector<1x128xf32>
    %151 = vector.broadcast %150 : vector<1x128xf32> to vector<16x128xf32>
    %152 = arith.addf %149, %151 : vector<16x128xf32>
    %cst_113 = arith.constant 0.000000e+00 : f32
    %153 = vector.broadcast %cst_113 : f32 to vector<16x128xf32>
    %154 = arith.maximumf %152, %153 : vector<16x128xf32>
    %155 = arith.truncf %154 : vector<16x128xf32> to vector<16x128xbf16>
    %c0_114 = arith.constant 0 : index
    %c0_115 = arith.constant 0 : index
    %156 = vector.load %arg10[%c0_114, %c0_115] : memref<128x128xbf16, #tpu.memory_space<vmem>>, vector<128x128xbf16>
    %cst_116 = arith.constant dense<0.000000e+00> : vector<16x128xf32>
    %157 = tpu.matmul %155, %156, %cst_116 {dimension_numbers = #tpu.dot_dimension_numbers<[1], [0], [0], [1], [0, 0, 1, 1], [], []>} : vector<16x128xbf16>, vector<128x128xbf16>, vector<16x128xf32> -> vector<16x128xf32>
    %c0_117 = arith.constant 0 : index
    %c0_118 = arith.constant 0 : index
    %158 = vector.load %arg11[%c0_117, %c0_118] : memref<1x128xf32, #tpu.memory_space<vmem>>, vector<1x128xf32>
    %159 = vector.broadcast %158 : vector<1x128xf32> to vector<16x128xf32>
    %160 = arith.addf %157, %159 : vector<16x128xf32>
    %cst_119 = arith.constant 0.000000e+00 : f32
    %161 = vector.broadcast %cst_119 : f32 to vector<16x128xf32>
    %162 = arith.maximumf %160, %161 : vector<16x128xf32>
    %c0_120 = arith.constant 0 : index
    %c0_121 = arith.constant 0 : index
    %163 = vector.load %arg15[%c0_120, %c0_121] : memref<16x128xf32, #tpu.memory_space<vmem>>, vector<16x128xf32>
    tpu.vector_store %arg15[%c0_120, %c0_121], %162 {strides = array<i32>} : memref<16x128xf32, #tpu.memory_space<vmem>>, vector<16x128xf32>,
    %164 = vector.extract_strided_slice %162 {offsets = [0, 0], sizes = [8, 128], strides = [1, 1]} : vector<16x128xf32> to vector<8x128xf32>
    %165 = vector.extract_strided_slice %162 {offsets = [8, 0], sizes = [8, 128], strides = [1, 1]} : vector<16x128xf32> to vector<8x128xf32>
    %166 = tpu.concatenate %164, %165 in 1 : vector<8x128xf32>, vector<8x128xf32> -> vector<8x256xf32>
    %167 = arith.truncf %166 : vector<8x256xf32> to vector<8x256xbf16>
    %c0_122 = arith.constant 0 : index
    %c0_123 = arith.constant 0 : index
    %168 = vector.load %arg12[%c0_122, %c0_123] : memref<256x128xbf16, #tpu.memory_space<vmem>>, vector<256x128xbf16>
    %cst_124 = arith.constant dense<0.000000e+00> : vector<8x128xf32>
    %169 = tpu.matmul %167, %168, %cst_124 {dimension_numbers = #tpu.dot_dimension_numbers<[1], [0], [0], [1], [0, 0, 1, 1], [], []>} : vector<8x256xbf16>, vector<256x128xbf16>, vector<8x128xf32> -> vector<8x128xf32>
    %c0_125 = arith.constant 0 : index
    %c0_126 = arith.constant 0 : index
    %170 = vector.load %arg13[%c0_125, %c0_126] : memref<1x128xf32, #tpu.memory_space<vmem>>, vector<1x128xf32>
    %171 = vector.broadcast %170 : vector<1x128xf32> to vector<8x128xf32>
    %172 = arith.addf %169, %171 : vector<8x128xf32>
    %c0_127 = arith.constant 0 : index
    %c0_128 = arith.constant 0 : index
    %173 = vector.load %arg14[%c0_127, %c0_128] : memref<8x128xf32, #tpu.memory_space<vmem>>, vector<8x128xf32>
    tpu.vector_store %arg14[%c0_127, %c0_128], %172 {strides = array<i32>} : memref<8x128xf32, #tpu.memory_space<vmem>>, vector<8x128xf32>,
    return
  }
  func.func @transform_0(%arg0: i32) -> (i32, i32) {
    %c0_i32 = arith.constant 0 : i32
    %c0_i32_0 = arith.constant 0 : i32
    return %arg0, %c0_i32 : i32, i32
  }
  func.func @transform_1(%arg0: i32) -> (i32, i32) {
    %c0_i32 = arith.constant 0 : i32
    %c0_i32_0 = arith.constant 0 : i32
    %c0_i32_1 = arith.constant 0 : i32
    return %c0_i32, %c0_i32_0 : i32, i32
  }
  func.func @transform_2(%arg0: i32) -> (i32, i32) {
    %c0_i32 = arith.constant 0 : i32
    %c0_i32_0 = arith.constant 0 : i32
    %c0_i32_1 = arith.constant 0 : i32
    return %c0_i32, %c0_i32_0 : i32, i32
  }
  func.func @transform_3(%arg0: i32) -> (i32, i32) {
    %c0_i32 = arith.constant 0 : i32
    %c0_i32_0 = arith.constant 0 : i32
    %c0_i32_1 = arith.constant 0 : i32
    return %c0_i32, %c0_i32_0 : i32, i32
  }
  func.func @transform_4(%arg0: i32) -> (i32, i32) {
    %c0_i32 = arith.constant 0 : i32
    %c0_i32_0 = arith.constant 0 : i32
    %c0_i32_1 = arith.constant 0 : i32
    return %c0_i32, %c0_i32_0 : i32, i32
  }
  func.func @transform_5(%arg0: i32) -> (i32, i32) {
    %c0_i32 = arith.constant 0 : i32
    %c0_i32_0 = arith.constant 0 : i32
    %c0_i32_1 = arith.constant 0 : i32
    return %c0_i32, %c0_i32_0 : i32, i32
  }
  func.func @transform_6(%arg0: i32) -> (i32, i32) {
    %c0_i32 = arith.constant 0 : i32
    %c0_i32_0 = arith.constant 0 : i32
    %c0_i32_1 = arith.constant 0 : i32
    return %c0_i32, %c0_i32_0 : i32, i32
  }
  func.func @transform_7(%arg0: i32) -> (i32, i32) {
    %c0_i32 = arith.constant 0 : i32
    %c0_i32_0 = arith.constant 0 : i32
    %c0_i32_1 = arith.constant 0 : i32
    return %c0_i32, %c0_i32_0 : i32, i32
  }
  func.func @transform_8(%arg0: i32) -> (i32, i32) {
    %c0_i32 = arith.constant 0 : i32
    %c0_i32_0 = arith.constant 0 : i32
    %c0_i32_1 = arith.constant 0 : i32
    return %c0_i32, %c0_i32_0 : i32, i32
  }
  func.func @transform_9(%arg0: i32) -> (i32, i32) {
    %c0_i32 = arith.constant 0 : i32
    %c0_i32_0 = arith.constant 0 : i32
    %c0_i32_1 = arith.constant 0 : i32
    return %c0_i32, %c0_i32_0 : i32, i32
  }
  func.func @transform_10(%arg0: i32) -> (i32, i32) {
    %c0_i32 = arith.constant 0 : i32
    %c0_i32_0 = arith.constant 0 : i32
    %c0_i32_1 = arith.constant 0 : i32
    return %c0_i32, %c0_i32_0 : i32, i32
  }
  func.func @transform_11(%arg0: i32) -> (i32, i32) {
    %c0_i32 = arith.constant 0 : i32
    %c0_i32_0 = arith.constant 0 : i32
    %c0_i32_1 = arith.constant 0 : i32
    return %c0_i32, %c0_i32_0 : i32, i32
  }
  func.func @transform_12(%arg0: i32) -> (i32, i32) {
    %c0_i32 = arith.constant 0 : i32
    %c0_i32_0 = arith.constant 0 : i32
    %c0_i32_1 = arith.constant 0 : i32
    return %c0_i32, %c0_i32_0 : i32, i32
  }
  func.func @transform_13(%arg0: i32) -> (i32, i32) {
    %c0_i32 = arith.constant 0 : i32
    %c0_i32_0 = arith.constant 0 : i32
    return %arg0, %c0_i32 : i32, i32
  }
  func.func @transform_14(%arg0: i32) -> (i32, i32) {
    %c0_i32 = arith.constant 0 : i32
    %c0_i32_0 = arith.constant 0 : i32
    return %arg0, %c0_i32 : i32, i32
  }
}

</mosaic_0001>

<bundles_post_ra>
// kernel: aux_model_forward.1
= control target key start
LH: loop header
LB: loop body
LE: loop exit
PB: predicated region body
PF: predicated region fallthrough
CT: control target
= control target key end

     0   :  { %vm1063_vm0 = vcmask 130048   ;;  %vm2661_vm1 = vcmask 519168   ;;  %vm2914_vm2 = vcmask 523264   ;;  %s9403_s1 = inlined_call_operand.vmem [shape: bf16[16,64], index: 1, kind: input, shape index: {}]   ;;  %s9404_s0 = inlined_call_operand.vmem [shape: bf16[2304,16], index: 0, kind: input, shape index: {}]   ;;  %s9405_s2 = inlined_call_operand.vmem [shape: f32[1,64], index: 2, kind: input, shape index: {}]   ;;  %s9406_s3 = inlined_call_operand.vmem [shape: bf16[576,128], index: 3, kind: input, shape index: {}]   ;;  %s9407_s4 = inlined_call_operand.vmem [shape: f32[1,128], index: 4, kind: input, shape index: {}]   ;;  %s9408_s5 = inlined_call_operand.vmem [shape: bf16[512,128], index: 5, kind: input, shape index: {}]   ;;  %s9409_s6 = inlined_call_operand.vmem [shape: f32[1,128], index: 6, kind: input, shape index: {}]   ;;  %s9410_s8 = inlined_call_operand.vmem [shape: f32[1,128], index: 8, kind: input, shape index: {}]   ;;  %s9411_s7 = inlined_call_operand.vmem [shape: bf16[128,128], index: 7, kind: input, shape index: {}]   ;;  %s9412_s9 = inlined_call_operand.vmem [shape: bf16[128,128], index: 9, kind: input, shape index: {}]   ;;  %s9413_s10 = inlined_call_operand.vmem [shape: f32[1,128], index: 10, kind: input, shape index: {}]   ;;  %s9414_s11 = inlined_call_operand.vmem [shape: bf16[256,128], index: 11, kind: input, shape index: {}]   ;;  %s9415_s12 = inlined_call_operand.vmem [shape: f32[1,128], index: 12, kind: input, shape index: {}]   ;;  %s9416_s14 = inlined_call_operand.vmem [shape: f32[16,128], index: 14, kind: output, shape index: {1}]   ;;  %s9417_s13 = inlined_call_operand.vmem [shape: f32[8,128], index: 13, kind: output, shape index: {0}]  }
   0x1   :  { %v7037_v0 = vld [vmem:[%s9403_s1] sm:$0xff]  ;;  %v6894_v2 = vld [vmem:[%s9404_s0 + $0x8] sm:$0xff]  ;;  %v6895_v3 = vld [vmem:[%s9404_s0 + $0x10] sm:$0xff] }
   0x2   :  { %v6893_v1 = vld [vmem:[%s9404_s0] sm:$0xff]  ;;  %1503 = vmatpush.bf16.msra.mxu0 %v7037_v0  ;;  %7199 = vmatpush.bf16.msra.mxu2 %v7037_v0  ;;  %v6896_v4 = vld [vmem:[%s9404_s0 + $0x18] sm:$0xff]  ;;  %v6898_v6 = vld [vmem:[%s9404_s0 + $0x28] sm:$0xff] }
   0x3   :  { %7198 = vmatpush.bf16.msra.mxu1 %v7037_v0  ;;  %7200 = vmatpush.bf16.msra.mxu3 %v7037_v0  ;;  %v6897_v5 = vld [vmem:[%s9404_s0 + $0x20] sm:$0xff]  ;;  %v6899_v7 = vld [vmem:[%s9404_s0 + $0x30] sm:$0xff]  ;;  %v6900_v8 = vld [vmem:[%s9404_s0 + $0x38] sm:$0xff] }
   0x4   :  { %v6901_v9 = vld [vmem:[%s9404_s0 + $0x40] sm:$0xff]  ;;  %v6902_v12 = vld [vmem:[%s9404_s0 + $0x48] sm:$0xff]  ;;  %v6903_v15 = vld [vmem:[%s9404_s0 + $0x50] sm:$0xff] }
   0x5   :  { %5965 = vmatmul.msk.bf16.vlgmr.msra.gmra.mxu0 %vm1063_vm0, %v6893_v1  ;;  %v6904_v18 = vld [vmem:[%s9404_s0 + $0x58] sm:$0xff]  ;;  %v6905_v21 = vld [vmem:[%s9404_s0 + $0x60] sm:$0xff]  ;;  %v6906_v24 = vld [vmem:[%s9404_s0 + $0x68] sm:$0xff] }
   0x6   :  { %v6907_v27 = vld [vmem:[%s9404_s0 + $0x70] sm:$0xff]  ;;  %v6908_v30 = vld [vmem:[%s9404_s0 + $0x78] sm:$0xff]  ;;  %v6909_v33 = vld [vmem:[%s9404_s0 + $0x80] sm:$0xff] }
   0x7   :  { %v6910_v36 = vld [vmem:[%s9404_s0 + $0x88] sm:$0xff]  ;;  %v6911_v39 = vld [vmem:[%s9404_s0 + $0x90] sm:$0xff]  ;;  %v6912_v42 = vld [vmem:[%s9404_s0 + $0x98] sm:$0xff] }
   0x8   :  { %v6913_v45 = vld [vmem:[%s9404_s0 + $0xa0] sm:$0xff]  ;;  %v6914_v48 = vld [vmem:[%s9404_s0 + $0xa8] sm:$0xff]  ;;  %v6915_v51 = vld [vmem:[%s9404_s0 + $0xb0] sm:$0xff] }
   0x9   :  { %v6916_v54 = vld [vmem:[%s9404_s0 + $0xb8] sm:$0xff]  ;;  %v6917_v57 = vld [vmem:[%s9404_s0 + $0xc0] sm:$0xff]  ;;  %v6918_v61 = vld [vmem:[%s9404_s0 + $0xc8] sm:$0xff] }
   0xa   :  { %v6992_v60 = vld [vmem:[%s9404_s0 + $0x318] sm:$0xff]  ;;  %v6993_v0 = vld [vmem:[%s9404_s0 + $0x320] sm:$0xff]  ;;  %v6919_v1 = vld [vmem:[%s9404_s0 + $0xd0] sm:$0xff] }
   0xb   :  { %6064 = vmatmul.msk.bf16.vlgmr.msra.gmra.mxu2 %vm1063_vm0, %v6992_v60 }
  0x15   :  { %5966 = vmatmul.msk.bf16.gmra.mxu0 %vm1063_vm0, %v6894_v2 }
  0x1b   :  { %6065 = vmatmul.msk.bf16.gmra.mxu2 %vm1063_vm0, %v6993_v0  ;;  %v7000_v0 = vld [vmem:[%s9404_s0 + $0x358] sm:$0xff] }
  0x25   :  { %5967 = vmatmul.msk.bf16.gmra.mxu0 %vm1063_vm0, %v6895_v3 }
  0x35   :  { %5968 = vmatmul.msk.bf16.gmra.mxu0 %vm1063_vm0, %v6896_v4  ;;  %v6994_v4 = vld [vmem:[%s9404_s0 + $0x328] sm:$0xff] }
  0x36   :  { %6066 = vmatmul.msk.bf16.gmra.mxu2 %vm1063_vm0, %v6994_v4 }
  0x45   :  { %5969 = vmatmul.msk.bf16.gmra.mxu0 %vm1063_vm0, %v6897_v5  ;;  %v6920_v5 = vld [vmem:[%s9404_s0 + $0xd8] sm:$0xff] }
  0x55   :  { %5970 = vmatmul.msk.bf16.gmra.mxu0 %vm1063_vm0, %v6898_v6 }
  0x65   :  { %5971 = vmatmul.msk.bf16.gmra.mxu0 %vm1063_vm0, %v6899_v7 }
  0x75   :  { %5972 = vmatmul.msk.bf16.gmra.mxu0 %vm1063_vm0, %v6900_v8  ;;  %v6995_v8 = vld [vmem:[%s9404_s0 + $0x330] sm:$0xff] }
  0x76   :  { %6067 = vmatmul.msk.bf16.gmra.mxu2 %vm1063_vm0, %v6995_v8 }
  0x82   :  { %v7321_v10 = vpop.f32.mrf.mxu0 }
  0x83   :  { %9419 = vst [vmem:[#allocation3_spill] sm:$0xff] %v7321_v10 }
  0x85   :  { %5973 = vmatmul.msk.bf16.gmra.mxu0 %vm1063_vm0, %v6901_v9  ;;  %v6921_v9 = vld [vmem:[%s9404_s0 + $0xe0] sm:$0xff] }
  0x8a   :  { %v7324_v11 = vpop.f32.mrf.mxu0 }
  0x8b   :  { %9420 = vst [vmem:[#allocation4_spill] sm:$0xff] %v7324_v11 }
  0x92   :  { %v7329_v13 = vpop.f32.mrf.mxu0 }
  0x93   :  { %9421 = vst [vmem:[#allocation5_spill] sm:$0xff] %v7329_v13 }
  0x95   :  { %5974 = vmatmul.msk.bf16.gmra.mxu0 %vm1063_vm0, %v6902_v12 }
  0x9a   :  { %v7332_v14 = vpop.f32.mrf.mxu0 }
  0x9b   :  { %9422 = vst [vmem:[#allocation6_spill] sm:$0xff] %v7332_v14  ;;  %v7004_v14 = vld [vmem:[%s9404_s0 + $0x378] sm:$0xff] }
  0xa2   :  { %v7337_v16 = vpop.f32.mrf.mxu0 }
  0xa3   :  { %9423 = vst [vmem:[#allocation7_spill] sm:$0xff] %v7337_v16 }
  0xa5   :  { %5975 = vmatmul.msk.bf16.gmra.mxu0 %vm1063_vm0, %v6903_v15 }
  0xaa   :  { %v7340_v17 = vpop.f32.mrf.mxu0 }
  0xab   :  { %9424 = vst [vmem:[#allocation8_spill] sm:$0xff] %v7340_v17 }
  0xb2   :  { %v7345_v19 = vpop.f32.mrf.mxu0 }
  0xb3   :  { %9425 = vst [vmem:[#allocation9_spill] sm:$0xff] %v7345_v19 }
  0xb5   :  { %5976 = vmatmul.msk.bf16.gmra.mxu0 %vm1063_vm0, %v6904_v18  ;;  %v6996_v18 = vld [vmem:[%s9404_s0 + $0x338] sm:$0xff] }
  0xb6   :  { %6068 = vmatmul.msk.bf16.gmra.mxu2 %vm1063_vm0, %v6996_v18  ;;  %v7001_v18 = vld [vmem:[%s9404_s0 + $0x360] sm:$0xff] }
  0xba   :  { %v7348_v20 = vpop.f32.mrf.mxu0 }
  0xbb   :  { %9426 = vst [vmem:[#allocation10_spill] sm:$0xff] %v7348_v20  ;;  %v7003_v20 = vld [vmem:[%s9404_s0 + $0x370] sm:$0xff] }
  0xc2   :  { %v7353_v22 = vpop.f32.mrf.mxu0 }
  0xc5   :  { %5977 = vmatmul.msk.bf16.gmra.mxu0 %vm1063_vm0, %v6905_v21  ;;  %v6922_v21 = vld [vmem:[%s9404_s0 + $0xe8] sm:$0xff] }
  0xca   :  { %v7356_v23 = vpop.f32.mrf.mxu0 }
  0xd2   :  { %v7361_v25 = vpop.f32.mrf.mxu0 }
  0xd5   :  { %5978 = vmatmul.msk.bf16.gmra.mxu0 %vm1063_vm0, %v6906_v24 }
  0xda   :  { %v7364_v26 = vpop.f32.mrf.mxu0 }
  0xe2   :  { %v7369_v28 = vpop.f32.mrf.mxu0 }
  0xe5   :  { %5979 = vmatmul.msk.bf16.gmra.mxu0 %vm1063_vm0, %v6907_v27 }
  0xea   :  { %v7372_v29 = vpop.f32.mrf.mxu0 }
  0xf2   :  { %v7377_v31 = vpop.f32.mrf.mxu0 }
  0xf5   :  { %5980 = vmatmul.msk.bf16.gmra.mxu0 %vm1063_vm0, %v6908_v30  ;;  %v6997_v30 = vld [vmem:[%s9404_s0 + $0x340] sm:$0xff] }
  0xf6   :  { %6069 = vmatmul.msk.bf16.gmra.mxu2 %vm1063_vm0, %v6997_v30 }
  0xfa   :  { %v7380_v32 = vpop.f32.mrf.mxu0 }
 0x102   :  { %v7385_v34 = vpop.f32.mrf.mxu0 }
 0x105   :  { %5981 = vmatmul.msk.bf16.gmra.mxu0 %vm1063_vm0, %v6909_v33  ;;  %v6923_v33 = vld [vmem:[%s9404_s0 + $0xf0] sm:$0xff] }
 0x10a   :  { %v7388_v35 = vpop.f32.mrf.mxu0 }
 0x112   :  { %v7393_v37 = vpop.f32.mrf.mxu0 }
 0x115   :  { %5982 = vmatmul.msk.bf16.gmra.mxu0 %vm1063_vm0, %v6910_v36 }
 0x11a   :  { %v7396_v38 = vpop.f32.mrf.mxu0 }
 0x122   :  { %v7401_v40 = vpop.f32.mrf.mxu0 }
 0x125   :  { %5983 = vmatmul.msk.bf16.gmra.mxu0 %vm1063_vm0, %v6911_v39 }
 0x12a   :  { %v7404_v41 = vpop.f32.mrf.mxu0 }
 0x132   :  { %v7409_v43 = vpop.f32.mrf.mxu0 }
 0x135   :  { %5984 = vmatmul.msk.bf16.gmra.mxu0 %vm1063_vm0, %v6912_v42  ;;  %v6998_v42 = vld [vmem:[%s9404_s0 + $0x348] sm:$0xff] }
 0x136   :  { %6070 = vmatmul.msk.bf16.gmra.mxu2 %vm1063_vm0, %v6998_v42 }
 0x13a   :  { %v7412_v44 = vpop.f32.mrf.mxu0 }
 0x142   :  { %v7417_v46 = vpop.f32.mrf.mxu0 }
 0x145   :  { %5985 = vmatmul.msk.bf16.gmra.mxu0 %vm1063_vm0, %v6913_v45  ;;  %v6924_v45 = vld [vmem:[%s9404_s0 + $0xf8] sm:$0xff] }
 0x14a   :  { %v7420_v47 = vpop.f32.mrf.mxu0 }
 0x152   :  { %v7425_v49 = vpop.f32.mrf.mxu0 }
 0x155   :  { %5986 = vmatmul.msk.bf16.gmra.mxu0 %vm1063_vm0, %v6914_v48 }
 0x15a   :  { %v7428_v50 = vpop.f32.mrf.mxu0 }
 0x162   :  { %v7433_v52 = vpop.f32.mrf.mxu0 }
 0x165   :  { %5987 = vmatmul.msk.bf16.gmra.mxu0 %vm1063_vm0, %v6915_v51 }
 0x16a   :  { %v7436_v53 = vpop.f32.mrf.mxu0 }
 0x172   :  { %v7441_v55 = vpop.f32.mrf.mxu0 }
 0x175   :  { %5988 = vmatmul.msk.bf16.gmra.mxu0 %vm1063_vm0, %v6916_v54  ;;  %v6999_v54 = vld [vmem:[%s9404_s0 + $0x350] sm:$0xff] }
 0x176   :  { %6071 = vmatmul.msk.bf16.gmra.mxu2 %vm1063_vm0, %v6999_v54  ;;  %v7002_v54 = vld [vmem:[%s9404_s0 + $0x368] sm:$0xff] }
 0x17a   :  { %v7444_v56 = vpop.f32.mrf.mxu0 }
 0x182   :  { %v7449_v58 = vpop.f32.mrf.mxu0 }
 0x185   :  { %5989 = vmatmul.msk.bf16.gmra.mxu0 %vm1063_vm0, %v6917_v57  ;;  %v6925_v57 = vld [vmem:[%s9404_s0 + $0x100] sm:$0xff] }
 0x186   :  { %6072 = vmatmul.msk.bf16.gmra.mxu2 %vm1063_vm0, %v7000_v0 }
 0x18a   :  { %v7452_v59 = vpop.f32.mrf.mxu0 }
 0x192   :  { %v7461_v62 = vpop.f32.mrf.mxu0 }
 0x195   :  { %5990 = vmatmul.msk.bf16.gmra.mxu0 %vm1063_vm0, %v6918_v61 }
 0x196   :  { %6073 = vmatmul.msk.bf16.gmra.mxu2 %vm1063_vm0, %v7001_v18 }
 0x19a   :  { %v7464_v63 = vpop.f32.mrf.mxu0 }
 0x1a2   :  { %v7473_v2 = vpop.f32.mrf.mxu0 }
 0x1a5   :  { %5991 = vmatmul.msk.bf16.gmra.mxu0 %vm1063_vm0, %v6919_v1  ;;  %v6926_v1 = vld [vmem:[%s9404_s0 + $0x108] sm:$0xff] }
 0x1a6   :  { %6074 = vmatmul.msk.bf16.gmra.mxu2 %vm1063_vm0, %v7002_v54  ;;  %v6929_v54 = vld [vmem:[%s9404_s0 + $0x120] sm:$0xff] }
 0x1aa   :  { %v7476_v3 = vpop.f32.mrf.mxu0 }
 0x1b2   :  { %v7485_v6 = vpop.f32.mrf.mxu0 }
 0x1b5   :  { %5992 = vmatmul.msk.bf16.gmra.mxu0 %vm1063_vm0, %v6920_v5  ;;  %v7559_v5 = vpop.f32.mrf.mxu2 }
 0x1b6   :  { %9427 = vst [vmem:[#allocation11_spill] sm:$0xff] %v7559_v5  ;;  %6075 = vmatmul.msk.bf16.gmra.mxu2 %vm1063_vm0, %v7003_v20  ;;  %v6930_v20 = vld [vmem:[%s9404_s0 + $0x128] sm:$0xff] }
 0x1ba   :  { %v7488_v7 = vpop.f32.mrf.mxu0 }
 0x1c2   :  { %v7497_v12 = vpop.f32.mrf.mxu0 }
 0x1c5   :  { %5993 = vmatmul.msk.bf16.gmra.mxu0 %vm1063_vm0, %v6921_v9  ;;  %v7564_v9 = vpop.f32.mrf.mxu2 }
 0x1c6   :  { %9429 = vst [vmem:[#allocation13_spill] sm:$0xff] %v7564_v9  ;;  %6076 = vmatmul.msk.bf16.gmra.mxu2 %vm1063_vm0, %v7004_v14  ;;  %v6931_v14 = vld [vmem:[%s9404_s0 + $0x130] sm:$0xff]  ;;  %v7841_v9 = vld [vmem:[%s9405_s2] ss:$0 sm:$0xff] }
 0x1ca   :  { %v7500_v15 = vpop.f32.mrf.mxu0 }
 0x1d2   :  { %v7509_v24 = vpop.f32.mrf.mxu0 }
 0x1d5   :  { %5994 = vmatmul.msk.bf16.gmra.mxu0 %vm1063_vm0, %v6922_v21  ;;  %v6927_v21 = vld [vmem:[%s9404_s0 + $0x110] sm:$0xff] }
 0x1da   :  { %v7512_v27 = vpop.f32.mrf.mxu0 }
 0x1e2   :  { %v7521_v36 = vpop.f32.mrf.mxu0 }
 0x1e5   :  { %5995 = vmatmul.msk.bf16.gmra.mxu0 %vm1063_vm0, %v6923_v33  ;;  %v7575_v33 = vpop.f32.mrf.mxu2 }
 0x1e6   :  { %9431 = vst [vmem:[#allocation15_spill] sm:$0xff] %v7575_v33 }
 0x1ea   :  { %v7524_v39 = vpop.f32.mrf.mxu0 }
 0x1f2   :  { %v7533_v48 = vpop.f32.mrf.mxu0 }
 0x1f5   :  { %5996 = vmatmul.msk.bf16.gmra.mxu0 %vm1063_vm0, %v6924_v45  ;;  %v7580_v45 = vpop.f32.mrf.mxu2 }
 0x1f6   :  { %9433 = vst [vmem:[#allocation17_spill] sm:$0xff] %v7580_v45 }
 0x1fa   :  { %v7536_v51 = vpop.f32.mrf.mxu0 }
 0x202   :  { %v7545_v60 = vpop.f32.mrf.mxu0 }
 0x205   :  { %5997 = vmatmul.msk.bf16.gmra.mxu0 %vm1063_vm0, %v6925_v57  ;;  %v6928_v57 = vld [vmem:[%s9404_s0 + $0x118] sm:$0xff] }
 0x20a   :  { %v7548_v61 = vpop.f32.mrf.mxu0 }
 0x212   :  { %v7557_v4 = vpop.f32.mrf.mxu0 }
 0x215   :  { %5998 = vmatmul.msk.bf16.gmra.mxu0 %vm1063_vm0, %v6926_v1  ;;  %v7591_v1 = vpop.f32.mrf.mxu2 }
 0x216   :  { %9435 = vst [vmem:[#allocation19_spill] sm:$0xff] %v7591_v1 }
 0x21a   :  { %v7562_v8 = vpop.f32.mrf.mxu0 }
 0x21b   :  { %9428 = vst [vmem:[#allocation12_spill] sm:$0xff] %v7562_v8 }
 0x222   :  { %v7573_v30 = vpop.f32.mrf.mxu0 }
 0x223   :  { %9430 = vst [vmem:[#allocation14_spill] sm:$0xff] %v7573_v30 }
 0x225   :  { %5999 = vmatmul.msk.bf16.gmra.mxu0 %vm1063_vm0, %v6927_v21  ;;  %v7596_v21 = vpop.f32.mrf.mxu2 }
 0x226   :  { %9437 = vst [vmem:[#allocation21_spill] sm:$0xff] %v7596_v21 }
 0x22a   :  { %v7578_v42 = vpop.f32.mrf.mxu0 }
 0x22b   :  { %9432 = vst [vmem:[#allocation16_spill] sm:$0xff] %v7578_v42 }
 0x22d   :  { %v7607_v17 = vpop.f32.mrf.mxu2 }
 0x22e   :  { %9439 = vst [vmem:[#allocation23_spill] sm:$0xff] %v7607_v17 }
 0x232   :  { %v7589_v0 = vpop.f32.mrf.mxu0 }
 0x233   :  { %9434 = vst [vmem:[#allocation18_spill] sm:$0xff] %v7589_v0 }
 0x235   :  { %6000 = vmatmul.msk.bf16.gmra.mxu0 %vm1063_vm0, %v6928_v57  ;;  %v7612_v16 = vpop.f32.mrf.mxu2 }
 0x236   :  { %9441 = vst [vmem:[#allocation25_spill] sm:$0xff] %v7612_v16  ;;  %v7005_v16 = vld [vmem:[%s9404_s0 + $0x380] sm:$0xff] }
 0x237   :  { %6077 = vmatmul.msk.bf16.gmra.mxu2 %vm1063_vm0, %v7005_v16  ;;  %v7006_v16 = vld [vmem:[%s9404_s0 + $0x388] sm:$0xff] }
 0x23a   :  { %v7594_v18 = vpop.f32.mrf.mxu0 }
 0x23b   :  { %9436 = vst [vmem:[#allocation20_spill] sm:$0xff] %v7594_v18 }
 0x23d   :  { %v7623_v11 = vpop.f32.mrf.mxu2 }
 0x23e   :  { %9443 = vst [vmem:[#allocation27_spill] sm:$0xff] %v7623_v11 }
 0x242   :  { %v7605_v19 = vpop.f32.mrf.mxu0 }
 0x243   :  { %9438 = vst [vmem:[#allocation22_spill] sm:$0xff] %v7605_v19  ;;  %v6941_v19 = vld [vmem:[%s9404_s0 + $0x180] sm:$0xff] }
 0x245   :  { %6001 = vmatmul.msk.bf16.gmra.mxu0 %vm1063_vm0, %v6929_v54  ;;  %v7628_v10 = vpop.f32.mrf.mxu2 }
 0x246   :  { %9445 = vst [vmem:[#allocation29_spill] sm:$0xff] %v7628_v10 }
 0x247   :  { %6078 = vmatmul.msk.bf16.gmra.mxu2 %vm1063_vm0, %v7006_v16  ;;  %v7007_v16 = vld [vmem:[%s9404_s0 + $0x390] sm:$0xff] }
 0x24a   :  { %v7610_v57 = vpop.f32.mrf.mxu0 }
 0x24b   :  { %9440 = vst [vmem:[#allocation24_spill] sm:$0xff] %v7610_v57 }
 0x24d   :  { %v7639_v21 = vpop.f32.mrf.mxu2 }
 0x24e   :  { %9447 = vst [vmem:[#allocation31_spill] sm:$0xff] %v7639_v21  ;;  %v6932_v21 = vld [vmem:[%s9404_s0 + $0x138] sm:$0xff] }
 0x252   :  { %v7621_v13 = vpop.f32.mrf.mxu0 }
 0x253   :  { %9442 = vst [vmem:[#allocation26_spill] sm:$0xff] %v7621_v13  ;;  %v6940_v13 = vld [vmem:[%s9404_s0 + $0x178] sm:$0xff] }
 0x255   :  { %6002 = vmatmul.msk.bf16.gmra.mxu0 %vm1063_vm0, %v6930_v20  ;;  %v6969_v20 = vld [vmem:[%s9404_s0 + $0x260] sm:$0xff]  ;;  %v7648_v11 = vpop.f32.mrf.mxu2 }
 0x256   :  { %6041 = vmatmul.msk.bf16.vlgmr.msra.gmra.mxu1 %vm1063_vm0, %v6969_v20  ;;  %9449 = vst [vmem:[#allocation33_spill] sm:$0xff] %v7648_v11 }
 0x257   :  { %6079 = vmatmul.msk.bf16.gmra.mxu2 %vm1063_vm0, %v7007_v16  ;;  %v7008_v16 = vld [vmem:[%s9404_s0 + $0x398] sm:$0xff] }
 0x25a   :  { %v7626_v54 = vpop.f32.mrf.mxu0 }
 0x25b   :  { %9444 = vst [vmem:[#allocation28_spill] sm:$0xff] %v7626_v54 }
 0x25d   :  { %v7659_v54 = vpop.f32.mrf.mxu2 }
 0x25e   :  { %9451 = vst [vmem:[#allocation35_spill] sm:$0xff] %v7659_v54  ;;  %v6933_v54 = vld [vmem:[%s9404_s0 + $0x140] sm:$0xff] }
 0x262   :  { %v7637_v17 = vpop.f32.mrf.mxu0 }
 0x263   :  { %9446 = vst [vmem:[#allocation30_spill] sm:$0xff] %v7637_v17 }
 0x265   :  { %6003 = vmatmul.msk.bf16.gmra.mxu0 %vm1063_vm0, %v6931_v14  ;;  %v6970_v14 = vld [vmem:[%s9404_s0 + $0x268] sm:$0xff]  ;;  %v7668_v11 = vpop.f32.mrf.mxu2 }
 0x266   :  { %6042 = vmatmul.msk.bf16.gmra.mxu1 %vm1063_vm0, %v6970_v14  ;;  %9453 = vst [vmem:[#allocation37_spill] sm:$0xff] %v7668_v11 }
 0x267   :  { %6080 = vmatmul.msk.bf16.gmra.mxu2 %vm1063_vm0, %v7008_v16  ;;  %v7009_v16 = vld [vmem:[%s9404_s0 + $0x3a0] sm:$0xff] }
 0x26a   :  { %v7646_v10 = vpop.f32.mrf.mxu0 }
 0x26b   :  { %9448 = vst [vmem:[#allocation32_spill] sm:$0xff] %v7646_v10 }
 0x26d   :  { %v7679_v10 = vpop.f32.mrf.mxu2 }
 0x26e   :  { %9455 = vst [vmem:[#allocation39_spill] sm:$0xff] %v7679_v10  ;;  %v6934_v10 = vld [vmem:[%s9404_s0 + $0x148] sm:$0xff] }
 0x272   :  { %v7657_v17 = vpop.f32.mrf.mxu0 }
 0x273   :  { %9450 = vst [vmem:[#allocation34_spill] sm:$0xff] %v7657_v17 }
 0x275   :  { %6004 = vmatmul.msk.bf16.gmra.mxu0 %vm1063_vm0, %v6932_v21  ;;  %v6971_v21 = vld [vmem:[%s9404_s0 + $0x270] sm:$0xff]  ;;  %v7688_v11 = vpop.f32.mrf.mxu2 }
 0x276   :  { %6043 = vmatmul.msk.bf16.gmra.mxu1 %vm1063_vm0, %v6971_v21  ;;  %9457 = vst [vmem:[#allocation41_spill] sm:$0xff] %v7688_v11 }
 0x277   :  { %6081 = vmatmul.msk.bf16.gmra.mxu2 %vm1063_vm0, %v7009_v16 }
 0x27a   :  { %v7666_v20 = vpop.f32.mrf.mxu0 }
 0x27b   :  { %9452 = vst [vmem:[#allocation36_spill] sm:$0xff] %v7666_v20 }
 0x27d   :  { %v7699_v20 = vpop.f32.mrf.mxu2 }
 0x27e   :  { %9459 = vst [vmem:[#allocation43_spill] sm:$0xff] %v7699_v20  ;;  %v6935_v20 = vld [vmem:[%s9404_s0 + $0x150] sm:$0xff] }
 0x282   :  { %v7677_v17 = vpop.f32.mrf.mxu0 }
 0x283   :  { %9454 = vst [vmem:[#allocation38_spill] sm:$0xff] %v7677_v17 }
 0x285   :  { %6005 = vmatmul.msk.bf16.gmra.mxu0 %vm1063_vm0, %v6933_v54  ;;  %v6972_v54 = vld [vmem:[%s9404_s0 + $0x278] sm:$0xff]  ;;  %v7708_v11 = vpop.f32.mrf.mxu2 }
 0x286   :  { %6044 = vmatmul.msk.bf16.gmra.mxu1 %vm1063_vm0, %v6972_v54  ;;  %9461 = vst [vmem:[#allocation45_spill] sm:$0xff] %v7708_v11  ;;  %v7012_v54 = vld [vmem:[%s9404_s0 + $0x3b8] sm:$0xff] }
 0x287   :  { %6084 = vmatmul.msk.bf16.vlgmr.msra.gmra.mxu3 %vm1063_vm0, %v7012_v54  ;;  %v6974_v54 = vld [vmem:[%s9404_s0 + $0x288] sm:$0xff] }
 0x28a   :  { %v7686_v14 = vpop.f32.mrf.mxu0 }
 0x28b   :  { %9456 = vst [vmem:[#allocation40_spill] sm:$0xff] %v7686_v14 }
 0x28d   :  { %v7719_v14 = vpop.f32.mrf.mxu2 }
 0x28e   :  { %9463 = vst [vmem:[#allocation47_spill] sm:$0xff] %v7719_v14  ;;  %v7010_v14 = vld [vmem:[%s9404_s0 + $0x3a8] sm:$0xff] }
 0x28f   :  { %6082 = vmatmul.msk.bf16.gmra.mxu2 %vm1063_vm0, %v7010_v14  ;;  %v7013_v14 = vld [vmem:[%s9404_s0 + $0x3c0] sm:$0xff] }
 0x292   :  { %v7697_v17 = vpop.f32.mrf.mxu0 }
 0x293   :  { %9458 = vst [vmem:[#allocation42_spill] sm:$0xff] %v7697_v17 }
 0x295   :  { %6006 = vmatmul.msk.bf16.gmra.mxu0 %vm1063_vm0, %v6934_v10  ;;  %v6973_v10 = vld [vmem:[%s9404_s0 + $0x280] sm:$0xff]  ;;  %v7732_v11 = vpop.f32.mrf.mxu2 }
 0x296   :  { %6045 = vmatmul.msk.bf16.gmra.mxu1 %vm1063_vm0, %v6973_v10  ;;  %9465 = vst [vmem:[#allocation49_spill] sm:$0xff] %v7732_v11 }
 0x297   :  { %6085 = vmatmul.msk.bf16.gmra.mxu3 %vm1063_vm0, %v7013_v14  ;;  %v6975_v14 = vld [vmem:[%s9404_s0 + $0x290] sm:$0xff] }
 0x29a   :  { %v7706_v21 = vpop.f32.mrf.mxu0 }
 0x29b   :  { %9460 = vst [vmem:[#allocation44_spill] sm:$0xff] %v7706_v21 }
 0x2a2   :  { %v7717_v17 = vpop.f32.mrf.mxu0 }
 0x2a3   :  { %9462 = vst [vmem:[#allocation46_spill] sm:$0xff] %v7717_v17  ;;  %v7743_v17 = vpop.f32.mrf.mxu2 }
 0x2a4   :  { %9467 = vst [vmem:[#allocation51_spill] sm:$0xff] %v7743_v17  ;;  %v7011_v17 = vld [vmem:[%s9404_s0 + $0x3b0] sm:$0xff] }
 0x2a5   :  { %6007 = vmatmul.msk.bf16.gmra.mxu0 %vm1063_vm0, %v6935_v20  ;;  %v6936_v20 = vld [vmem:[%s9404_s0 + $0x158] sm:$0xff]  ;;  %6083 = vmatmul.msk.bf16.gmra.mxu2 %vm1063_vm0, %v7011_v17  ;;  %v7014_v17 = vld [vmem:[%s9404_s0 + $0x3c8] sm:$0xff] }
 0x2a6   :  { %6046 = vmatmul.msk.bf16.gmra.mxu1 %vm1063_vm0, %v6974_v54 }
 0x2a7   :  { %6086 = vmatmul.msk.bf16.gmra.mxu3 %vm1063_vm0, %v7014_v17 }
 0x2aa   :  { %v7730_v16 = vpop.f32.mrf.mxu0 }
 0x2ab   :  { %9464 = vst [vmem:[#allocation48_spill] sm:$0xff] %v7730_v16  ;;  %v7756_v16 = vpop.f32.mrf.mxu2 }
 0x2ac   :  { %9469 = vst [vmem:[#allocation53_spill] sm:$0xff] %v7756_v16 }
 0x2b2   :  { %v7741_v10 = vpop.f32.mrf.mxu0 }
 0x2b3   :  { %9466 = vst [vmem:[#allocation50_spill] sm:$0xff] %v7741_v10  ;;  %v7767_v10 = vpop.f32.mrf.mxu2 }
 0x2b4   :  { %9471 = vst [vmem:[#allocation55_spill] sm:$0xff] %v7767_v10  ;;  %v6938_v10 = vld [vmem:[%s9404_s0 + $0x168] sm:$0xff] }
 0x2b5   :  { %6008 = vmatmul.msk.bf16.gmra.mxu0 %vm1063_vm0, %v6936_v20  ;;  %v6937_v20 = vld [vmem:[%s9404_s0 + $0x160] sm:$0xff] }
 0x2b6   :  { %6047 = vmatmul.msk.bf16.gmra.mxu1 %vm1063_vm0, %v6975_v14  ;;  %v7015_v14 = vld [vmem:[%s9404_s0 + $0x3d0] sm:$0xff] }
 0x2b7   :  { %6087 = vmatmul.msk.bf16.gmra.mxu3 %vm1063_vm0, %v7015_v14  ;;  %v7016_v14 = vld [vmem:[%s9404_s0 + $0x3d8] sm:$0xff] }
 0x2ba   :  { %v7754_v11 = vpop.f32.mrf.mxu0 }
 0x2bb   :  { %9468 = vst [vmem:[#allocation52_spill] sm:$0xff] %v7754_v11  ;;  %v7780_v11 = vpop.f32.mrf.mxu2 }
 0x2bc   :  { %9473 = vst [vmem:[#allocation57_spill] sm:$0xff] %v7780_v11 }
 0x2c2   :  { %v7765_v54 = vpop.f32.mrf.mxu0 }
 0x2c3   :  { %9470 = vst [vmem:[#allocation54_spill] sm:$0xff] %v7765_v54  ;;  %v7787_v21 = vpop.f32.mrf.mxu2 }
 0x2c4   :  { %9475 = vst [vmem:[#allocation59_spill] sm:$0xff] %v7787_v21  ;;  %v6939_v21 = vld [vmem:[%s9404_s0 + $0x170] sm:$0xff] }
 0x2c5   :  { %6009 = vmatmul.msk.bf16.gmra.mxu0 %vm1063_vm0, %v6937_v20  ;;  %v6976_v20 = vld [vmem:[%s9404_s0 + $0x298] sm:$0xff] }
 0x2c6   :  { %6048 = vmatmul.msk.bf16.gmra.mxu1 %vm1063_vm0, %v6976_v20  ;;  %v6977_v20 = vld [vmem:[%s9404_s0 + $0x2a0] sm:$0xff] }
 0x2c7   :  { %6088 = vmatmul.msk.bf16.gmra.mxu3 %vm1063_vm0, %v7016_v14 }
 0x2ca   :  { %v7778_v16 = vpop.f32.mrf.mxu0 }
 0x2cb   :  { %9472 = vst [vmem:[#allocation56_spill] sm:$0xff] %v7778_v16  ;;  %v7800_v11 = vpop.f32.mrf.mxu2 }
 0x2cc   :  { %9477 = vst [vmem:[#allocation61_spill] sm:$0xff] %v7800_v11 }
 0x2d2   :  { %v7785_v54 = vpop.f32.mrf.mxu0 }
 0x2d3   :  { %9474 = vst [vmem:[#allocation58_spill] sm:$0xff] %v7785_v54  ;;  %v1885_v16 = vpop.f32.mrf.mxu1 }
 0x2d5   :  { %6010 = vmatmul.msk.bf16.gmra.mxu0 %vm1063_vm0, %v6938_v10  ;;  %v2065_v10 = vpop.f32.mrf.mxu2 }
 0x2d6   :  { %6049 = vmatmul.msk.bf16.gmra.mxu1 %vm1063_vm0, %v6977_v20  ;;  %v7017_v20 = vld [vmem:[%s9404_s0 + $0x3e0] sm:$0xff] }
 0x2d7   :  { %6089 = vmatmul.msk.bf16.gmra.mxu3 %vm1063_vm0, %v7017_v20  ;;  %v6979_v20 = vld [vmem:[%s9404_s0 + $0x2b0] sm:$0xff] }
 0x2da   :  { %v7798_v17 = vpop.f32.mrf.mxu0 }
 0x2db   :  { %9476 = vst [vmem:[#allocation60_spill] sm:$0xff] %v7798_v17  ;;  %v1887_v17 = vpop.f32.mrf.mxu1 }
 0x2e2   :  { %v7805_v54 = vpop.f32.mrf.mxu0 }
 0x2e3   :  { %9478 = vst [vmem:[#allocation62_spill] sm:$0xff] %v7805_v54  ;;  %v2067_v54 = vpop.f32.mrf.mxu2  ;;  %v1890_v57 = vpop.f32.mrf.mxu1 }
 0x2e5   :  { %6011 = vmatmul.msk.bf16.gmra.mxu0 %vm1063_vm0, %v6939_v21  ;;  %v6978_v21 = vld [vmem:[%s9404_s0 + $0x2a8] sm:$0xff] }
 0x2e6   :  { %6050 = vmatmul.msk.bf16.gmra.mxu1 %vm1063_vm0, %v6978_v21 }
 0x2ea   :  { %v7816_v11 = vpop.f32.mrf.mxu0 }
 0x2eb   :  { %9479 = vst [vmem:[#allocation63_spill] sm:$0xff] %v7816_v11  ;;  %v2070_v14 = vpop.f32.mrf.mxu2  ;;  %v1892_v45 = vpop.f32.mrf.mxu1 }
 0x2ec   :  { %v2307_v8 = vmax.f32 %v1890_v57, %v2070_v14  ;;  %v7019_v57 = vld [vmem:[%s9404_s0 + $0x3f0] sm:$0xff] }
 0x2f2   :  { %v7821_v1 = vpop.f32.mrf.mxu0 }
 0x2f3   :  { %9480 = vst [vmem:[#allocation64_spill] sm:$0xff] %v7821_v1  ;;  %v2305_v1 = vmax.f32 %v1885_v16, %v2065_v10  ;;  %v2072_v33 = vpop.f32.mrf.mxu2  ;;  %v7018_v16 = vld [vmem:[%s9404_s0 + $0x3e8] sm:$0xff]  ;;  %v2306_v10 = vmax.f32 %v1887_v17, %v2067_v54 }
 0x2f4   :  { %6090 = vmatmul.msk.bf16.gmra.mxu3 %vm1063_vm0, %v7018_v16  ;;  %v2308_v14 = vmax.f32 %v1892_v45, %v2072_v33 }
 0x2f5   :  { %6012 = vmatmul.msk.bf16.gmra.mxu0 %vm1063_vm0, %v6940_v13  ;;  %v1895_v13 = vpop.f32.mrf.mxu1 }
 0x2f6   :  { %6051 = vmatmul.msk.bf16.gmra.mxu1 %vm1063_vm0, %v6979_v20 }
 0x2fa   :  { %v7832_v11 = vpop.f32.mrf.mxu0 }
 0x2fb   :  { %9481 = vst [vmem:[#allocation65_spill] sm:$0xff] %v7832_v11 }
 0x2fd   :  { %v1897_v5 = vpop.f32.mrf.mxu1 }
 0x302   :  { %v1705_v18 = vpop.f32.mrf.mxu0 }
 0x303   :  { %v2233_v21 = vmax.f32 %v7353_v22, %v1705_v18 }
 0x304   :  { %6091 = vmatmul.msk.bf16.gmra.mxu3 %vm1063_vm0, %v7019_v57 }
 0x305   :  { %v2377_v11 = vmax.f32 %v2233_v21, %v2305_v1  ;;  %6013 = vmatmul.msk.bf16.gmra.mxu0 %vm1063_vm0, %v6941_v19  ;;  %v2075_v21 = vpop.f32.mrf.mxu2  ;;  %v1900_v54 = vpop.f32.mrf.mxu1 }
 0x307   :  { %v2453_v22 = vadd.f32 %v7841_v9, %v2377_v11  ;;  %v6942_v11 = vld [vmem:[%s9404_s0 + $0x188] sm:$0xff] }
 0x309   :  { %v2525_v18 = vmax.f32 %v2453_v22, 0.0 }
 0x30a   :  { %v1707_v0 = vpop.f32.mrf.mxu0 }
 0x30b   :  { %v2597_v42 = vpack.c.bf16 %v2525_v18, %v2525_v18  ;;  %v2234_v1 = vmax.f32 %v7356_v23, %v1707_v0  ;;  %v6980_v23 = vld [vmem:[%s9404_s0 + $0x2b8] sm:$0xff] }
 0x30c   :  { %6052 = vmatmul.msk.bf16.gmra.mxu1 %vm1063_vm0, %v6980_v23 }
 0x30d   :  { %2670 = vst.msk [vmem:[#allocation2 + $0x20] sm:$0xf] %vm2661_vm1, %v2597_v42  ;;  %v2378_v19 = vmax.f32 %v2234_v1, %v2306_v10  ;;  %v2077_v0 = vpop.f32.mrf.mxu2  ;;  %v1902_v10 = vpop.f32.mrf.mxu1 }
 0x30f   :  { %v2454_v20 = vadd.f32 %v7841_v9, %v2378_v19 }
 0x311   :  { %v2526_v30 = vmax.f32 %v2454_v20, 0.0 }
 0x312   :  { %v1710_v16 = vpop.f32.mrf.mxu0 }
 0x313   :  { %v2598_v17 = vpack.c.bf16 %v2526_v30, %v2526_v30  ;;  %v2235_v22 = vmax.f32 %v7361_v25, %v1710_v16 }
 0x315   :  { %2671 = vst.msk [vmem:[#allocation2 + $0x24] sm:$0xf] %vm2661_vm1, %v2598_v17  ;;  %v2379_v42 = vmax.f32 %v2235_v22, %v2307_v8  ;;  %6014 = vmatmul.msk.bf16.gmra.mxu0 %vm1063_vm0, %v6942_v11  ;;  %v2080_v11 = vpop.f32.mrf.mxu2  ;;  %v2309_v17 = vmax.f32 %v1895_v13, %v2075_v21  ;;  %v6943_v22 = vld [vmem:[%s9404_s0 + $0x190] sm:$0xff]  ;;  %v7020_v13 = vld [vmem:[%s9404_s0 + $0x3f8] sm:$0xff] }
 0x316   :  { %6092 = vmatmul.msk.bf16.gmra.mxu3 %vm1063_vm0, %v7020_v13 }
 0x317   :  { %v2455_v30 = vadd.f32 %v7841_v9, %v2379_v42  ;;  %v1905_v42 = vpop.f32.mrf.mxu1 }
 0x319   :  { %v2527_v25 = vmax.f32 %v2455_v30, 0.0  ;;  %v2310_v30 = vmax.f32 %v1897_v5, %v2077_v0 }
 0x31a   :  { %v1712_v18 = vpop.f32.mrf.mxu0 }
 0x31b   :  { %v2599_v1 = vpack.c.bf16 %v2527_v25, %v2527_v25  ;;  %v2236_v8 = vmax.f32 %v7364_v26, %v1712_v18  ;;  %v6981_v26 = vld [vmem:[%s9404_s0 + $0x2c0] sm:$0xff] }
 0x31c   :  { %6053 = vmatmul.msk.bf16.gmra.mxu1 %vm1063_vm0, %v6981_v26 }
 0x31d   :  { %2672 = vst.msk [vmem:[#allocation2 + $0x28] sm:$0xf] %vm2661_vm1, %v2599_v1  ;;  %v2380_v19 = vmax.f32 %v2236_v8, %v2308_v14  ;;  %v2082_v25 = vpop.f32.mrf.mxu2 }
 0x31f   :  { %v2456_v20 = vadd.f32 %v7841_v9, %v2380_v19  ;;  %v1907_v18 = vpop.f32.mrf.mxu1  ;;  %v7890_v19 = vpop.f32.mrf.mxu3 }
 0x321   :  { %v2528_v16 = vmax.f32 %v2456_v20, 0.0 }
 0x322   :  { %v1715_v23 = vpop.f32.mrf.mxu0 }
 0x323   :  { %v2600_v33 = vpack.c.bf16 %v2528_v16, %v2528_v16  ;;  %v2237_v45 = vmax.f32 %v7369_v28, %v1715_v23  ;;  %v6944_v23 = vld [vmem:[%s9404_s0 + $0x198] sm:$0xff] }
 0x325   :  { %2673 = vst.msk [vmem:[#allocation2 + $0x2c] sm:$0xf] %vm2661_vm1, %v2600_v33  ;;  %v2381_v57 = vmax.f32 %v2237_v45, %v2309_v17  ;;  %6015 = vmatmul.msk.bf16.gmra.mxu0 %vm1063_vm0, %v6943_v22  ;;  %v2311_v22 = vmax.f32 %v1900_v54, %v2080_v11  ;;  %v7021_v11 = vld [vmem:[%s9404_s0 + $0x400] sm:$0xff] }
 0x326   :  { %6093 = vmatmul.msk.bf16.gmra.mxu3 %vm1063_vm0, %v7021_v11 }
 0x327   :  { %v2457_v21 = vadd.f32 %v7841_v9, %v2381_v57  ;;  %v7897_v0 = vpop.f32.mrf.mxu1  ;;  %v7900_v26 = vpop.f32.mrf.mxu3  ;;  %v6982_v57 = vld [vmem:[%s9404_s0 + $0x2c8] sm:$0xff] }
 0x329   :  { %v2529_v28 = vmax.f32 %v2457_v21, 0.0  ;;  %v2312_v21 = vmax.f32 %v1902_v10, %v2082_v25 }
 0x32a   :  { %v1717_v14 = vpop.f32.mrf.mxu0 }
 0x32b   :  { %v2601_v1 = vpack.c.bf16 %v2529_v28, %v2529_v28  ;;  %v2238_v8 = vmax.f32 %v7372_v29, %v1717_v14  ;;  %v2085_v29 = vpop.f32.mrf.mxu2 }
 0x32c   :  { %6054 = vmatmul.msk.bf16.gmra.mxu1 %vm1063_vm0, %v6982_v57  ;;  %v6983_v57 = vld [vmem:[%s9404_s0 + $0x2d0] sm:$0xff] }
 0x32d   :  { %2674 = vst.msk [vmem:[#allocation2 + $0x30] sm:$0xf] %vm2661_vm1, %v2601_v1  ;;  %v2382_v20 = vmax.f32 %v2238_v8, %v2310_v30 }
 0x32f   :  { %v2458_v16 = vadd.f32 %v7841_v9, %v2382_v20  ;;  %v1912_v30 = vpop.f32.mrf.mxu1  ;;  %v7914_v8 = vpop.f32.mrf.mxu3 }
 0x331   :  { %v2530_v17 = vmax.f32 %v2458_v16, 0.0 }
 0x332   :  { %v1720_v5 = vpop.f32.mrf.mxu0 }
 0x333   :  { %v2602_v33 = vpack.c.bf16 %v2530_v17, %v2530_v17  ;;  %v2239_v45 = vmax.f32 %v7377_v31, %v1720_v5  ;;  %v2087_v16 = vpop.f32.mrf.mxu2  ;;  %v6945_v5 = vld [vmem:[%s9404_s0 + $0x1a0] sm:$0xff] }
 0x335   :  { %2675 = vst.msk [vmem:[#allocation2 + $0x34] sm:$0xf] %vm2661_vm1, %v2602_v33  ;;  %v2383_v54 = vmax.f32 %v2239_v45, %v2311_v22  ;;  %6016 = vmatmul.msk.bf16.gmra.mxu0 %vm1063_vm0, %v6944_v23  ;;  %v2313_v23 = vmax.f32 %v1905_v42, %v2085_v29  ;;  %v7022_v42 = vld [vmem:[%s9404_s0 + $0x408] sm:$0xff] }
 0x336   :  { %6094 = vmatmul.msk.bf16.gmra.mxu3 %vm1063_vm0, %v7022_v42 }
 0x337   :  { %v2459_v31 = vadd.f32 %v7841_v9, %v2383_v54  ;;  %v1915_v25 = vpop.f32.mrf.mxu1 }
 0x339   :  { %v2531_v13 = vmax.f32 %v2459_v31, 0.0  ;;  %v2314_v31 = vmax.f32 %v1907_v18, %v2087_v16 }
 0x33a   :  { %v1722_v28 = vpop.f32.mrf.mxu0 }
 0x33b   :  { %v2603_v14 = vpack.c.bf16 %v2531_v13, %v2531_v13  ;;  %v2240_v1 = vmax.f32 %v7380_v32, %v1722_v28  ;;  %v7922_v32 = vpop.f32.mrf.mxu3 }
 0x33c   :  { %6055 = vmatmul.msk.bf16.gmra.mxu1 %vm1063_vm0, %v6983_v57  ;;  %v6984_v57 = vld [vmem:[%s9404_s0 + $0x2d8] sm:$0xff] }
 0x33d   :  { %2676 = vst.msk [vmem:[#allocation2 + $0x38] sm:$0xf] %vm2661_vm1, %v2603_v14  ;;  %v2384_v20 = vmax.f32 %v2240_v1, %v2312_v21 }
 0x33f   :  { %v2460_v17 = vadd.f32 %v7841_v9, %v2384_v20  ;;  %v1917_v21 = vpop.f32.mrf.mxu1 }
 0x341   :  { %v2532_v22 = vmax.f32 %v2460_v17, 0.0 }
 0x342   :  { %v1725_v10 = vpop.f32.mrf.mxu0 }
 0x343   :  { %v2604_v33 = vpack.c.bf16 %v2532_v22, %v2532_v22  ;;  %v2241_v45 = vmax.f32 %v7385_v34, %v1725_v10  ;;  %v2090_v34 = vpop.f32.mrf.mxu2  ;;  %v7936_v1 = vpop.f32.mrf.mxu3 }
 0x345   :  { %2677 = vst.msk [vmem:[#allocation2 + $0x3c] sm:$0xf] %vm2661_vm1, %v2604_v33  ;;  %v2385_v54 = vmax.f32 %v2241_v45, %v2313_v23  ;;  %6017 = vmatmul.msk.bf16.gmra.mxu0 %vm1063_vm0, %v6945_v5  ;;  %v2315_v23 = vmax.f32 %v7897_v0, %v2090_v34  ;;  %v6946_v5 = vld [vmem:[%s9404_s0 + $0x1a8] sm:$0xff]  ;;  %v7023_v0 = vld [vmem:[%s9404_s0 + $0x410] sm:$0xff] }
 0x346   :  { %6095 = vmatmul.msk.bf16.gmra.mxu3 %vm1063_vm0, %v7023_v0 }
 0x347   :  { %v2461_v29 = vadd.f32 %v7841_v9, %v2385_v54  ;;  %v1920_v10 = vpop.f32.mrf.mxu1 }
 0x349   :  { %v2533_v11 = vmax.f32 %v2461_v29, 0.0 }
 0x34a   :  { %v1727_v13 = vpop.f32.mrf.mxu0 }
 0x34b   :  { %v2605_v28 = vpack.c.bf16 %v2533_v11, %v2533_v11  ;;  %v2242_v14 = vmax.f32 %v7388_v35, %v1727_v13  ;;  %v2092_v18 = vpop.f32.mrf.mxu2  ;;  %v7945_v45 = vpop.f32.mrf.mxu3 }
 0x34c   :  { %6056 = vmatmul.msk.bf16.gmra.mxu1 %vm1063_vm0, %v6984_v57  ;;  %v2316_v29 = vmax.f32 %v1912_v30, %v2092_v18 }
 0x34d   :  { %2678 = vst.msk [vmem:[#allocation2 + $0x40] sm:$0xf] %vm2661_vm1, %v2605_v28  ;;  %v2386_v20 = vmax.f32 %v2242_v14, %v2314_v31 }
 0x34f   :  { %v2462_v17 = vadd.f32 %v7841_v9, %v2386_v20  ;;  %v1922_v11 = vpop.f32.mrf.mxu1 }
 0x351   :  { %v2534_v22 = vmax.f32 %v2462_v17, 0.0 }
 0x352   :  { %v1730_v16 = vpop.f32.mrf.mxu0 }
 0x353   :  { %v2606_v33 = vpack.c.bf16 %v2534_v22, %v2534_v22  ;;  %v2243_v35 = vmax.f32 %v7393_v37, %v1730_v16  ;;  %v7959_v28 = vpop.f32.mrf.mxu3  ;;  %v2095_v14 = vpop.f32.mrf.mxu2 }
 0x355   :  { %2679 = vst.msk [vmem:[#allocation2 + $0x44] sm:$0xf] %vm2661_vm1, %v2606_v33  ;;  %v2387_v54 = vmax.f32 %v2243_v35, %v2315_v23  ;;  %6018 = vmatmul.msk.bf16.gmra.mxu0 %vm1063_vm0, %v6946_v5  ;;  %v2317_v23 = vmax.f32 %v1915_v25, %v2095_v14  ;;  %v6947_v5 = vld [vmem:[%s9404_s0 + $0x1b0] sm:$0xff]  ;;  %v6985_v35 = vld [vmem:[%s9404_s0 + $0x2e0] sm:$0xff]  ;;  %v7024_v25 = vld [vmem:[%s9404_s0 + $0x418] sm:$0xff] }
 0x356   :  { %6096 = vmatmul.msk.bf16.gmra.mxu3 %vm1063_vm0, %v7024_v25 }
 0x357   :  { %v2463_v42 = vadd.f32 %v7841_v9, %v2387_v54  ;;  %v1925_v18 = vpop.f32.mrf.mxu1 }
 0x359   :  { %v2535_v37 = vmax.f32 %v2463_v42, 0.0 }
 0x35a   :  { %v1732_v34 = vpop.f32.mrf.mxu0 }
 0x35b   :  { %v2607_v31 = vpack.c.bf16 %v2535_v37, %v2535_v37  ;;  %v2244_v13 = vmax.f32 %v7396_v38, %v1732_v34  ;;  %v7967_v38 = vpop.f32.mrf.mxu3  ;;  %v2097_v54 = vpop.f32.mrf.mxu2 }
 0x35c   :  { %6057 = vmatmul.msk.bf16.gmra.mxu1 %vm1063_vm0, %v6985_v35  ;;  %v2318_v42 = vmax.f32 %v1917_v21, %v2097_v54 }
 0x35d   :  { %2680 = vst.msk [vmem:[#allocation2 + $0x48] sm:$0xf] %vm2661_vm1, %v2607_v31  ;;  %v2388_v20 = vmax.f32 %v2244_v13, %v2316_v29 }
 0x35f   :  { %v2464_v17 = vadd.f32 %v7841_v9, %v2388_v20  ;;  %v1927_v29 = vpop.f32.mrf.mxu1 }
 0x361   :  { %v2536_v22 = vmax.f32 %v2464_v17, 0.0 }
 0x362   :  { %v1735_v30 = vpop.f32.mrf.mxu0 }
 0x363   :  { %v2608_v16 = vpack.c.bf16 %v2536_v22, %v2536_v22  ;;  %v2245_v33 = vmax.f32 %v7401_v40, %v1735_v30  ;;  %v7981_v13 = vpop.f32.mrf.mxu3  ;;  %v2319_v22 = vmax.f32 %v1920_v10, %v7890_v19  ;;  %v7025_v19 = vld [vmem:[%s9404_s0 + $0x420] sm:$0xff] }
 0x365   :  { %2681 = vst.msk [vmem:[#allocation2 + $0x4c] sm:$0xf] %vm2661_vm1, %v2608_v16  ;;  %v2389_v57 = vmax.f32 %v2245_v33, %v2317_v23  ;;  %6019 = vmatmul.msk.bf16.gmra.mxu0 %vm1063_vm0, %v6947_v5  ;;  %v6948_v23 = vld [vmem:[%s9404_s0 + $0x1b8] sm:$0xff]  ;;  %v6986_v33 = vld [vmem:[%s9404_s0 + $0x2e8] sm:$0xff] }
 0x366   :  { %6097 = vmatmul.msk.bf16.gmra.mxu3 %vm1063_vm0, %v7025_v19 }
 0x367   :  { %v2465_v40 = vadd.f32 %v7841_v9, %v2389_v57  ;;  %v1930_v5 = vpop.f32.mrf.mxu1  ;;  %v2320_v57 = vmax.f32 %v1922_v11, %v7900_v26 }
 0x369   :  { %v2537_v0 = vmax.f32 %v2465_v40, 0.0 }
 0x36a   :  { %v1737_v37 = vpop.f32.mrf.mxu0 }
 0x36b   :  { %v2609_v34 = vpack.c.bf16 %v2537_v0, %v2537_v0  ;;  %v2246_v31 = vmax.f32 %v7404_v41, %v1737_v37  ;;  %v7990_v41 = vpop.f32.mrf.mxu3 }
 0x36c   :  { %6058 = vmatmul.msk.bf16.gmra.mxu1 %vm1063_vm0, %v6986_v33 }
 0x36d   :  { %2682 = vst.msk [vmem:[#allocation2 + $0x50] sm:$0xf] %vm2661_vm1, %v2609_v34  ;;  %v2390_v14 = vmax.f32 %v2246_v31, %v2318_v42 }
 0x36f   :  { %v2466_v20 = vadd.f32 %v7841_v9, %v2390_v14  ;;  %v1932_v54 = vpop.f32.mrf.mxu1  ;;  %v2321_v14 = vmax.f32 %v1925_v18, %v7914_v8  ;;  %v7026_v8 = vld [vmem:[%s9404_s0 + $0x428] sm:$0xff] }
 0x371   :  { %v2538_v17 = vmax.f32 %v2466_v20, 0.0  ;;  %v6949_v20 = vld [vmem:[%s9404_s0 + $0x1c0] sm:$0xff] }
 0x372   :  { %v1740_v21 = vpop.f32.mrf.mxu0 }
 0x373   :  { %v2610_v30 = vpack.c.bf16 %v2538_v17, %v2538_v17  ;;  %v2247_v16 = vmax.f32 %v7409_v43, %v1740_v21  ;;  %v8005_v42 = vpop.f32.mrf.mxu3 }
 0x375   :  { %2683 = vst.msk [vmem:[#allocation2 + $0x54] sm:$0xf] %vm2661_vm1, %v2610_v30  ;;  %v2391_v35 = vmax.f32 %v2247_v16, %v2319_v22  ;;  %6020 = vmatmul.msk.bf16.gmra.mxu0 %vm1063_vm0, %v6948_v23  ;;  %v6987_v23 = vld [vmem:[%s9404_s0 + $0x2f0] sm:$0xff]  ;;  %v2322_v30 = vmax.f32 %v1927_v29, %v7922_v32 }
 0x376   :  { %6098 = vmatmul.msk.bf16.gmra.mxu3 %vm1063_vm0, %v7026_v8 }
 0x377   :  { %v2467_v10 = vadd.f32 %v7841_v9, %v2391_v35  ;;  %v1935_v11 = vpop.f32.mrf.mxu1 }
 0x379   :  { %v2539_v43 = vmax.f32 %v2467_v10, 0.0 }
 0x37a   :  { %v1742_v25 = vpop.f32.mrf.mxu0 }
 0x37b   :  { %v2611_v40 = vpack.c.bf16 %v2539_v43, %v2539_v43  ;;  %v2248_v0 = vmax.f32 %v7412_v44, %v1742_v25  ;;  %v8014_v44 = vpop.f32.mrf.mxu3 }
 0x37c   :  { %6059 = vmatmul.msk.bf16.gmra.mxu1 %vm1063_vm0, %v6987_v23 }
 0x37d   :  { %2684 = vst.msk [vmem:[#allocation2 + $0x58] sm:$0xf] %vm2661_vm1, %v2611_v40  ;;  %v2392_v37 = vmax.f32 %v2248_v0, %v2320_v57  ;;  %v2323_v40 = vmax.f32 %v1930_v5, %v7936_v1  ;;  %v6950_v0 = vld [vmem:[%s9404_s0 + $0x1c8] sm:$0xff]  ;;  %v7085_v1 = vld [vmem:[%s9406_s3 + $0x58] sm:$0xff] }
 0x37e   :  { %3373 = vmatpush.bf16.msrb.mxu3 %v7085_v1 }
 0x37f   :  { %v2468_v34 = vadd.f32 %v7841_v9, %v2392_v37  ;;  %v1937_v33 = vpop.f32.mrf.mxu1 }
 0x381   :  { %v2540_v31 = vmax.f32 %v2468_v34, 0.0 }
 0x382   :  { %v1745_v26 = vpop.f32.mrf.mxu0 }
 0x383   :  { %v2612_v17 = vpack.c.bf16 %v2540_v31, %v2540_v31  ;;  %v2249_v22 = vmax.f32 %v7417_v46, %v1745_v26  ;;  %v8029_v10 = vpop.f32.mrf.mxu3  ;;  %v6988_v31 = vld [vmem:[%s9404_s0 + $0x2f8] sm:$0xff]  ;;  %v2324_v26 = vmax.f32 %v1932_v54, %v7945_v45 }
 0x385   :  { %2685 = vst.msk [vmem:[#allocation2 + $0x5c] sm:$0xf] %vm2661_vm1, %v2612_v17  ;;  %v2393_v21 = vmax.f32 %v2249_v22, %v2321_v14  ;;  %6021 = vmatmul.msk.bf16.gmra.mxu0 %vm1063_vm0, %v6949_v20 }
 0x387   :  { %v2469_v18 = vadd.f32 %v7841_v9, %v2393_v21 }
 0x389   :  { %v2541_v46 = vmax.f32 %v2469_v18, 0.0  ;;  %v1940_v29 = vpop.f32.mrf.mxu1 }
 0x38a   :  { %v1747_v16 = vpop.f32.mrf.mxu0 }
 0x38b   :  { %v2613_v35 = vpack.c.bf16 %v2541_v46, %v2541_v46  ;;  %v2250_v19 = vmax.f32 %v7420_v47, %v1747_v16  ;;  %v8038_v47 = vpop.f32.mrf.mxu3  ;;  %v2325_v16 = vmax.f32 %v1935_v11, %v7959_v28  ;;  %v7028_v28 = vld [vmem:[%s9404_s0 + $0x438] sm:$0xff] }
 0x38c   :  { %6060 = vmatmul.msk.bf16.gmra.mxu1 %vm1063_vm0, %v6988_v31 }
 0x38d   :  { %2686 = vst.msk [vmem:[#allocation2 + $0x60] sm:$0xf] %vm2661_vm1, %v2613_v35  ;;  %v2394_v43 = vmax.f32 %v2250_v19, %v2322_v30  ;;  %v6951_v35 = vld [vmem:[%s9404_s0 + $0x1d0] sm:$0xff] }
 0x38f   :  { %v2470_v57 = vadd.f32 %v7841_v9, %v2394_v43 }
 0x391   :  { %v2542_v25 = vmax.f32 %v2470_v57, 0.0  ;;  %v1942_v22 = vpop.f32.mrf.mxu1  ;;  %v6989_v57 = vld [vmem:[%s9404_s0 + $0x300] sm:$0xff] }
 0x392   :  { %v1750_v32 = vpop.f32.mrf.mxu0 }
 0x393   :  { %v2614_v37 = vpack.c.bf16 %v2542_v25, %v2542_v25  ;;  %v2251_v34 = vmax.f32 %v7425_v49, %v1750_v32  ;;  %v7027_v49 = vld [vmem:[%s9404_s0 + $0x430] sm:$0xff]  ;;  %v8056_v8 = vpop.f32.mrf.mxu3 }
 0x394   :  { %6099 = vmatmul.msk.bf16.gmra.mxu3 %vm1063_vm0, %v7027_v49 }
 0x395   :  { %2687 = vst.msk [vmem:[#allocation2 + $0x64] sm:$0xf] %vm2661_vm1, %v2614_v37  ;;  %v2395_v14 = vmax.f32 %v2251_v34, %v2323_v40  ;;  %6022 = vmatmul.msk.bf16.gmra.mxu0 %vm1063_vm0, %v6950_v0  ;;  %v2326_v40 = vmax.f32 %v1937_v33, %v7967_v38 }
 0x397   :  { %v2471_v5 = vadd.f32 %v7841_v9, %v2395_v14 }
 0x399   :  { %v2543_v20 = vmax.f32 %v2471_v5, 0.0  ;;  %v1945_v54 = vpop.f32.mrf.mxu1  ;;  %v2327_v5 = vmax.f32 %v1940_v29, %v7981_v13  ;;  %v7065_v13 = vld [vmem:[%s9406_s3 + $0x38] sm:$0xff]  ;;  %v7029_v29 = vld [vmem:[%s9404_s0 + $0x440] sm:$0xff] }
 0x39a   :  { %v1752_v17 = vpop.f32.mrf.mxu0  ;;  %2967 = vmatpush.bf16.msrb.mxu1 %v7065_v13 }
 0x39b   :  { %v2615_v23 = vpack.c.bf16 %v2543_v20, %v2543_v20  ;;  %v2252_v21 = vmax.f32 %v7428_v50, %v1752_v17  ;;  %v8065_v50 = vpop.f32.mrf.mxu3  ;;  %v6952_v20 = vld [vmem:[%s9404_s0 + $0x1d8] sm:$0xff] }
 0x39c   :  { %6061 = vmatmul.msk.bf16.gmra.mxu1 %vm1063_vm0, %v6989_v57 }
 0x39d   :  { %2688 = vst.msk [vmem:[#allocation2 + $0x68] sm:$0xf] %vm2661_vm1, %v2615_v23  ;;  %v2396_v18 = vmax.f32 %v2252_v21, %v2324_v26 }
 0x39f   :  { %v2472_v46 = vadd.f32 %v7841_v9, %v2396_v18 }
 0x3a1   :  { %v2544_v30 = vmax.f32 %v2472_v46, 0.0  ;;  %v1947_v32 = vpop.f32.mrf.mxu1  ;;  %v2328_v46 = vmax.f32 %v1942_v22, %v7990_v41 }
 0x3a2   :  { %v1755_v45 = vpop.f32.mrf.mxu0 }
 0x3a3   :  { %v2616_v19 = vpack.c.bf16 %v2544_v30, %v2544_v30  ;;  %v2253_v43 = vmax.f32 %v7433_v52, %v1755_v45  ;;  %v8081_v14 = vpop.f32.mrf.mxu3 }
 0x3a4   :  { %6100 = vmatmul.msk.bf16.gmra.mxu3 %vm1063_vm0, %v7028_v28  ;;  %v6953_v28 = vld [vmem:[%s9404_s0 + $0x1e0] sm:$0xff] }
 0x3a5   :  { %2689 = vst.msk [vmem:[#allocation2 + $0x6c] sm:$0xf] %vm2661_vm1, %v2616_v19  ;;  %v2397_v25 = vmax.f32 %v2253_v43, %v2325_v16  ;;  %6023 = vmatmul.msk.bf16.gmra.mxu0 %vm1063_vm0, %v6951_v35 }
 0x3a7   :  { %v2473_v11 = vadd.f32 %v7841_v9, %v2397_v25  ;;  %v2329_v25 = vmax.f32 %v1945_v54, %v8005_v42  ;;  %v7030_v42 = vld [vmem:[%s9404_s0 + $0x448] sm:$0xff] }
 0x3a9   :  { %v2545_v52 = vmax.f32 %v2473_v11, 0.0  ;;  %v1950_v33 = vpop.f32.mrf.mxu1 }
 0x3aa   :  { %v1757_v0 = vpop.f32.mrf.mxu0 }
 0x3ab   :  { %v2617_v37 = vpack.c.bf16 %v2545_v52, %v2545_v52  ;;  %v2254_v34 = vmax.f32 %v7436_v53, %v1757_v0  ;;  %v6990_v53 = vld [vmem:[%s9404_s0 + $0x308] sm:$0xff]  ;;  %v8102_v21 = vpop.f32.mrf.mxu3 }
 0x3ac   :  { %6062 = vmatmul.msk.bf16.gmra.mxu1 %vm1063_vm0, %v6990_v53  ;;  %v6954_v53 = vld [vmem:[%s9404_s0 + $0x1e8] sm:$0xff] }
 0x3ad   :  { %2690 = vst.msk [vmem:[#allocation2 + $0x70] sm:$0xf] %vm2661_vm1, %v2617_v37  ;;  %v2398_v31 = vmax.f32 %v2254_v34, %v2326_v40  ;;  %v2330_v37 = vmax.f32 %v1947_v32, %v8014_v44 }
 0x3af   :  { %v2474_v1 = vadd.f32 %v7841_v9, %v2398_v31 }
 0x3b1   :  { %v2546_v49 = vmax.f32 %v2474_v1, 0.0  ;;  %v1952_v16 = vpop.f32.mrf.mxu1 }
 0x3b2   :  { %v1760_v38 = vpop.f32.mrf.mxu0 }
 0x3b3   :  { %v2618_v26 = vpack.c.bf16 %v2546_v49, %v2546_v49  ;;  %v2255_v17 = vmax.f32 %v7441_v55, %v1760_v38  ;;  %v8113_v11 = vpop.f32.mrf.mxu3 }
 0x3b4   :  { %6101 = vmatmul.msk.bf16.gmra.mxu3 %vm1063_vm0, %v7029_v29  ;;  %v7031_v29 = vld [vmem:[%s9404_s0 + $0x450] sm:$0xff] }
 0x3b5   :  { %2691 = vst.msk [vmem:[#allocation2 + $0x74] sm:$0xf] %vm2661_vm1, %v2618_v26  ;;  %v2399_v23 = vmax.f32 %v2255_v17, %v2327_v5  ;;  %6024 = vmatmul.msk.bf16.gmra.mxu0 %vm1063_vm0, %v6952_v20  ;;  %v2331_v17 = vmax.f32 %v1950_v33, %v8029_v10 }
 0x3b7   :  { %v2475_v55 = vadd.f32 %v7841_v9, %v2399_v23 }
 0x3b9   :  { %v2547_v18 = vmax.f32 %v2475_v55, 0.0  ;;  %v1955_v22 = vpop.f32.mrf.mxu1 }
 0x3ba   :  { %v1762_v30 = vpop.f32.mrf.mxu0 }
 0x3bb   :  { %v2619_v35 = vpack.c.bf16 %v2547_v18, %v2547_v18  ;;  %v2256_v45 = vmax.f32 %v7444_v56, %v1762_v30  ;;  %v6991_v56 = vld [vmem:[%s9404_s0 + $0x310] sm:$0xff]  ;;  %v8129_v5 = vpop.f32.mrf.mxu3  ;;  %v2332_v18 = vmax.f32 %v1952_v16, %v8038_v47 }
 0x3bc   :  { %6063 = vmatmul.msk.bf16.gmra.mxu1 %vm1063_vm0, %v6991_v56 }
 0x3bd   :  { %2692 = vst.msk [vmem:[#allocation2 + $0x78] sm:$0xf] %vm2661_vm1, %v2619_v35  ;;  %v2400_v19 = vmax.f32 %v2256_v45, %v2328_v46 }
 0x3bf   :  { %v2476_v43 = vadd.f32 %v7841_v9, %v2400_v19 }
 0x3c1   :  { %v2548_v57 = vmax.f32 %v2476_v43, 0.0  ;;  %v1957_v31 = vpop.f32.mrf.mxu1 }
 0x3c2   :  { %v1765_v41 = vpop.f32.mrf.mxu0  ;;  %v2334_v56 = vmax.f32 %v1957_v31, %v8065_v50 }
 0x3c3   :  { %v2620_v52 = vpack.c.bf16 %v2548_v57, %v2548_v57  ;;  %v2257_v40 = vmax.f32 %v7449_v58, %v1765_v41  ;;  %v8143_v55 = vpop.f32.mrf.mxu3 }
 0x3c4   :  { %6102 = vmatmul.msk.bf16.gmra.mxu3 %vm1063_vm0, %v7030_v42 }
 0x3c5   :  { %2693 = vst.msk [vmem:[#allocation2 + $0x7c] sm:$0xf] %vm2661_vm1, %v2620_v52  ;;  %v2401_v0 = vmax.f32 %v2257_v40, %v2329_v25  ;;  %6025 = vmatmul.msk.bf16.gmra.mxu0 %vm1063_vm0, %v6953_v28  ;;  %v2333_v25 = vmax.f32 %v1955_v22, %v8056_v8  ;;  %v6955_v28 = vld [vmem:[%s9404_s0 + $0x1f0] sm:$0xff]  ;;  %v7057_v40 = vld [vmem:[%s9406_s3 + $0x18] sm:$0xff] }
 0x3c6   :  { %v7032_v8 = vld [vmem:[%s9404_s0 + $0x458] sm:$0xff]  ;;  %3092 = vmatpush.bf16.msrb.mxu2 %v7057_v40 }
 0x3c7   :  { %v2477_v54 = vadd.f32 %v7841_v9, %v2401_v0 }
 0x3c9   :  { %v2549_v58 = vmax.f32 %v2477_v54, 0.0  ;;  %v1960_v32 = vpop.f32.mrf.mxu1 }
 0x3ca   :  { %v1767_v34 = vpop.f32.mrf.mxu0 }
 0x3cb   :  { %v2621_v1 = vpack.c.bf16 %v2549_v58, %v2549_v58  ;;  %v2258_v49 = vmax.f32 %v7452_v59, %v1767_v34  ;;  %v8151_v43 = vpop.f32.mrf.mxu3 }
 0x3cd   :  { %2694 = vst.msk [vmem:[#allocation2 + $0x80] sm:$0xf] %vm2661_vm1, %v2621_v1  ;;  %v2402_v20 = vmax.f32 %v2258_v49, %v2330_v37 }
 0x3cf   :  { %v2478_v38 = vadd.f32 %v7841_v9, %v2402_v20  ;;  %v2335_v20 = vmax.f32 %v1960_v32, %v8081_v14 }
 0x3d1   :  { %v2550_v26 = vmax.f32 %v2478_v38, 0.0  ;;  %v6956_v38 = vld [vmem:[%s9404_s0 + $0x1f8] sm:$0xff] }
 0x3d2   :  { %v1770_v44 = vpop.f32.mrf.mxu0 }
 0x3d3   :  { %v2622_v23 = vpack.c.bf16 %v2550_v26, %v2550_v26  ;;  %v2259_v13 = vmax.f32 %v7461_v62, %v1770_v44  ;;  %v1962_v62 = vpop.f32.mrf.mxu1  ;;  %v8169_v42 = vpop.f32.mrf.mxu3 }
 0x3d4   :  { %6103 = vmatmul.msk.bf16.gmra.mxu3 %vm1063_vm0, %v7031_v29 }
 0x3d5   :  { %2695 = vst.msk [vmem:[#allocation2 + $0x84] sm:$0xf] %vm2661_vm1, %v2622_v23  ;;  %v2403_v59 = vmax.f32 %v2259_v13, %v2331_v17  ;;  %6026 = vmatmul.msk.bf16.gmra.mxu0 %vm1063_vm0, %v6954_v53  ;;  %v7033_v53 = vld [vmem:[%s9404_s0 + $0x460] sm:$0xff]  ;;  %v2336_v23 = vmax.f32 %v1962_v62, %v8102_v21 }
 0x3d6   :  { %v6957_v21 = vld [vmem:[%s9404_s0 + $0x200] sm:$0xff] }
 0x3d7   :  { %v2479_v10 = vadd.f32 %v7841_v9, %v2403_v59 }
 0x3d9   :  { %v2551_v33 = vmax.f32 %v2479_v10, 0.0  ;;  %v7084_v10 = vld [vmem:[%s9406_s3 + $0x50] sm:$0xff] }
 0x3da   :  { %v1772_v46 = vpop.f32.mrf.mxu0  ;;  %3374 = vmatpush.bf16.msrb.mxu3 %v7084_v10 }
 0x3db   :  { %v2623_v30 = vpack.c.bf16 %v2551_v33, %v2551_v33  ;;  %v2260_v35 = vmax.f32 %v7464_v63, %v1772_v46  ;;  %v1965_v52 = vpop.f32.mrf.mxu1  ;;  %v8179_v17 = vpop.f32.mrf.mxu3 }
 0x3dd   :  { %2696 = vst.msk [vmem:[#allocation2 + $0x88] sm:$0xf] %vm2661_vm1, %v2623_v30  ;;  %v2404_v45 = vmax.f32 %v2260_v35, %v2332_v18  ;;  %v2337_v30 = vmax.f32 %v1965_v52, %v8113_v11 }
 0x3df   :  { %v2480_v19 = vadd.f32 %v7841_v9, %v2404_v45 }
 0x3e1   :  { %v2552_v57 = vmax.f32 %v2480_v19, 0.0 }
 0x3e2   :  { %v1775_v47 = vpop.f32.mrf.mxu0 }
 0x3e3   :  { %v2624_v16 = vpack.c.bf16 %v2552_v57, %v2552_v57  ;;  %v2261_v41 = vmax.f32 %v7473_v2, %v1775_v47  ;;  %v1967_v34 = vpop.f32.mrf.mxu1  ;;  %v8194_v33 = vpop.f32.mrf.mxu3  ;;  %v7034_v57 = vld [vmem:[%s9404_s0 + $0x468] sm:$0xff] }
 0x3e4   :  { %6104 = vmatmul.msk.bf16.gmra.mxu3 %vm1063_vm0, %v7032_v8  ;;  %v2338_v47 = vmax.f32 %v1967_v34, %v8129_v5 }
 0x3e5   :  { %2697 = vst.msk [vmem:[#allocation2 + $0x8c] sm:$0xf] %vm2661_vm1, %v2624_v16  ;;  %v2405_v63 = vmax.f32 %v2261_v41, %v2333_v25  ;;  %6027 = vmatmul.msk.bf16.gmra.mxu0 %vm1063_vm0, %v6955_v28 }
 0x3e7   :  { %v2481_v22 = vadd.f32 %v7841_v9, %v2405_v63 }
 0x3e9   :  { %v2553_v2 = vmax.f32 %v2481_v22, 0.0 }
 0x3ea   :  { %v1777_v0 = vpop.f32.mrf.mxu0 }
 0x3eb   :  { %v2625_v54 = vpack.c.bf16 %v2553_v2, %v2553_v2  ;;  %v2262_v58 = vmax.f32 %v7476_v3, %v1777_v0  ;;  %v1970_v44 = vpop.f32.mrf.mxu1  ;;  %v8208_v25 = vpop.f32.mrf.mxu3  ;;  %v6958_v2 = vld [vmem:[%s9404_s0 + $0x208] sm:$0xff] }
 0x3ec   :  { %v2339_v22 = vmax.f32 %v1970_v44, %v8143_v55  ;;  %v7035_v55 = vld [vmem:[%s9404_s0 + $0x470] sm:$0xff] }
 0x3ed   :  { %2698 = vst.msk [vmem:[#allocation2 + $0x90] sm:$0xf] %vm2661_vm1, %v2625_v54  ;;  %v2406_v37 = vmax.f32 %v2262_v58, %v2334_v56  ;;  %v7064_v58 = vld [vmem:[%s9406_s3 + $0x30] sm:$0xff] }
 0x3ee   :  { %2968 = vmatpush.bf16.msrb.mxu1 %v7064_v58  ;;  %v6959_v44 = vld [vmem:[%s9404_s0 + $0x210] sm:$0xff] }
 0x3ef   :  { %v2482_v1 = vadd.f32 %v7841_v9, %v2406_v37 }
 0x3f1   :  { %v2554_v49 = vmax.f32 %v2482_v1, 0.0 }
 0x3f2   :  { %v1780_v50 = vpop.f32.mrf.mxu0 }
 0x3f3   :  { %v2626_v31 = vpack.c.bf16 %v2554_v49, %v2554_v49  ;;  %v2263_v26 = vmax.f32 %v7485_v6, %v1780_v50  ;;  %v1972_v62 = vpop.f32.mrf.mxu1  ;;  %v8219_v0 = vpop.f32.mrf.mxu3 }
 0x3f4   :  { %6105 = vmatmul.msk.bf16.gmra.mxu3 %vm1063_vm0, %v7033_v53  ;;  %v2340_v1 = vmax.f32 %v1972_v62, %v8151_v43 }
 0x3f5   :  { %2699 = vst.msk [vmem:[#allocation2 + $0x94] sm:$0xf] %vm2661_vm1, %v2626_v31  ;;  %v2407_v3 = vmax.f32 %v2263_v26, %v2335_v20  ;;  %6028 = vmatmul.msk.bf16.gmra.mxu0 %vm1063_vm0, %v6956_v38 }
 0x3f7   :  { %v2483_v14 = vadd.f32 %v7841_v9, %v2407_v3 }
 0x3f9   :  { %v2555_v32 = vmax.f32 %v2483_v14, 0.0 }
 0x3fa   :  { %v1782_v6 = vpop.f32.mrf.mxu0 }
 0x3fb   :  { %v2627_v13 = vpack.c.bf16 %v2555_v32, %v2555_v32  ;;  %v2264_v59 = vmax.f32 %v7488_v7, %v1782_v6  ;;  %v1975_v52 = vpop.f32.mrf.mxu1  ;;  %v8234_v50 = vpop.f32.mrf.mxu3  ;;  %v7036_v6 = vld [vmem:[%s9404_s0 + $0x478] sm:$0xff] }
 0x3fc   :  { %v2341_v14 = vmax.f32 %v1975_v52, %v8169_v42 }
 0x3fd   :  { %2700 = vst.msk [vmem:[#allocation2 + $0x98] sm:$0xf] %vm2661_vm1, %v2627_v13  ;;  %v2408_v29 = vmax.f32 %v2264_v59, %v2336_v23 }
 0x3ff   :  { %v2484_v18 = vadd.f32 %v7841_v9, %v2408_v29 }
 0x401   :  { %v2556_v46 = vmax.f32 %v2484_v18, 0.0 }
 0x402   :  { %v1785_v7 = vpop.f32.mrf.mxu0 }
 0x403   :  { %v2628_v35 = vpack.c.bf16 %v2556_v46, %v2556_v46  ;;  %v2265_v45 = vmax.f32 %v7497_v12, %v1785_v7  ;;  %v1977_v37 = vpop.f32.mrf.mxu1  ;;  %v8248_v13 = vpop.f32.mrf.mxu3 }
 0x404   :  { %6106 = vmatmul.msk.bf16.gmra.mxu3 %vm1063_vm0, %v7034_v57  ;;  %v2342_v29 = vmax.f32 %v1977_v37, %v8179_v17 }
 0x405   :  { %2701 = vst.msk [vmem:[#allocation2 + $0x9c] sm:$0xf] %vm2661_vm1, %v2628_v35  ;;  %v2409_v19 = vmax.f32 %v2265_v45, %v2337_v30  ;;  %6029 = vmatmul.msk.bf16.gmra.mxu0 %vm1063_vm0, %v6957_v21  ;;  %v6960_v45 = vld [vmem:[%s9404_s0 + $0x218] sm:$0xff] }
 0x407   :  { %v2485_v11 = vadd.f32 %v7841_v9, %v2409_v19 }
 0x409   :  { %v2557_v28 = vmax.f32 %v2485_v11, 0.0 }
 0x40a   :  { %v1787_v16 = vpop.f32.mrf.mxu0 }
 0x40b   :  { %v2629_v12 = vpack.c.bf16 %v2557_v28, %v2557_v28  ;;  %v2266_v41 = vmax.f32 %v7500_v15, %v1787_v16  ;;  %v1980_v3 = vpop.f32.mrf.mxu1  ;;  %v8256_v7 = vpop.f32.mrf.mxu3  ;;  %v7056_v28 = vld [vmem:[%s9406_s3 + $0x10] sm:$0xff] }
 0x40c   :  { %v2343_v35 = vmax.f32 %v1980_v3, %v8194_v33  ;;  %3093 = vmatpush.bf16.msrb.mxu2 %v7056_v28 }
 0x40d   :  { %2702 = vst.msk [vmem:[#allocation2 + $0xa0] sm:$0xf] %vm2661_vm1, %v2629_v12  ;;  %v2410_v63 = vmax.f32 %v2266_v41, %v2338_v47 }
 0x40f   :  { %v2486_v40 = vadd.f32 %v7841_v9, %v2410_v63 }
 0x411   :  { %v2558_v8 = vmax.f32 %v2486_v40, 0.0 }
 0x412   :  { %v1790_v56 = vpop.f32.mrf.mxu0 }
 0x413   :  { %v2630_v5 = vpack.c.bf16 %v2558_v8, %v2558_v8  ;;  %v2267_v54 = vmax.f32 %v7509_v24, %v1790_v56  ;;  %v6961_v56 = vld [vmem:[%s9404_s0 + $0x220] sm:$0xff] }
 0x414   :  { %6107 = vmatmul.msk.bf16.gmra.mxu3 %vm1063_vm0, %v7035_v55 }
 0x415   :  { %2703 = vst.msk [vmem:[#allocation2 + $0xa4] sm:$0xf] %vm2661_vm1, %v2630_v5  ;;  %v2411_v15 = vmax.f32 %v2267_v54, %v2339_v22  ;;  %6030 = vmatmul.msk.bf16.gmra.mxu0 %vm1063_vm0, %v6958_v2 }
 0x417   :  { %v2487_v34 = vadd.f32 %v7841_v9, %v2411_v15  ;;  %v2175_v41 = vpop.f32.mrf.mxu3 }
 0x419   :  { %v2559_v24 = vmax.f32 %v2487_v34, 0.0 }
 0x41a   :  { %v1792_v49 = vpop.f32.mrf.mxu0 }
 0x41b   :  { %v2631_v20 = vpack.c.bf16 %v2559_v24, %v2559_v24  ;;  %v2268_v38 = vmax.f32 %v7512_v27, %v1792_v49 }
 0x41d   :  { %2704 = vst.msk [vmem:[#allocation2 + $0xa8] sm:$0xf] %vm2661_vm1, %v2631_v20  ;;  %v2412_v31 = vmax.f32 %v2268_v38, %v2340_v1 }
 0x41f   :  { %v2488_v26 = vadd.f32 %v7841_v9, %v2412_v31  ;;  %v2177_v15 = vpop.f32.mrf.mxu3 }
 0x421   :  { %v2560_v53 = vmax.f32 %v2488_v26, 0.0  ;;  %v6962_v26 = vld [vmem:[%s9404_s0 + $0x228] sm:$0xff] }
 0x422   :  { %v1795_v43 = vpop.f32.mrf.mxu0 }
 0x423   :  { %v2632_v32 = vpack.c.bf16 %v2560_v53, %v2560_v53  ;;  %v2269_v23 = vmax.f32 %v7521_v36, %v1795_v43  ;;  %v1982_v36 = vpop.f32.mrf.mxu1 }
 0x424   :  { %6108 = vmatmul.msk.bf16.gmra.mxu3 %vm1063_vm0, %v7036_v6  ;;  %v2344_v16 = vmax.f32 %v1982_v36, %v8208_v25 }
 0x425   :  { %2705 = vst.msk [vmem:[#allocation2 + $0xac] sm:$0xf] %vm2661_vm1, %v2632_v32  ;;  %v2413_v27 = vmax.f32 %v2269_v23, %v2341_v14  ;;  %6031 = vmatmul.msk.bf16.gmra.mxu0 %vm1063_vm0, %v6959_v44 }
 0x427   :  { %v2489_v42 = vadd.f32 %v7841_v9, %v2413_v27  ;;  %v2180_v49 = vpop.f32.mrf.mxu3 }
 0x429   :  { %v2561_v59 = vmax.f32 %v2489_v42, 0.0 }
 0x42a   :  { %v1797_v10 = vpop.f32.mrf.mxu0 }
 0x42b   :  { %v2633_v18 = vpack.c.bf16 %v2561_v59, %v2561_v59  ;;  %v2270_v46 = vmax.f32 %v7524_v39, %v1797_v10  ;;  %v1985_v11 = vpop.f32.mrf.mxu1 }
 0x42c   :  { %v2345_v2 = vmax.f32 %v1985_v11, %v8219_v0 }
 0x42d   :  { %2706 = vst.msk [vmem:[#allocation2 + $0xb0] sm:$0xf] %vm2661_vm1, %v2633_v18  ;;  %v2414_v30 = vmax.f32 %v2270_v46, %v2342_v29  ;;  %v6963_v46 = vld [vmem:[%s9404_s0 + $0x230] sm:$0xff] }
 0x42f   :  { %v2490_v21 = vadd.f32 %v7841_v9, %v2414_v30  ;;  %v2182_v43 = vpop.f32.mrf.mxu3 }
 0x431   :  { %v2562_v62 = vmax.f32 %v2490_v21, 0.0 }
 0x432   :  { %v1800_v17 = vpop.f32.mrf.mxu0 }
 0x433   :  { %v2634_v19 = vpack.c.bf16 %v2562_v62, %v2562_v62  ;;  %v2271_v57 = vmax.f32 %v7533_v48, %v1800_v17  ;;  %v1987_v40 = vpop.f32.mrf.mxu1  ;;  %v9483_v62 = vld [vmem:[#allocation14_spill] sm:$0xff] }
 0x434   :  { %v2346_v37 = vmax.f32 %v1987_v40, %v8234_v50 }
 0x435   :  { %2707 = vst.msk [vmem:[#allocation2 + $0xb4] sm:$0xf] %vm2661_vm1, %v2634_v19  ;;  %v2415_v39 = vmax.f32 %v2271_v57, %v2343_v35  ;;  %6032 = vmatmul.msk.bf16.gmra.mxu0 %vm1063_vm0, %v6960_v45 }
 0x437   :  { %v2491_v33 = vadd.f32 %v7841_v9, %v2415_v39  ;;  %v2185_v30 = vpop.f32.mrf.mxu3 }
 0x439   :  { %v2563_v47 = vmax.f32 %v2491_v33, 0.0  ;;  %v9484_v33 = vld [vmem:[#allocation16_spill] sm:$0xff] }
 0x43a   :  { %v1802_v12 = vpop.f32.mrf.mxu0 }
 0x43b   :  { %v2635_v52 = vpack.c.bf16 %v2563_v47, %v2563_v47  ;;  %v2272_v48 = vmax.f32 %v7536_v51, %v1802_v12  ;;  %v1990_v58 = vpop.f32.mrf.mxu1 }
 0x43c   :  { %v2347_v31 = vmax.f32 %v1990_v58, %v8248_v13  ;;  %v9482_v13 = vld [vmem:[#allocation12_spill] sm:$0xff]  ;;  %v9487_v58 = vld [vmem:[#allocation13_spill] sm:$0xff] }
 0x43d   :  { %2708 = vst.msk [vmem:[#allocation2 + $0xb8] sm:$0xf] %vm2661_vm1, %v2635_v52  ;;  %v2416_v63 = vmax.f32 %v2272_v48, %v2344_v16 }
 0x43f   :  { %v2492_v8 = vadd.f32 %v7841_v9, %v2416_v63  ;;  %v8283_v9 = vld [vmem:[%s9405_s2] ss:$0 sm:$0xff]  ;;  %v2187_v16 = vpop.f32.mrf.mxu3  ;;  %v6964_v63 = vld [vmem:[%s9404_s0 + $0x238] sm:$0xff] }
 0x441   :  { %v2564_v22 = vmax.f32 %v2492_v8, 0.0  ;;  %v9485_v8 = vld [vmem:[#allocation11_spill] sm:$0xff] }
 0x442   :  { %v1805_v5 = vpop.f32.mrf.mxu0 }
 0x443   :  { %v2636_v25 = vpack.c.bf16 %v2564_v22, %v2564_v22  ;;  %v2273_v54 = vmax.f32 %v7545_v60, %v1805_v5  ;;  %v1992_v53 = vpop.f32.mrf.mxu1  ;;  %v2351_v22 = vmax.f32 %v9485_v8, %v2180_v49  ;;  %v9497_v8 = vld [vmem:[#allocation23_spill] sm:$0xff] }
 0x444   :  { %v2348_v23 = vmax.f32 %v1992_v53, %v8256_v7 }
 0x445   :  { %2709 = vst.msk [vmem:[#allocation2 + $0xbc] sm:$0xf] %vm2661_vm1, %v2636_v25  ;;  %v2417_v51 = vmax.f32 %v2273_v54, %v2345_v2  ;;  %6033 = vmatmul.msk.bf16.gmra.mxu0 %vm1063_vm0, %v6961_v56  ;;  %v9486_v56 = vld [vmem:[#allocation18_spill] sm:$0xff] }
 0x447   :  { %v2493_v0 = vadd.f32 %v8283_v9, %v2417_v51  ;;  %v2190_v54 = vpop.f32.mrf.mxu3 }
 0x449   :  { %v2565_v55 = vmax.f32 %v2493_v0, 0.0 }
 0x44a   :  { %v1807_v34 = vpop.f32.mrf.mxu0 }
 0x44b   :  { %v2637_v24 = vpack.c.bf16 %v2565_v55, %v2565_v55  ;;  %v2274_v60 = vmax.f32 %v7548_v61, %v1807_v34  ;;  %v1995_v59 = vpop.f32.mrf.mxu1  ;;  %v2352_v55 = vmax.f32 %v9487_v58, %v2182_v43  ;;  %v9488_v34 = vld [vmem:[#allocation20_spill] sm:$0xff]  ;;  %v9499_v58 = vld [vmem:[#allocation25_spill] sm:$0xff] }
 0x44c   :  { %v2349_v18 = vmax.f32 %v1995_v59, %v2175_v41  ;;  %v7063_v41 = vld [vmem:[%s9406_s3 + $0x28] sm:$0xff] }
 0x44d   :  { %2710 = vst.msk [vmem:[#allocation2 + $0xc0] sm:$0xf] %vm2661_vm1, %v2637_v24  ;;  %v2418_v1 = vmax.f32 %v2274_v60, %v2346_v37  ;;  %2969 = vmatpush.bf16.msrb.mxu1 %v7063_v41  ;;  %v9492_v59 = vld [vmem:[#allocation24_spill] sm:$0xff] }
 0x44f   :  { %v2494_v20 = vadd.f32 %v8283_v9, %v2418_v1  ;;  %v2192_v49 = vpop.f32.mrf.mxu3 }
 0x451   :  { %v2566_v38 = vmax.f32 %v2494_v20, 0.0 }
 0x452   :  { %v1810_v3 = vpop.f32.mrf.mxu0 }
 0x453   :  { %v2638_v50 = vpack.c.bf16 %v2566_v38, %v2566_v38  ;;  %v2275_v14 = vmax.f32 %v7557_v4, %v1810_v3  ;;  %v7083_v4 = vld [vmem:[%s9406_s3 + $0x48] sm:$0xff]  ;;  %v1997_v17 = vpop.f32.mrf.mxu1  ;;  %v6965_v38 = vld [vmem:[%s9404_s0 + $0x240] sm:$0xff] }
 0x454   :  { %3375 = vmatpush.bf16.msrb.mxu3 %v7083_v4  ;;  %v2350_v11 = vmax.f32 %v1997_v17, %v2177_v15 }
 0x455   :  { %2711 = vst.msk [vmem:[#allocation2 + $0xc4] sm:$0xf] %vm2661_vm1, %v2638_v50  ;;  %v2419_v61 = vmax.f32 %v2275_v14, %v2347_v31  ;;  %6034 = vmatmul.msk.bf16.gmra.mxu0 %vm1063_vm0, %v6962_v26  ;;  %v9489_v26 = vld [vmem:[#allocation15_spill] sm:$0xff]  ;;  %v9490_v50 = vld [vmem:[#allocation22_spill] sm:$0xff] }
 0x456   :  { %v2353_v3 = vmax.f32 %v9489_v26, %v2185_v30  ;;  %v9493_v30 = vld [vmem:[#allocation19_spill] sm:$0xff] }
 0x457   :  { %v2495_v44 = vadd.f32 %v8283_v9, %v2419_v61  ;;  %v9501_v26 = vld [vmem:[#allocation27_spill] sm:$0xff] }
 0x459   :  { %v2567_v32 = vmax.f32 %v2495_v44, 0.0  ;;  %v7055_v44 = vld [vmem:[%s9406_s3 + $0x8] sm:$0xff] }
 0x45a   :  { %v1812_v27 = vpop.f32.mrf.mxu0  ;;  %3094 = vmatpush.bf16.msrb.mxu2 %v7055_v44 }
 0x45b   :  { %v2639_v6 = vpack.c.bf16 %v2567_v32, %v2567_v32  ;;  %v2276_v42 = vmax.f32 %v9482_v13, %v1812_v27 }
 0x45d   :  { %2712 = vst.msk [vmem:[#allocation2 + $0xc8] sm:$0xf] %vm2661_vm1, %v2639_v6  ;;  %v2420_v29 = vmax.f32 %v2276_v42, %v2348_v23  ;;  %v2195_v23 = vpop.f32.mrf.mxu3  ;;  %v9491_v6 = vld [vmem:[#allocation17_spill] sm:$0xff] }
 0x45e   :  { %v2354_v13 = vmax.f32 %v9491_v6, %v2187_v16 }
 0x45f   :  { %v2496_v10 = vadd.f32 %v8283_v9, %v2420_v29 }
 0x461   :  { %v2568_v36 = vmax.f32 %v2496_v10, 0.0 }
 0x462   :  { %v1815_v21 = vpop.f32.mrf.mxu0 }
 0x463   :  { %v2640_v7 = vpack.c.bf16 %v2568_v36, %v2568_v36  ;;  %v2277_v35 = vmax.f32 %v9483_v62, %v1815_v21  ;;  %v2355_v21 = vmax.f32 %v9493_v30, %v2190_v54  ;;  %v9494_v62 = vld [vmem:[#allocation26_spill] sm:$0xff] }
 0x465   :  { %2713 = vst.msk [vmem:[#allocation2 + $0xcc] sm:$0xf] %vm2661_vm1, %v2640_v7  ;;  %v2421_v45 = vmax.f32 %v2277_v35, %v2349_v18  ;;  %6035 = vmatmul.msk.bf16.gmra.mxu0 %vm1063_vm0, %v6963_v46  ;;  %v6966_v18 = vld [vmem:[%s9404_s0 + $0x248] sm:$0xff] }
 0x467   :  { %v2497_v19 = vadd.f32 %v8283_v9, %v2421_v45  ;;  %v2197_v45 = vpop.f32.mrf.mxu3 }
 0x469   :  { %v2569_v57 = vmax.f32 %v2497_v19, 0.0 }
 0x46a   :  { %v1817_v39 = vpop.f32.mrf.mxu0 }
 0x46b   :  { %v2641_v28 = vpack.c.bf16 %v2569_v57, %v2569_v57  ;;  %v2278_v47 = vmax.f32 %v9484_v33, %v1817_v39  ;;  %v9495_v39 = vld [vmem:[#allocation21_spill] sm:$0xff] }
 0x46d   :  { %2714 = vst.msk [vmem:[#allocation2 + $0xd0] sm:$0xf] %vm2661_vm1, %v2641_v28  ;;  %v2422_v12 = vmax.f32 %v2278_v47, %v2350_v11  ;;  %v2356_v28 = vmax.f32 %v9495_v39, %v2192_v49  ;;  %v9496_v47 = vld [vmem:[#allocation28_spill] sm:$0xff] }
 0x46f   :  { %v2498_v52 = vadd.f32 %v8283_v9, %v2422_v12  ;;  %v2200_v41 = vpop.f32.mrf.mxu3 }
 0x471   :  { %v2570_v48 = vmax.f32 %v2498_v52, 0.0 }
 0x472   :  { %v1820_v40 = vpop.f32.mrf.mxu0 }
 0x473   :  { %v2642_v2 = vpack.c.bf16 %v2570_v48, %v2570_v48  ;;  %v2279_v5 = vmax.f32 %v9486_v56, %v1820_v40  ;;  %v9498_v56 = vld [vmem:[#allocation30_spill] sm:$0xff] }
 0x475   :  { %2715 = vst.msk [vmem:[#allocation2 + $0xd4] sm:$0xf] %vm2661_vm1, %v2642_v2  ;;  %v2423_v25 = vmax.f32 %v2279_v5, %v2351_v22  ;;  %6036 = vmatmul.msk.bf16.gmra.mxu0 %vm1063_vm0, %v6964_v63  ;;  %v6967_v63 = vld [vmem:[%s9404_s0 + $0x250] sm:$0xff]  ;;  %v2357_v22 = vmax.f32 %v9497_v8, %v2195_v23 }
 0x476   :  { %v9503_v23 = vld [vmem:[#allocation29_spill] sm:$0xff] }
 0x477   :  { %v2499_v15 = vadd.f32 %v8283_v9, %v2423_v25 }
 0x479   :  { %v2571_v51 = vmax.f32 %v2499_v15, 0.0  ;;  %v2202_v15 = vpop.f32.mrf.mxu3 }
 0x47a   :  { %v1822_v0 = vpop.f32.mrf.mxu0 }
 0x47b   :  { %v2643_v37 = vpack.c.bf16 %v2571_v51, %v2571_v51  ;;  %v2280_v24 = vmax.f32 %v9488_v34, %v1822_v0  ;;  %v9500_v34 = vld [vmem:[#allocation32_spill] sm:$0xff] }
 0x47d   :  { %2716 = vst.msk [vmem:[#allocation2 + $0xd8] sm:$0xf] %vm2661_vm1, %v2643_v37  ;;  %v2424_v60 = vmax.f32 %v2280_v24, %v2352_v55  ;;  %v2358_v55 = vmax.f32 %v9499_v58, %v2197_v45  ;;  %v9511_v58 = vld [vmem:[#allocation37_spill] sm:$0xff] }
 0x47f   :  { %v2500_v1 = vadd.f32 %v8283_v9, %v2424_v60 }
 0x481   :  { %v2572_v20 = vmax.f32 %v2500_v1, 0.0 }
 0x482   :  { %v1825_v31 = vpop.f32.mrf.mxu0 }
 0x483   :  { %v2644_v53 = vpack.c.bf16 %v2572_v20, %v2572_v20  ;;  %v2281_v14 = vmax.f32 %v9490_v50, %v1825_v31  ;;  %v6968_v20 = vld [vmem:[%s9404_s0 + $0x258] sm:$0xff] }
 0x484   :  { %v9502_v50 = vld [vmem:[#allocation34_spill] sm:$0xff] }
 0x485   :  { %2717 = vst.msk [vmem:[#allocation2 + $0xdc] sm:$0xf] %vm2661_vm1, %v2644_v53  ;;  %v2425_v61 = vmax.f32 %v2281_v14, %v2353_v3  ;;  %6037 = vmatmul.msk.bf16.gmra.mxu0 %vm1063_vm0, %v6965_v38  ;;  %v2205_v38 = vpop.f32.mrf.mxu3  ;;  %v2359_v3 = vmax.f32 %v9501_v26, %v2200_v41 }
 0x487   :  { %v2501_v43 = vadd.f32 %v8283_v9, %v2425_v61 }
 0x489   :  { %v2573_v32 = vmax.f32 %v2501_v43, 0.0 }
 0x48a   :  { %v1827_v27 = vpop.f32.mrf.mxu0 }
 0x48b   :  { %v2645_v42 = vpack.c.bf16 %v2573_v32, %v2573_v32  ;;  %v2282_v29 = vmax.f32 %v9492_v59, %v1827_v27  ;;  %v2360_v27 = vmax.f32 %v9503_v23, %v2202_v15 }
 0x48d   :  { %2718 = vst.msk [vmem:[#allocation2 + $0xe0] sm:$0xf] %vm2661_vm1, %v2645_v42  ;;  %v2426_v4 = vmax.f32 %v2282_v29, %v2354_v13  ;;  %v9504_v13 = vld [vmem:[#allocation36_spill] sm:$0xff]  ;;  %v2207_v59 = vpop.f32.mrf.mxu3 }
 0x48f   :  { %v2502_v10 = vadd.f32 %v8283_v9, %v2426_v4 }
 0x491   :  { %v2574_v36 = vmax.f32 %v2502_v10, 0.0 }
 0x492   :  { %v1830_v46 = vpop.f32.mrf.mxu0 }
 0x493   :  { %v2646_v7 = vpack.c.bf16 %v2574_v36, %v2574_v36  ;;  %v2283_v35 = vmax.f32 %v9494_v62, %v1830_v46 }
 0x495   :  { %2719 = vst.msk [vmem:[#allocation2 + $0xe4] sm:$0xf] %vm2661_vm1, %v2646_v7  ;;  %v2427_v17 = vmax.f32 %v2283_v35, %v2355_v21  ;;  %6038 = vmatmul.msk.bf16.gmra.mxu0 %vm1063_vm0, %v6966_v18  ;;  %v9505_v18 = vld [vmem:[#allocation31_spill] sm:$0xff]  ;;  %v9506_v21 = vld [vmem:[#allocation38_spill] sm:$0xff]  ;;  %v2210_v45 = vpop.f32.mrf.mxu3 }
 0x496   :  { %v2361_v46 = vmax.f32 %v9505_v18, %v2205_v38  ;;  %v7082_v35 = vld [vmem:[%s9406_s3 + $0x40] sm:$0xff] }
 0x497   :  { %v2503_v19 = vadd.f32 %v8283_v9, %v2427_v17  ;;  %3376 = vmatpush.bf16.msrb.mxu3 %v7082_v35  ;;  %v9513_v38 = vld [vmem:[#allocation39_spill] sm:$0xff] }
 0x499   :  { %v2575_v57 = vmax.f32 %v2503_v19, 0.0 }
 0x49a   :  { %v1832_v11 = vpop.f32.mrf.mxu0 }
 0x49b   :  { %v2647_v33 = vpack.c.bf16 %v2575_v57, %v2575_v57  ;;  %v2284_v16 = vmax.f32 %v9496_v47, %v1832_v11  ;;  %v9507_v11 = vld [vmem:[#allocation33_spill] sm:$0xff] }
 0x49c   :  { %v2362_v39 = vmax.f32 %v9507_v11, %v2207_v59 }
 0x49d   :  { %2720 = vst.msk [vmem:[#allocation2 + $0xe8] sm:$0xf] %vm2661_vm1, %v2647_v33  ;;  %v2428_v12 = vmax.f32 %v2284_v16, %v2356_v28  ;;  %v9508_v33 = vld [vmem:[#allocation40_spill] sm:$0xff] }
 0x49f   :  { %v2504_v52 = vadd.f32 %v8283_v9, %v2428_v12  ;;  %v7062_v12 = vld [vmem:[%s9406_s3 + $0x20] sm:$0xff] }
 0x4a0   :  { %2970 = vmatpush.bf16.msrb.mxu1 %v7062_v12 }
 0x4a1   :  { %v2576_v48 = vmax.f32 %v2504_v52, 0.0  ;;  %v2212_v52 = vpop.f32.mrf.mxu3 }
 0x4a2   :  { %v1835_v40 = vpop.f32.mrf.mxu0 }
 0x4a3   :  { %v2648_v2 = vpack.c.bf16 %v2576_v48, %v2576_v48  ;;  %v2285_v5 = vmax.f32 %v9498_v56, %v1835_v40  ;;  %v9509_v40 = vld [vmem:[#allocation35_spill] sm:$0xff] }
 0x4a4   :  { %v2363_v8 = vmax.f32 %v9509_v40, %v2210_v45  ;;  %v9523_v40 = vld [vmem:[#allocation47_spill] sm:$0xff] }
 0x4a5   :  { %2721 = vst.msk [vmem:[#allocation2 + $0xec] sm:$0xf] %vm2661_vm1, %v2648_v2  ;;  %v2429_v25 = vmax.f32 %v2285_v5, %v2357_v22  ;;  %6039 = vmatmul.msk.bf16.gmra.mxu0 %vm1063_vm0, %v6967_v63  ;;  %v9510_v2 = vld [vmem:[#allocation42_spill] sm:$0xff] }
 0x4a7   :  { %v2505_v54 = vadd.f32 %v8283_v9, %v2429_v25  ;;  %v7054_v25 = vld [vmem:[%s9406_s3] sm:$0xff] }
 0x4a8   :  { %3095 = vmatpush.bf16.msrb.mxu2 %v7054_v25  ;;  %v9524_v25 = vld [vmem:[#allocation56_spill] sm:$0xff] }
 0x4a9   :  { %v2577_v51 = vmax.f32 %v2505_v54, 0.0 }
 0x4aa   :  { %v1837_v0 = vpop.f32.mrf.mxu0 }
 0x4ab   :  { %v2649_v37 = vpack.c.bf16 %v2577_v51, %v2577_v51  ;;  %v2286_v24 = vmax.f32 %v9500_v34, %v1837_v0  ;;  %v2215_v51 = vpop.f32.mrf.mxu3  ;;  %v9512_v34 = vld [vmem:[#allocation44_spill] sm:$0xff] }
 0x4ad   :  { %2722 = vst.msk [vmem:[#allocation2 + $0xf0] sm:$0xf] %vm2661_vm1, %v2649_v37  ;;  %v2430_v60 = vmax.f32 %v2286_v24, %v2358_v55  ;;  %v2364_v55 = vmax.f32 %v9511_v58, %v2212_v52  ;;  %v9522_v52 = vld [vmem:[#allocation3_spill] sm:$0xff] }
 0x4af   :  { %v2506_v1 = vadd.f32 %v8283_v9, %v2430_v60 }
 0x4b1   :  { %v2578_v49 = vmax.f32 %v2506_v1, 0.0 }
 0x4b2   :  { %v1840_v31 = vpop.f32.mrf.mxu0 }
 0x4b3   :  { %v2650_v53 = vpack.c.bf16 %v2578_v49, %v2578_v49  ;;  %v2287_v14 = vmax.f32 %v9502_v50, %v1840_v31  ;;  %v2365_v31 = vmax.f32 %v9513_v38, %v2215_v51  ;;  %v2217_v50 = vpop.f32.mrf.mxu3  ;;  %v9529_v38 = vld [vmem:[#allocation51_spill] sm:$0xff] }
 0x4b5   :  { %2723 = vst.msk [vmem:[#allocation2 + $0xf4] sm:$0xf] %vm2661_vm1, %v2650_v53  ;;  %v2431_v61 = vmax.f32 %v2287_v14, %v2359_v3  ;;  %6040 = vmatmul.msk.bf16.gmra.mxu0 %vm1063_vm0, %v6968_v20  ;;  %v9514_v3 = vld [vmem:[#allocation46_spill] sm:$0xff] }
 0x4b7   :  { %v2507_v44 = vadd.f32 %v8283_v9, %v2431_v61 }
 0x4b9   :  { %v2579_v43 = vmax.f32 %v2507_v44, 0.0 }
 0x4ba   :  { %v1842_v32 = vpop.f32.mrf.mxu0 }
 0x4bb   :  { %v2651_v6 = vpack.c.bf16 %v2579_v43, %v2579_v43  ;;  %v2288_v42 = vmax.f32 %v9504_v13, %v1842_v32  ;;  %v9515_v32 = vld [vmem:[#allocation41_spill] sm:$0xff]  ;;  %v2220_v59 = vpop.f32.mrf.mxu3 }
 0x4bc   :  { %v2366_v23 = vmax.f32 %v9515_v32, %v2217_v50  ;;  %v9532_v32 = vld [vmem:[#allocation53_spill] sm:$0xff] }
 0x4bd   :  { %2724 = vst.msk [vmem:[#allocation2 + $0xf8] sm:$0xf] %vm2661_vm1, %v2651_v6  ;;  %v2432_v29 = vmax.f32 %v2288_v42, %v2360_v27  ;;  %v9516_v6 = vld [vmem:[#allocation48_spill] sm:$0xff] }
 0x4bf   :  { %v2508_v4 = vadd.f32 %v8283_v9, %v2432_v29 }
 0x4c1   :  { %v2580_v10 = vmax.f32 %v2508_v4, 0.0 }
 0x4c2   :  { %v1845_v36 = vpop.f32.mrf.mxu0 }
 0x4c3   :  { %v2652_v30 = vpack.c.bf16 %v2580_v10, %v2580_v10  ;;  %v2289_v7 = vmax.f32 %v9506_v21, %v1845_v36  ;;  %v9517_v36 = vld [vmem:[#allocation43_spill] sm:$0xff]  ;;  %v2222_v35 = vpop.f32.mrf.mxu3 }
 0x4c4   :  { %v2367_v18 = vmax.f32 %v9517_v36, %v2220_v59 }
 0x4c5   :  { %2725 = vst.msk [vmem:[#allocation2 + $0xfc] sm:$0xf] %vm2661_vm1, %v2652_v30  ;;  %v2433_v62 = vmax.f32 %v2289_v7, %v2361_v46  ;;  %v9518_v30 = vld [vmem:[#allocation50_spill] sm:$0xff] }
 0x4c7   :  { %v2509_v17 = vadd.f32 %v8283_v9, %v2433_v62 }
 0x4c9   :  { %v2581_v19 = vmax.f32 %v2509_v17, 0.0 }
 0x4ca   :  { %v1847_v57 = vpop.f32.mrf.mxu0 }
 0x4cb   :  { %v2653_v28 = vpack.c.bf16 %v2581_v19, %v2581_v19  ;;  %v2290_v47 = vmax.f32 %v9508_v33, %v1847_v57  ;;  %v9519_v19 = vld [vmem:[#allocation45_spill] sm:$0xff] }
 0x4cc   :  { %v2368_v57 = vmax.f32 %v9519_v19, %v2222_v35  ;;  %v9536_v19 = vld [vmem:[#allocation63_spill] sm:$0xff] }
 0x4cd   :  { %2726 = vst.msk [vmem:[#allocation2 + $0x100] sm:$0xf] %vm2661_vm1, %v2653_v28  ;;  %v2434_v16 = vmax.f32 %v2290_v47, %v2362_v39  ;;  %v9520_v39 = vld [vmem:[#allocation52_spill] sm:$0xff] }
 0x4cf   :  { %v2510_v41 = vadd.f32 %v8283_v9, %v2434_v16 }
 0x4d1   :  { %v2582_v48 = vmax.f32 %v2510_v41, 0.0  ;;  %v9521_v41 = vld [vmem:[#allocation54_spill] sm:$0xff] }
 0x4d2   :  { %v1850_v63 = vpop.f32.mrf.mxu0 }
 0x4d3   :  { %v2654_v22 = vpack.c.bf16 %v2582_v48, %v2582_v48  ;;  %v2291_v56 = vmax.f32 %v9510_v2, %v1850_v63  ;;  %v2225_v48 = vmax.f32 %v9522_v52, %v9521_v41 }
 0x4d5   :  { %2727 = vst.msk [vmem:[#allocation2 + $0x104] sm:$0xf] %vm2661_vm1, %v2654_v22  ;;  %v2435_v5 = vmax.f32 %v2291_v56, %v2363_v8 }
 0x4d7   :  { %v2511_v54 = vadd.f32 %v8283_v9, %v2435_v5 }
 0x4d9   :  { %v2583_v15 = vmax.f32 %v2511_v54, 0.0  ;;  %v9525_v54 = vld [vmem:[#allocation4_spill] sm:$0xff] }
 0x4da   :  { %v1852_v0 = vpop.f32.mrf.mxu0 }
 0x4db   :  { %v2655_v37 = vpack.c.bf16 %v2583_v15, %v2583_v15  ;;  %v2292_v24 = vmax.f32 %v9512_v34, %v1852_v0  ;;  %v2226_v15 = vmax.f32 %v9525_v54, %v9524_v25  ;;  %v9526_v0 = vld [vmem:[#allocation49_spill] sm:$0xff] }
 0x4dd   :  { %2728 = vst.msk [vmem:[#allocation2 + $0x108] sm:$0xf] %vm2661_vm1, %v2655_v37  ;;  %v2436_v60 = vmax.f32 %v2292_v24, %v2364_v55 }
 0x4df   :  { %v2512_v1 = vadd.f32 %v8283_v9, %v2436_v60  ;;  %v9527_v60 = vld [vmem:[#allocation58_spill] sm:$0xff] }
 0x4e1   :  { %v2584_v49 = vmax.f32 %v2512_v1, 0.0  ;;  %v9528_v1 = vld [vmem:[#allocation5_spill] sm:$0xff] }
 0x4e2   :  { %v1855_v20 = vpop.f32.mrf.mxu0 }
 0x4e3   :  { %v2656_v26 = vpack.c.bf16 %v2584_v49, %v2584_v49  ;;  %v2293_v53 = vmax.f32 %v9514_v3, %v1855_v20  ;;  %v2227_v49 = vmax.f32 %v9528_v1, %v9527_v60 }
 0x4e5   :  { %2729 = vst.msk [vmem:[#allocation2 + $0x10c] sm:$0xf] %vm2661_vm1, %v2656_v26  ;;  %v2437_v14 = vmax.f32 %v2293_v53, %v2365_v31 }
 0x4e7   :  { %v2513_v61 = vadd.f32 %v8283_v9, %v2437_v14  ;;  %v9530_v14 = vld [vmem:[#allocation60_spill] sm:$0xff] }
 0x4e9   :  { %v2585_v44 = vmax.f32 %v2513_v61, 0.0  ;;  %v9531_v61 = vld [vmem:[#allocation6_spill] sm:$0xff] }
 0x4ea   :  { %v1857_v43 = vpop.f32.mrf.mxu0 }
 0x4eb   :  { %v2657_v27 = vpack.c.bf16 %v2585_v44, %v2585_v44  ;;  %v2294_v13 = vmax.f32 %v9516_v6, %v1857_v43  ;;  %v2228_v44 = vmax.f32 %v9531_v61, %v9530_v14  ;;  %v7092_v14 = vld [vmem:[%s9406_s3 + $0x70] sm:$0xff]  ;;  %v8496_v61 = vld [vmem:[#allocation2 + $0x38] sm:$0xff] }
 0x4ed   :  { %2730 = vst.msk [vmem:[#allocation2 + $0x110] sm:$0xf] %vm2661_vm1, %v2657_v27  ;;  %v2438_v42 = vmax.f32 %v2294_v13, %v2366_v23 }
 0x4ef   :  { %v2514_v29 = vadd.f32 %v8283_v9, %v2438_v42 }
 0x4f1   :  { %v2586_v4 = vmax.f32 %v2514_v29, 0.0  ;;  %v9533_v29 = vld [vmem:[#allocation62_spill] sm:$0xff] }
 0x4f2   :  { %v1860_v10 = vpop.f32.mrf.mxu0 }
 0x4f3   :  { %v2658_v46 = vpack.c.bf16 %v2586_v4, %v2586_v4  ;;  %v2295_v21 = vmax.f32 %v9518_v30, %v1860_v10  ;;  %v9534_v4 = vld [vmem:[#allocation7_spill] sm:$0xff] }
 0x4f4   :  { %v2229_v10 = vmax.f32 %v9534_v4, %v9533_v29  ;;  %v7107_v29 = vld [vmem:[%s9406_s3 + $0xa8] sm:$0xff] }
 0x4f5   :  { %2731 = vst.msk [vmem:[#allocation2 + $0x114] sm:$0xf] %vm2661_vm1, %v2658_v46  ;;  %v2439_v7 = vmax.f32 %v2295_v21, %v2367_v18  ;;  %v9535_v18 = vld [vmem:[#allocation55_spill] sm:$0xff]  ;;  %v7101_v21 = vld [vmem:[%s9406_s3 + $0x98] sm:$0xff]  ;;  %v7091_v4 = vld [vmem:[%s9406_s3 + $0x68] sm:$0xff] }
 0x4f6   :  { %3759 = vmatpush.bf16.msra.mxu2 %v7101_v21  ;;  %v8546_v21 = vld [vmem:[#allocation2 + $0x58] sm:$0xff] }
 0x4f7   :  { %v2515_v62 = vadd.f32 %v8283_v9, %v2439_v7  ;;  %v7109_v7 = vld [vmem:[%s9406_s3 + $0xb8] sm:$0xff] }
 0x4f8   :  { %3952 = vmatpush.bf16.msra.mxu3 %v7109_v7 }
 0x4f9   :  { %v2587_v45 = vmax.f32 %v2515_v62, 0.0  ;;  %v7093_v62 = vld [vmem:[%s9406_s3 + $0x78] sm:$0xff] }
 0x4fa   :  { %v1862_v17 = vpop.f32.mrf.mxu0  ;;  %3566 = vmatpush.bf16.msra.mxu1 %v7093_v62 }
 0x4fb   :  { %v2659_v11 = vpack.c.bf16 %v2587_v45, %v2587_v45  ;;  %v2296_v28 = vmax.f32 %v9520_v39, %v1862_v17 }
 0x4fd   :  { %2732 = vst.msk [vmem:[#allocation2 + $0x118] sm:$0xf] %vm2661_vm1, %v2659_v11  ;;  %v2440_v33 = vmax.f32 %v2296_v28, %v2368_v57  ;;  %v9537_v57 = vld [vmem:[#allocation8_spill] sm:$0xff]  ;;  %v9538_v28 = vld [vmem:[#allocation57_spill] sm:$0xff] }
 0x4fe   :  { %v2230_v11 = vmax.f32 %v9537_v57, %v9536_v19  ;;  %3567 = vmatpush.bf16.msra.mxu1 %v7092_v14  ;;  %v8554_v57 = vld [vmem:[#allocation2 + $0x70] sm:$0xff] }
 0x4ff   :  { %v2516_v47 = vadd.f32 %v8283_v9, %v2440_v33 }
 0x501   :  { %v2588_v16 = vmax.f32 %v2516_v47, 0.0 }
 0x502   :  { %v1865_v12 = vpop.f32.mrf.mxu0  ;;  %3568 = vmatpush.bf16.msra.mxu1 %v7091_v4 }
 0x503   :  { %v2660_v63 = vpack.c.bf16 %v2588_v16, %v2588_v16  ;;  %v2297_v8 = vmax.f32 %v1865_v12, %v9523_v40 }
 0x505   :  { %2733 = vst.msk [vmem:[#allocation2 + $0x11c] sm:$0xf] %vm2661_vm1, %v2660_v63  ;;  %v2369_v22 = vmax.f32 %v2225_v48, %v2297_v8  ;;  %v9539_v48 = vld [vmem:[#allocation64_spill] sm:$0xff]  ;;  %v9540_v63 = vld [vmem:[#allocation9_spill] sm:$0xff] }
 0x506   :  { %v2231_v40 = vmax.f32 %v9540_v63, %v9539_v48 }
 0x507   :  { %v2445_v2 = vadd.f32 %v8283_v9, %v2369_v22  ;;  %v9541_v22 = vld [vmem:[#allocation59_spill] sm:$0xff] }
 0x509   :  { %v2517_v56 = vmax.f32 %v2445_v2, 0.0 }
 0x50a   :  { %v1867_v5 = vpop.f32.mrf.mxu0 }
 0x50b   :  { %v2589_v51 = vpack.c.bf16 %v2517_v56, %v2517_v56  ;;  %v2298_v58 = vmax.f32 %v1867_v5, %v9526_v0 }
 0x50d   :  { %2662 = vst.msk [vmem:[#allocation2] sm:$0xf] %vm2661_vm1, %v2589_v51  ;;  %v2370_v55 = vmax.f32 %v2226_v15, %v2298_v58  ;;  %v9542_v15 = vld [vmem:[#allocation65_spill] sm:$0xff]  ;;  %v9543_v51 = vld [vmem:[#allocation10_spill] sm:$0xff] }
 0x50e   :  { %v2232_v0 = vmax.f32 %v9543_v51, %v9542_v15 }
 0x50f   :  { %v2446_v37 = vadd.f32 %v8283_v9, %v2370_v55  ;;  %v9544_v55 = vld [vmem:[#allocation61_spill] sm:$0xff] }
 0x511   :  { %v2518_v34 = vmax.f32 %v2446_v37, 0.0 }
 0x512   :  { %v1870_v24 = vpop.f32.mrf.mxu0 }
 0x513   :  { %v2590_v20 = vpack.c.bf16 %v2518_v34, %v2518_v34  ;;  %v2299_v31 = vmax.f32 %v1870_v24, %v9529_v38 }
 0x515   :  { %2663 = vst.msk [vmem:[#allocation2 + $0x4] sm:$0xf] %vm2661_vm1, %v2590_v20  ;;  %v2371_v26 = vmax.f32 %v2227_v49, %v2299_v31 }
 0x517   :  { %v2447_v3 = vadd.f32 %v8283_v9, %v2371_v26  ;;  %v7100_v26 = vld [vmem:[%s9406_s3 + $0x90] sm:$0xff] }
 0x518   :  { %3760 = vmatpush.bf16.msra.mxu2 %v7100_v26 }
 0x519   :  { %v2519_v53 = vmax.f32 %v2447_v3, 0.0  ;;  %v8484_v3 = vld [vmem:[#allocation2 + $0x30] sm:$0xff] }
 0x51a   :  { %v1872_v50 = vpop.f32.mrf.mxu0 }
 0x51b   :  { %v2591_v43 = vpack.c.bf16 %v2519_v53, %v2519_v53  ;;  %v2300_v23 = vmax.f32 %v1872_v50, %v9532_v32  ;;  %v7068_v53 = vld [vmem:[#allocation2 + $0x20] sm:$0xff]  ;;  %v7108_v50 = vld [vmem:[%s9406_s3 + $0xb0] sm:$0xff] }
 0x51c   :  { %v7038_v27 = vld [vmem:[#allocation2] sm:$0xff]  ;;  %3953 = vmatpush.bf16.msra.mxu3 %v7108_v50 }
 0x51d   :  { %2664 = vst.msk [vmem:[#allocation2 + $0x8] sm:$0xf] %vm2661_vm1, %v2591_v43  ;;  %v2372_v6 = vmax.f32 %v2228_v44, %v2300_v23  ;;  %6237 = vmatmul.msk.bf16.vlgmr.msrb.gmra.mxu2 %vm2914_vm2, %v7038_v27  ;;  %v7069_v44 = vld [vmem:[#allocation2 + $0x28] sm:$0xff]  ;;  %v8503_v43 = vld [vmem:[#allocation2 + $0x40] sm:$0xff] }
 0x51e   :  { %v8505_v32 = vld [vmem:[#allocation2 + $0x40] sm:$0xff]  ;;  %v8513_v23 = vld [vmem:[#allocation2 + $0x48] sm:$0xff] }
 0x51f   :  { %v2448_v13 = vadd.f32 %v8283_v9, %v2372_v6  ;;  %v8515_v27 = vld [vmem:[#allocation2 + $0x48] sm:$0xff]  ;;  %v8523_v6 = vld [vmem:[#allocation2 + $0x50] sm:$0xff] }
 0x520   :  { %3954 = vmatpush.bf16.msra.mxu3 %v7107_v29  ;;  %v8609_v29 = vld [vmem:[#allocation2 + $0x88] sm:$0xff] }
 0x521   :  { %v2520_v42 = vmax.f32 %v2448_v13, 0.0  ;;  %v8525_v13 = vld [vmem:[#allocation2 + $0x60] sm:$0xff] }
 0x522   :  { %v1875_v59 = vpop.f32.mrf.mxu0 }
 0x523   :  { %v2592_v36 = vpack.c.bf16 %v2520_v42, %v2520_v42  ;;  %v2301_v46 = vmax.f32 %v1875_v59, %v9535_v18  ;;  %v7099_v42 = vld [vmem:[%s9406_s3 + $0x88] sm:$0xff]  ;;  %v8530_v59 = vld [vmem:[#allocation2 + $0x50] sm:$0xff] }
 0x524   :  { %3761 = vmatpush.bf16.msra.mxu2 %v7099_v42  ;;  %v8607_v42 = vld [vmem:[#allocation2 + $0x98] sm:$0xff] }
 0x525   :  { %2665 = vst.msk [vmem:[#allocation2 + $0xc] sm:$0xf] %vm2661_vm1, %v2592_v36  ;;  %v2373_v30 = vmax.f32 %v2229_v10, %v2301_v46 }
 0x527   :  { %v2449_v35 = vadd.f32 %v8283_v9, %v2373_v30  ;;  %v8544_v30 = vld [vmem:[#allocation2 + $0x68] sm:$0xff] }
 0x529   :  { %v2521_v45 = vmax.f32 %v2449_v35, 0.0 }
 0x52a   :  { %v1877_v17 = vpop.f32.mrf.mxu0 }
 0x52b   :  { %v2593_v39 = vpack.c.bf16 %v2521_v45, %v2521_v45  ;;  %v2302_v33 = vmax.f32 %v1877_v17, %v9538_v28 }
 0x52c   :  { %v7039_v47 = vld [vmem:[#allocation2 + $0x8] sm:$0xff] }
 0x52d   :  { %2666 = vst.msk [vmem:[#allocation2 + $0x10] sm:$0xf] %vm2661_vm1, %v2593_v39  ;;  %v2374_v16 = vmax.f32 %v2230_v11, %v2302_v33  ;;  %6205 = vmatmul.msk.bf16.vlgmr.msrb.gmra.mxu1 %vm2914_vm2, %v7039_v47  ;;  %6238 = vmatmul.msk.bf16.gmra.mxu2 %vm2914_vm2, %v7039_v47  ;;  %v8556_v11 = vld [vmem:[#allocation2 + $0x70] sm:$0xff] }
 0x52f   :  { %v2450_v12 = vadd.f32 %v8283_v9, %v2374_v16 }
 0x531   :  { %v2522_v41 = vmax.f32 %v2450_v12, 0.0 }
 0x532   :  { %v1880_v52 = vpop.f32.mrf.mxu0 }
 0x533   :  { %v2594_v8 = vpack.c.bf16 %v2522_v41, %v2522_v41  ;;  %v2303_v2 = vmax.f32 %v1880_v52, %v9541_v22 }
 0x535   :  { %2667 = vst.msk [vmem:[#allocation2 + $0x14] sm:$0xf] %vm2661_vm1, %v2594_v8  ;;  %v2375_v56 = vmax.f32 %v2231_v40, %v2303_v2  ;;  %v8568_v40 = vld [vmem:[#allocation2 + $0x78] sm:$0xff] }
 0x536   :  { %v8570_v8 = vld [vmem:[#allocation2 + $0x78] sm:$0xff] }
 0x537   :  { %v2451_v5 = vadd.f32 %v8283_v9, %v2375_v56 }
 0x539   :  { %v2523_v25 = vmax.f32 %v2451_v5, 0.0 }
 0x53a   :  { %v1882_v54 = vpop.f32.mrf.mxu0 }
 0x53b   :  { %v2595_v58 = vpack.c.bf16 %v2523_v25, %v2523_v25  ;;  %v2304_v37 = vmax.f32 %v1882_v54, %v9544_v55  ;;  %v8582_v55 = vld [vmem:[#allocation2 + $0x80] sm:$0xff] }
 0x53c   :  { %v7040_v34 = vld [vmem:[#allocation2 + $0x10] sm:$0xff] }
 0x53d   :  { %v7066_v24 = vld [vmem:[#allocation2 + $0x10] sm:$0xff]  ;;  %2668 = vst.msk [vmem:[#allocation2 + $0x18] sm:$0xf] %vm2661_vm1, %v2595_v58  ;;  %v2376_v60 = vmax.f32 %v2232_v0, %v2304_v37  ;;  %6206 = vmatmul.msk.bf16.gmra.mxu1 %vm2914_vm2, %v7040_v34  ;;  %6239 = vmatmul.msk.bf16.gmra.mxu2 %vm2914_vm2, %v7040_v34  ;;  %v7098_v34 = vld [vmem:[%s9406_s3 + $0x80] sm:$0xff] }
 0x53e   :  { %6333 = vmatmul.msk.bf16.vlgmr.msrb.gmra.mxu3 %vm2914_vm2, %v7066_v24  ;;  %v8584_v37 = vld [vmem:[#allocation2 + $0x90] sm:$0xff]  ;;  %v8589_v24 = vld [vmem:[#allocation2 + $0x80] sm:$0xff]  ;;  %3762 = vmatpush.bf16.msra.mxu2 %v7098_v34 }
 0x53f   :  { %v2452_v1 = vadd.f32 %v8283_v9, %v2376_v60  ;;  %v7058_v9 = vld [vmem:[#allocation2 + $0x20] sm:$0xff] }
 0x540   :  { %v7106_v60 = vld [vmem:[%s9406_s3 + $0xa0] sm:$0xff] }
 0x541   :  { %v2524_v49 = vmax.f32 %v2452_v1, 0.0  ;;  %v7090_v1 = vld [vmem:[%s9406_s3 + $0x60] sm:$0xff]  ;;  %3955 = vmatpush.bf16.msra.mxu3 %v7106_v60 }
 0x542   :  { %3569 = vmatpush.bf16.msra.mxu1 %v7090_v1 }
 0x543   :  { %v2596_v20 = vpack.c.bf16 %v2524_v49, %v2524_v49 }
 0x545   :  { %2669 = vst.msk [vmem:[#allocation2 + $0x1c] sm:$0xf] %vm2661_vm1, %v2596_v20 }
 0x54c   :  { %v7041_v38 = vld [vmem:[#allocation2 + $0x18] sm:$0xff] }
 0x54d   :  { %v7067_v31 = vld [vmem:[#allocation2 + $0x18] sm:$0xff]  ;;  %6207 = vmatmul.msk.bf16.gmra.mxu1 %vm2914_vm2, %v7041_v38  ;;  %6240 = vmatmul.msk.bf16.gmra.mxu2 %vm2914_vm2, %v7041_v38 }
 0x54e   :  { %6334 = vmatmul.msk.bf16.gmra.mxu3 %vm2914_vm2, %v7067_v31 }
 0x55d   :  { %6208 = vmatmul.msk.bf16.gmra.mxu1 %vm2914_vm2, %v7058_v9  ;;  %6241 = vmatmul.msk.bf16.gmra.mxu2 %vm2914_vm2, %v8484_v3 }
 0x55e   :  { %6335 = vmatmul.msk.bf16.gmra.mxu3 %vm2914_vm2, %v7068_v53 }
 0x56d   :  { %6209 = vmatmul.msk.bf16.gmra.mxu1 %vm2914_vm2, %v8496_v61  ;;  %6242 = vmatmul.msk.bf16.gmra.mxu2 %vm2914_vm2, %v8496_v61 }
 0x56e   :  { %6336 = vmatmul.msk.bf16.gmra.mxu3 %vm2914_vm2, %v7069_v44 }
 0x57d   :  { %6210 = vmatmul.msk.bf16.gmra.mxu1 %vm2914_vm2, %v8503_v43  ;;  %6243 = vmatmul.msk.bf16.gmra.mxu2 %vm2914_vm2, %v8503_v43 }
 0x57e   :  { %6337 = vmatmul.msk.bf16.gmra.mxu3 %vm2914_vm2, %v8505_v32 }
 0x58d   :  { %6211 = vmatmul.msk.bf16.gmra.mxu1 %vm2914_vm2, %v8513_v23  ;;  %6244 = vmatmul.msk.bf16.gmra.mxu2 %vm2914_vm2, %v8513_v23 }
 0x58e   :  { %6338 = vmatmul.msk.bf16.gmra.mxu3 %vm2914_vm2, %v8515_v27 }
 0x59d   :  { %6212 = vmatmul.msk.bf16.gmra.mxu1 %vm2914_vm2, %v8523_v6  ;;  %6245 = vmatmul.msk.bf16.gmra.mxu2 %vm2914_vm2, %v8525_v13 }
 0x59e   :  { %6339 = vmatmul.msk.bf16.gmra.mxu3 %vm2914_vm2, %v8530_v59 }
 0x5a0   :  { %v3097_v10 = vpop.f32.mrf.mxu2 }
 0x5a8   :  { %v3099_v36 = vpop.f32.mrf.mxu2 }
 0x5aa   :  { %v2972_v18 = vpop.f32.mrf.mxu1 }
 0x5ab   :  { %v3098_v46 = vadd.f32 %v3097_v10, %v2972_v18 }
 0x5ad   :  { %6213 = vmatmul.msk.bf16.gmra.mxu1 %vm2914_vm2, %v8544_v30  ;;  %6246 = vmatmul.msk.bf16.gmra.mxu2 %vm2914_vm2, %v8544_v30 }
 0x5ae   :  { %6340 = vmatmul.msk.bf16.gmra.mxu3 %vm2914_vm2, %v8546_v21 }
 0x5b0   :  { %v3102_v7 = vpop.f32.mrf.mxu2 }
 0x5b2   :  { %v2974_v62 = vpop.f32.mrf.mxu1 }
 0x5b3   :  { %v3100_v35 = vadd.f32 %v3099_v36, %v2974_v62 }
 0x5b8   :  { %v3104_v45 = vpop.f32.mrf.mxu2 }
 0x5ba   :  { %v2977_v17 = vpop.f32.mrf.mxu1 }
 0x5bb   :  { %v3103_v19 = vadd.f32 %v3102_v7, %v2977_v17 }
 0x5bd   :  { %6214 = vmatmul.msk.bf16.gmra.mxu1 %vm2914_vm2, %v8554_v57  ;;  %6247 = vmatmul.msk.bf16.gmra.mxu2 %vm2914_vm2, %v8554_v57 }
 0x5be   :  { %6341 = vmatmul.msk.bf16.gmra.mxu3 %vm2914_vm2, %v8556_v11 }
 0x5c0   :  { %v3107_v39 = vpop.f32.mrf.mxu2 }
 0x5c1   :  { %v3378_v28 = vpop.f32.mrf.mxu3 }
 0x5c2   :  { %v8564_v33 = vadd.f32 %v3378_v28, %v3098_v46  ;;  %v2979_v47 = vpop.f32.mrf.mxu1 }
 0x5c3   :  { %v3105_v16 = vadd.f32 %v3104_v45, %v2979_v47 }
 0x5c8   :  { %v3109_v12 = vpop.f32.mrf.mxu2 }
 0x5c9   :  { %v3380_v41 = vpop.f32.mrf.mxu3 }
 0x5ca   :  { %v8566_v52 = vadd.f32 %v3380_v41, %v3100_v35  ;;  %v2982_v48 = vpop.f32.mrf.mxu1 }
 0x5cb   :  { %v3108_v63 = vadd.f32 %v3107_v39, %v2982_v48  ;;  %v8623_v39 = vld [vmem:[#allocation2 + $0xa0] sm:$0xff] }
 0x5cd   :  { %6215 = vmatmul.msk.bf16.gmra.mxu1 %vm2914_vm2, %v8568_v40  ;;  %6248 = vmatmul.msk.bf16.gmra.mxu2 %vm2914_vm2, %v8568_v40 }
 0x5ce   :  { %6342 = vmatmul.msk.bf16.gmra.mxu3 %vm2914_vm2, %v8570_v8 }
 0x5d0   :  { %v3112_v22 = vpop.f32.mrf.mxu2 }
 0x5d1   :  { %v3383_v2 = vpop.f32.mrf.mxu3 }
 0x5d2   :  { %v8578_v56 = vadd.f32 %v3383_v2, %v3103_v19  ;;  %v2984_v5 = vpop.f32.mrf.mxu1  ;;  %v8621_v19 = vld [vmem:[#allocation2 + $0xa0] sm:$0xff] }
 0x5d3   :  { %v3110_v25 = vadd.f32 %v3109_v12, %v2984_v5 }
 0x5d8   :  { %v3114_v54 = vpop.f32.mrf.mxu2 }
 0x5d9   :  { %v3385_v15 = vpop.f32.mrf.mxu3 }
 0x5da   :  { %v8580_v51 = vadd.f32 %v3385_v15, %v3105_v16  ;;  %v2987_v0 = vpop.f32.mrf.mxu1 }
 0x5db   :  { %v3113_v58 = vadd.f32 %v3112_v22, %v2987_v0 }
 0x5dd   :  { %6216 = vmatmul.msk.bf16.gmra.mxu1 %vm2914_vm2, %v8582_v55  ;;  %6249 = vmatmul.msk.bf16.gmra.mxu2 %vm2914_vm2, %v8584_v37 }
 0x5de   :  { %6343 = vmatmul.msk.bf16.gmra.mxu3 %vm2914_vm2, %v8589_v24 }
 0x5e0   :  { %v3117_v49 = vpop.f32.mrf.mxu2 }
 0x5e1   :  { %v3388_v20 = vpop.f32.mrf.mxu3 }
 0x5e2   :  { %v8603_v38 = vadd.f32 %v3388_v20, %v3108_v63  ;;  %v2989_v31 = vpop.f32.mrf.mxu1 }
 0x5e3   :  { %v3115_v26 = vadd.f32 %v3114_v54, %v2989_v31  ;;  %v8637_v54 = vld [vmem:[#allocation2 + $0xa8] sm:$0xff] }
 0x5e8   :  { %v3119_v9 = vpop.f32.mrf.mxu2 }
 0x5e9   :  { %v3390_v53 = vpop.f32.mrf.mxu3 }
 0x5ea   :  { %v8605_v50 = vadd.f32 %v3390_v53, %v3110_v25  ;;  %v2992_v14 = vpop.f32.mrf.mxu1  ;;  %v8635_v25 = vld [vmem:[#allocation2 + $0xa8] sm:$0xff]  ;;  %v7125_v53 = vld [vmem:[%s9406_s3 + $0xf8] sm:$0xff] }
 0x5eb   :  { %v3118_v44 = vadd.f32 %v3117_v49, %v2992_v14  ;;  %v8654_v14 = vld [vmem:[#allocation2 + $0xb0] sm:$0xff]  ;;  %4338 = vmatpush.bf16.msrb.mxu2 %v7125_v53 }
 0x5ed   :  { %6217 = vmatmul.msk.bf16.gmra.mxu1 %vm2914_vm2, %v8607_v42  ;;  %6250 = vmatmul.msk.bf16.gmra.mxu2 %vm2914_vm2, %v8607_v42 }
 0x5ee   :  { %6344 = vmatmul.msk.bf16.gmra.mxu3 %vm2914_vm2, %v8609_v29 }
 0x5f0   :  { %v3122_v4 = vpop.f32.mrf.mxu2 }
 0x5f1   :  { %v3393_v10 = vpop.f32.mrf.mxu3 }
 0x5f2   :  { %v8617_v36 = vadd.f32 %v3393_v10, %v3113_v58  ;;  %v2994_v18 = vpop.f32.mrf.mxu1 }
 0x5f3   :  { %v3120_v46 = vadd.f32 %v3119_v9, %v2994_v18  ;;  %v8649_v9 = vld [vmem:[#allocation2 + $0xb0] sm:$0xff] }
 0x5f8   :  { %v3124_v7 = vpop.f32.mrf.mxu2 }
 0x5f9   :  { %v3395_v62 = vpop.f32.mrf.mxu3 }
 0x5fa   :  { %v8619_v35 = vadd.f32 %v3395_v62, %v3115_v26  ;;  %v2997_v45 = vpop.f32.mrf.mxu1 }
 0x5fb   :  { %v3123_v17 = vadd.f32 %v3122_v4, %v2997_v45  ;;  %v7117_v4 = vld [vmem:[%s9406_s3 + $0xd8] sm:$0xff] }
 0x5fc   :  { %4145 = vmatpush.bf16.msrb.mxu1 %v7117_v4 }
 0x5fd   :  { %6218 = vmatmul.msk.bf16.gmra.mxu1 %vm2914_vm2, %v8621_v19  ;;  %6251 = vmatmul.msk.bf16.gmra.mxu2 %vm2914_vm2, %v8621_v19 }
 0x5fe   :  { %6345 = vmatmul.msk.bf16.gmra.mxu3 %vm2914_vm2, %v8623_v39 }
 0x600   :  { %v3127_v28 = vpop.f32.mrf.mxu2 }
 0x601   :  { %v3398_v47 = vpop.f32.mrf.mxu3 }
 0x602   :  { %v8631_v16 = vadd.f32 %v3398_v47, %v3118_v44  ;;  %v2999_v12 = vpop.f32.mrf.mxu1  ;;  %v7133_v44 = vld [vmem:[%s9406_s3 + $0x118] sm:$0xff] }
 0x603   :  { %v3125_v41 = vadd.f32 %v3124_v7, %v2999_v12  ;;  %4531 = vmatpush.bf16.msrb.mxu3 %v7133_v44 }
 0x608   :  { %v3129_v48 = vpop.f32.mrf.mxu2 }
 0x609   :  { %v3400_v63 = vpop.f32.mrf.mxu3 }
 0x60a   :  { %v8633_v22 = vadd.f32 %v3400_v63, %v3120_v46  ;;  %v3002_v2 = vpop.f32.mrf.mxu1 }
 0x60b   :  { %v3128_v5 = vadd.f32 %v3127_v28, %v3002_v2 }
 0x60d   :  { %6219 = vmatmul.msk.bf16.gmra.mxu1 %vm2914_vm2, %v8635_v25  ;;  %6252 = vmatmul.msk.bf16.gmra.mxu2 %vm2914_vm2, %v8635_v25 }
 0x60e   :  { %6346 = vmatmul.msk.bf16.gmra.mxu3 %vm2914_vm2, %v8637_v54 }
 0x610   :  { %v3132_v15 = vpop.f32.mrf.mxu2 }
 0x611   :  { %v3403_v0 = vpop.f32.mrf.mxu3 }
 0x612   :  { %v8645_v58 = vadd.f32 %v3403_v0, %v3123_v17  ;;  %v3004_v34 = vpop.f32.mrf.mxu1 }
 0x613   :  { %v3130_v60 = vadd.f32 %v3129_v48, %v3004_v34 }
 0x618   :  { %v3134_v1 = vpop.f32.mrf.mxu2 }
 0x619   :  { %v3405_v49 = vpop.f32.mrf.mxu3 }
 0x61a   :  { %v8647_v20 = vadd.f32 %v3405_v49, %v3125_v41  ;;  %v3007_v31 = vpop.f32.mrf.mxu1  ;;  %v8672_v41 = vld [vmem:[#allocation2 + $0xb8] sm:$0xff] }
 0x61b   :  { %v3133_v26 = vadd.f32 %v3132_v15, %v3007_v31 }
 0x61d   :  { %6220 = vmatmul.msk.bf16.gmra.mxu1 %vm2914_vm2, %v8649_v9  ;;  %6429 = vmatmul.msk.bf16.vlgmr.msra.gmra.mxu2 %vm2914_vm2, %v8496_v61 }
 0x61e   :  { %6347 = vmatmul.msk.bf16.gmra.mxu3 %vm2914_vm2, %v8654_v14 }
 0x620   :  { %v3137_v10 = vpop.f32.mrf.mxu2 }
 0x621   :  { %v3408_v18 = vpop.f32.mrf.mxu3 }
 0x622   :  { %v8668_v46 = vadd.f32 %v3408_v18, %v3128_v5  ;;  %v3009_v7 = vpop.f32.mrf.mxu1 }
 0x623   :  { %v3135_v62 = vadd.f32 %v3134_v1, %v3009_v7 }
 0x628   :  { %v3139_v45 = vpop.f32.mrf.mxu2 }
 0x629   :  { %v3410_v17 = vpop.f32.mrf.mxu3 }
 0x62a   :  { %v8670_v28 = vadd.f32 %v3410_v17, %v3130_v60  ;;  %v3012_v47 = vpop.f32.mrf.mxu1 }
 0x62b   :  { %v3138_v12 = vadd.f32 %v3137_v10, %v3012_v47 }
 0x62d   :  { %6381 = vmatmul.msk.bf16.vlgmr.msra.gmra.mxu1 %vm2914_vm2, %v8484_v3  ;;  %6430 = vmatmul.msk.bf16.gmra.mxu2 %vm2914_vm2, %v8503_v43 }
 0x62e   :  { %6348 = vmatmul.msk.bf16.gmra.mxu3 %vm2914_vm2, %v8672_v41 }
 0x630   :  { %v3142_v48 = vpop.f32.mrf.mxu2 }
 0x631   :  { %v3413_v63 = vpop.f32.mrf.mxu3 }
 0x632   :  { %v8680_v2 = vadd.f32 %v3413_v63, %v3133_v26  ;;  %v3014_v5 = vpop.f32.mrf.mxu1 }
 0x633   :  { %v3140_v15 = vadd.f32 %v3139_v45, %v3014_v5 }
 0x638   :  { %v3144_v0 = vpop.f32.mrf.mxu2 }
 0x639   :  { %v3415_v34 = vpop.f32.mrf.mxu3 }
 0x63a   :  { %v8682_v60 = vadd.f32 %v3415_v34, %v3135_v62  ;;  %v3017_v1 = vpop.f32.mrf.mxu1 }
 0x63b   :  { %v3143_v49 = vadd.f32 %v3142_v48, %v3017_v1 }
 0x63d   :  { %6382 = vmatmul.msk.bf16.gmra.mxu1 %vm2914_vm2, %v8496_v61  ;;  %6431 = vmatmul.msk.bf16.gmra.mxu2 %vm2914_vm2, %v8513_v23 }
 0x63e   :  { %6477 = vmatmul.msk.bf16.vlgmr.msra.gmra.mxu3 %vm2914_vm2, %v8505_v32 }
 0x640   :  { %v3147_v3 = vpop.f32.mrf.mxu2 }
 0x641   :  { %v3418_v31 = vpop.f32.mrf.mxu3 }
 0x642   :  { %v8690_v26 = vadd.f32 %v3418_v31, %v3138_v12  ;;  %v3019_v53 = vpop.f32.mrf.mxu1 }
 0x643   :  { %v3145_v44 = vadd.f32 %v3144_v0, %v3019_v53 }
 0x648   :  { %v3149_v4 = vpop.f32.mrf.mxu2 }
 0x649   :  { %v3420_v10 = vpop.f32.mrf.mxu3 }
 0x64a   :  { %v8692_v18 = vadd.f32 %v3420_v10, %v3140_v15  ;;  %v3022_v7 = vpop.f32.mrf.mxu1 }
 0x64b   :  { %v3148_v62 = vadd.f32 %v3147_v3, %v3022_v7 }
 0x64d   :  { %6383 = vmatmul.msk.bf16.gmra.mxu1 %vm2914_vm2, %v8503_v43  ;;  %6432 = vmatmul.msk.bf16.gmra.mxu2 %vm2914_vm2, %v8523_v6  ;;  %v7124_v43 = vld [vmem:[%s9406_s3 + $0xf0] sm:$0xff] }
 0x64e   :  { %6478 = vmatmul.msk.bf16.gmra.mxu3 %vm2914_vm2, %v8515_v27  ;;  %4339 = vmatpush.bf16.msrb.mxu2 %v7124_v43  ;;  %v7132_v27 = vld [vmem:[%s9406_s3 + $0x110] sm:$0xff] }
 0x64f   :  { %v7116_v6 = vld [vmem:[%s9406_s3 + $0xd0] sm:$0xff]  ;;  %4532 = vmatpush.bf16.msrb.mxu3 %v7132_v27 }
 0x650   :  { %v3152_v61 = vpop.f32.mrf.mxu2  ;;  %4146 = vmatpush.bf16.msrb.mxu1 %v7116_v6 }
 0x651   :  { %v3423_v32 = vpop.f32.mrf.mxu3 }
 0x652   :  { %v8700_v45 = vadd.f32 %v3423_v32, %v3143_v49  ;;  %v3024_v17 = vpop.f32.mrf.mxu1 }
 0x653   :  { %v3150_v47 = vadd.f32 %v3149_v4, %v3024_v17 }
 0x658   :  { %v3154_v12 = vpop.f32.mrf.mxu2 }
 0x659   :  { %v3425_v48 = vpop.f32.mrf.mxu3 }
 0x65a   :  { %v8702_v63 = vadd.f32 %v3425_v48, %v3145_v44  ;;  %v3027_v5 = vpop.f32.mrf.mxu1 }
 0x65b   :  { %v3153_v15 = vadd.f32 %v3152_v61, %v3027_v5 }
 0x65d   :  { %6384 = vmatmul.msk.bf16.gmra.mxu1 %vm2914_vm2, %v8513_v23  ;;  %6433 = vmatmul.msk.bf16.gmra.mxu2 %vm2914_vm2, %v8544_v30 }
 0x65e   :  { %6479 = vmatmul.msk.bf16.gmra.mxu3 %vm2914_vm2, %v8530_v59 }
 0x660   :  { %v3157_v0 = vpop.f32.mrf.mxu2 }
 0x661   :  { %v3428_v34 = vpop.f32.mrf.mxu3 }
 0x662   :  { %v8719_v23 = vadd.f32 %v3428_v34, %v3148_v62  ;;  %v3029_v1 = vpop.f32.mrf.mxu1 }
 0x663   :  { %v3155_v49 = vadd.f32 %v3154_v12, %v3029_v1 }
 0x668   :  { %v3159_v3 = vpop.f32.mrf.mxu2 }
 0x669   :  { %v3430_v31 = vpop.f32.mrf.mxu3 }
 0x66a   :  { %v8721_v59 = vadd.f32 %v3430_v31, %v3150_v47  ;;  %v3032_v53 = vpop.f32.mrf.mxu1 }
 0x66b   :  { %v3158_v44 = vadd.f32 %v3157_v0, %v3032_v53 }
 0x66d   :  { %6385 = vmatmul.msk.bf16.gmra.mxu1 %vm2914_vm2, %v8525_v13  ;;  %6434 = vmatmul.msk.bf16.gmra.mxu2 %vm2914_vm2, %v8554_v57 }
 0x66e   :  { %6480 = vmatmul.msk.bf16.gmra.mxu3 %vm2914_vm2, %v8546_v21 }
 0x670   :  { %v3162_v4 = vpop.f32.mrf.mxu2 }
 0x671   :  { %v3433_v10 = vpop.f32.mrf.mxu3 }
 0x672   :  { %v8729_v7 = vadd.f32 %v3433_v10, %v3153_v15  ;;  %v3034_v62 = vpop.f32.mrf.mxu1 }
 0x673   :  { %v3160_v61 = vadd.f32 %v3159_v3, %v3034_v62 }
 0x678   :  { %v3164_v32 = vpop.f32.mrf.mxu2 }
 0x679   :  { %v3435_v17 = vpop.f32.mrf.mxu3 }
 0x67a   :  { %v8731_v47 = vadd.f32 %v3435_v17, %v3155_v49  ;;  %v3037_v12 = vpop.f32.mrf.mxu1 }
 0x67b   :  { %v3163_v48 = vadd.f32 %v3162_v4, %v3037_v12  ;;  %v7123_v12 = vld [vmem:[%s9406_s3 + $0xe8] sm:$0xff] }
 0x67c   :  { %4340 = vmatpush.bf16.msrb.mxu2 %v7123_v12 }
 0x67d   :  { %6386 = vmatmul.msk.bf16.gmra.mxu1 %vm2914_vm2, %v8544_v30  ;;  %6435 = vmatmul.msk.bf16.gmra.mxu2 %vm2914_vm2, %v8568_v40 }
 0x67e   :  { %6481 = vmatmul.msk.bf16.gmra.mxu3 %vm2914_vm2, %v8556_v11 }
 0x680   :  { %v3167_v21 = vpop.f32.mrf.mxu2 }
 0x681   :  { %v3438_v5 = vpop.f32.mrf.mxu3 }
 0x682   :  { %v8739_v15 = vadd.f32 %v3438_v5, %v3158_v44  ;;  %v3039_v43 = vpop.f32.mrf.mxu1 }
 0x683   :  { %v3165_v27 = vadd.f32 %v3164_v32, %v3039_v43 }
 0x688   :  { %v3169_v6 = vpop.f32.mrf.mxu2 }
 0x689   :  { %v3440_v0 = vpop.f32.mrf.mxu3 }
 0x68a   :  { %v8741_v34 = vadd.f32 %v3440_v0, %v3160_v61  ;;  %v3042_v1 = vpop.f32.mrf.mxu1 }
 0x68b   :  { %v3168_v49 = vadd.f32 %v3167_v21, %v3042_v1  ;;  %v7115_v21 = vld [vmem:[%s9406_s3 + $0xc8] sm:$0xff] }
 0x68c   :  { %4147 = vmatpush.bf16.msrb.mxu1 %v7115_v21 }
 0x68d   :  { %6387 = vmatmul.msk.bf16.gmra.mxu1 %vm2914_vm2, %v8554_v57  ;;  %6436 = vmatmul.msk.bf16.gmra.mxu2 %vm2914_vm2, %v8582_v55 }
 0x68e   :  { %6482 = vmatmul.msk.bf16.gmra.mxu3 %vm2914_vm2, %v8570_v8 }
 0x690   :  { %v3172_v3 = vpop.f32.mrf.mxu2 }
 0x691   :  { %v3443_v31 = vpop.f32.mrf.mxu3 }
 0x692   :  { %v8749_v53 = vadd.f32 %v3443_v31, %v3163_v48  ;;  %v3044_v44 = vpop.f32.mrf.mxu1  ;;  %v7131_v48 = vld [vmem:[%s9406_s3 + $0x108] sm:$0xff] }
 0x693   :  { %v3170_v4 = vadd.f32 %v3169_v6, %v3044_v44  ;;  %4533 = vmatpush.bf16.msrb.mxu3 %v7131_v48 }
 0x698   :  { %v3174_v10 = vpop.f32.mrf.mxu2 }
 0x699   :  { %v3445_v62 = vpop.f32.mrf.mxu3 }
 0x69a   :  { %v8751_v61 = vadd.f32 %v3445_v62, %v3165_v27  ;;  %v3047_v32 = vpop.f32.mrf.mxu1 }
 0x69b   :  { %v3173_v17 = vadd.f32 %v3172_v3, %v3047_v32 }
 0x69d   :  { %6388 = vmatmul.msk.bf16.gmra.mxu1 %vm2914_vm2, %v8568_v40  ;;  %6437 = vmatmul.msk.bf16.gmra.mxu2 %vm2914_vm2, %v8607_v42 }
 0x69e   :  { %6483 = vmatmul.msk.bf16.gmra.mxu3 %vm2914_vm2, %v8589_v24 }
 0x6a0   :  { %v3764_v5 = vpop.f32.mrf.mxu2 }
 0x6a1   :  { %v3448_v43 = vpop.f32.mrf.mxu3 }
 0x6a2   :  { %v8768_v27 = vadd.f32 %v3448_v43, %v3168_v49  ;;  %v3049_v6 = vpop.f32.mrf.mxu1 }
 0x6a3   :  { %v3175_v0 = vadd.f32 %v3174_v10, %v3049_v6 }
 0x6a8   :  { %v3766_v1 = vpop.f32.mrf.mxu2 }
 0x6a9   :  { %v3450_v3 = vpop.f32.mrf.mxu3 }
 0x6aa   :  { %v8770_v31 = vadd.f32 %v3450_v3, %v3170_v4  ;;  %v3571_v44 = vpop.f32.mrf.mxu1 }
 0x6ab   :  { %v3651_v62 = vadd.f32 %v3571_v44, %v8564_v33 }
 0x6ad   :  { %6389 = vmatmul.msk.bf16.gmra.mxu1 %vm2914_vm2, %v8584_v37  ;;  %6438 = vmatmul.msk.bf16.gmra.mxu2 %vm2914_vm2, %v8621_v19  ;;  %v3844_v32 = vadd.f32 %v3764_v5, %v3651_v62 }
 0x6ae   :  { %6484 = vmatmul.msk.bf16.gmra.mxu3 %vm2914_vm2, %v8609_v29 }
 0x6b0   :  { %v3769_v49 = vpop.f32.mrf.mxu2 }
 0x6b1   :  { %v3453_v12 = vpop.f32.mrf.mxu3 }
 0x6b2   :  { %v8779_v10 = vadd.f32 %v3453_v12, %v3173_v17  ;;  %v3573_v48 = vpop.f32.mrf.mxu1 }
 0x6b3   :  { %v3652_v4 = vadd.f32 %v3573_v48, %v8566_v52 }
 0x6b5   :  { %v3845_v21 = vadd.f32 %v3766_v1, %v3652_v4 }
 0x6b8   :  { %v3771_v43 = vpop.f32.mrf.mxu2 }
 0x6b9   :  { %v3455_v33 = vpop.f32.mrf.mxu3 }
 0x6ba   :  { %v8782_v6 = vadd.f32 %v3455_v33, %v3175_v0  ;;  %v3576_v3 = vpop.f32.mrf.mxu1 }
 0x6bb   :  { %v3653_v44 = vadd.f32 %v3576_v3, %v8578_v56 }
 0x6bd   :  { %6390 = vmatmul.msk.bf16.gmra.mxu1 %vm2914_vm2, %v8607_v42  ;;  %6439 = vmatmul.msk.bf16.gmra.mxu2 %vm2914_vm2, %v8635_v25  ;;  %v3846_v5 = vadd.f32 %v3769_v49, %v3653_v44 }
 0x6be   :  { %6485 = vmatmul.msk.bf16.gmra.mxu3 %vm2914_vm2, %v8623_v39 }
 0x6c0   :  { %v3774_v17 = vpop.f32.mrf.mxu2 }
 0x6c1   :  { %v3957_v52 = vpop.f32.mrf.mxu3 }
 0x6c2   :  { %v8791_v1 = vadd.f32 %v3957_v52, %v3844_v32  ;;  %v3578_v62 = vpop.f32.mrf.mxu1 }
 0x6c3   :  { %v3654_v0 = vadd.f32 %v3578_v62, %v8580_v51 }
 0x6c5   :  { %v3847_v12 = vadd.f32 %v3771_v43, %v3654_v0 }
 0x6c8   :  { %v3776_v48 = vpop.f32.mrf.mxu2 }
 0x6c9   :  { %v3959_v56 = vpop.f32.mrf.mxu3 }
 0x6ca   :  { %v8794_v4 = vadd.f32 %v3959_v56, %v3845_v21  ;;  %v3581_v33 = vpop.f32.mrf.mxu1 }
 0x6cb   :  { %v3655_v3 = vadd.f32 %v3581_v33, %v8603_v38 }
 0x6cc   :  { %9545 = vst [vmem:[#allocation12_spill] sm:$0xff] %v8794_v4  ;;  %v8809_v4 = vld [vmem:[#allocation2 + $0xc8] sm:$0xff] }
 0x6cd   :  { %6391 = vmatmul.msk.bf16.gmra.mxu1 %vm2914_vm2, %v8621_v19  ;;  %6440 = vmatmul.msk.bf16.gmra.mxu2 %vm2914_vm2, %v8649_v9  ;;  %v3848_v49 = vadd.f32 %v3774_v17, %v3655_v3  ;;  %v7122_v17 = vld [vmem:[%s9406_s3 + $0xe0] sm:$0xff] }
 0x6ce   :  { %6486 = vmatmul.msk.bf16.gmra.mxu3 %vm2914_vm2, %v8637_v54  ;;  %4341 = vmatpush.bf16.msrb.mxu2 %v7122_v17 }
 0x6d0   :  { %v3779_v32 = vpop.f32.mrf.mxu2 }
 0x6d1   :  { %v3962_v51 = vpop.f32.mrf.mxu3 }
 0x6d2   :  { %v8803_v43 = vadd.f32 %v3962_v51, %v3846_v5  ;;  %v3583_v44 = vpop.f32.mrf.mxu1  ;;  %v7114_v5 = vld [vmem:[%s9406_s3 + $0xc0] sm:$0xff] }
 0x6d3   :  { %v3656_v21 = vadd.f32 %v3583_v44, %v8605_v50  ;;  %4148 = vmatpush.bf16.msrb.mxu1 %v7114_v5 }
 0x6d4   :  { %9546 = vst [vmem:[#allocation14_spill] sm:$0xff] %v8803_v43  ;;  %v8834_v43 = vld [vmem:[#allocation2 + $0xd0] sm:$0xff] }
 0x6d5   :  { %v3849_v52 = vadd.f32 %v3776_v48, %v3656_v21 }
 0x6d8   :  { %v3781_v62 = vpop.f32.mrf.mxu2 }
 0x6d9   :  { %v3964_v38 = vpop.f32.mrf.mxu3 }
 0x6da   :  { %v8806_v0 = vadd.f32 %v3964_v38, %v3847_v12  ;;  %v3586_v56 = vpop.f32.mrf.mxu1 }
 0x6db   :  { %v3657_v33 = vadd.f32 %v3586_v56, %v8617_v36  ;;  %v7130_v36 = vld [vmem:[%s9406_s3 + $0x100] sm:$0xff] }
 0x6dc   :  { %9547 = vst [vmem:[#allocation16_spill] sm:$0xff] %v8806_v0  ;;  %4534 = vmatpush.bf16.msrb.mxu3 %v7130_v36  ;;  %v8832_v0 = vld [vmem:[#allocation2 + $0xc0] sm:$0xff] }
 0x6dd   :  { %6392 = vmatmul.msk.bf16.gmra.mxu1 %vm2914_vm2, %v8635_v25  ;;  %6441 = vmatmul.msk.bf16.gmra.mxu2 %vm2914_vm2, %v8809_v4  ;;  %v3850_v50 = vadd.f32 %v3779_v32, %v3657_v33 }
 0x6de   :  { %6487 = vmatmul.msk.bf16.gmra.mxu3 %vm2914_vm2, %v8654_v14 }
 0x6e0   :  { %v3784_v12 = vpop.f32.mrf.mxu2 }
 0x6e1   :  { %v3967_v48 = vpop.f32.mrf.mxu3 }
 0x6e2   :  { %v8826_v3 = vadd.f32 %v3967_v48, %v3848_v49  ;;  %v3588_v51 = vpop.f32.mrf.mxu1 }
 0x6e3   :  { %v3658_v32 = vadd.f32 %v3588_v51, %v8619_v35 }
 0x6e4   :  { %9548 = vst [vmem:[#allocation11_spill] sm:$0xff] %v8826_v3  ;;  %v8866_v3 = vld [vmem:[#allocation2 + $0xd0] sm:$0xff] }
 0x6e5   :  { %v3851_v44 = vadd.f32 %v3781_v62, %v3658_v32 }
 0x6e8   :  { %v3786_v21 = vpop.f32.mrf.mxu2 }
 0x6e9   :  { %v3969_v38 = vpop.f32.mrf.mxu3 }
 0x6ea   :  { %v8829_v56 = vadd.f32 %v3969_v38, %v3849_v52  ;;  %v3591_v33 = vpop.f32.mrf.mxu1 }
 0x6eb   :  { %v3659_v17 = vadd.f32 %v3591_v33, %v8631_v16 }
 0x6ec   :  { %9549 = vst [vmem:[#allocation18_spill] sm:$0xff] %v8829_v56  ;;  %v8848_v56 = vld [vmem:[#allocation2 + $0xc8] sm:$0xff] }
 0x6ed   :  { %6393 = vmatmul.msk.bf16.gmra.mxu1 %vm2914_vm2, %v8832_v0  ;;  %6442 = vmatmul.msk.bf16.gmra.mxu2 %vm2914_vm2, %v8834_v43  ;;  %v3852_v49 = vadd.f32 %v3784_v12, %v3659_v17  ;;  %v8850_v12 = vld [vmem:[#allocation2 + $0xd8] sm:$0xff]  ;;  %v8852_v17 = vld [vmem:[#allocation2 + $0xd0] sm:$0xff] }
 0x6ee   :  { %6488 = vmatmul.msk.bf16.gmra.mxu3 %vm2914_vm2, %v8672_v41 }
 0x6f0   :  { %v3789_v35 = vpop.f32.mrf.mxu2 }
 0x6f1   :  { %v3972_v52 = vpop.f32.mrf.mxu3 }
 0x6f2   :  { %v8842_v62 = vadd.f32 %v3972_v52, %v3850_v50  ;;  %v3593_v36 = vpop.f32.mrf.mxu1 }
 0x6f3   :  { %v3660_v16 = vadd.f32 %v3593_v36, %v8633_v22 }
 0x6f4   :  { %9550 = vst [vmem:[#allocation13_spill] sm:$0xff] %v8842_v62 }
 0x6f5   :  { %v3853_v5 = vadd.f32 %v3786_v21, %v3660_v16 }
 0x6f8   :  { %v3791_v48 = vpop.f32.mrf.mxu2 }
 0x6f9   :  { %v3974_v51 = vpop.f32.mrf.mxu3 }
 0x6fa   :  { %v8845_v32 = vadd.f32 %v3974_v51, %v3851_v44  ;;  %v3596_v38 = vpop.f32.mrf.mxu1 }
 0x6fb   :  { %v3661_v33 = vadd.f32 %v3596_v38, %v8645_v58 }
 0x6fc   :  { %9551 = vst [vmem:[#allocation20_spill] sm:$0xff] %v8845_v32 }
 0x6fd   :  { %6394 = vmatmul.msk.bf16.gmra.mxu1 %vm2914_vm2, %v8848_v56  ;;  %6443 = vmatmul.msk.bf16.gmra.mxu2 %vm2914_vm2, %v8850_v12  ;;  %v3854_v22 = vadd.f32 %v3789_v35, %v3661_v33  ;;  %v8868_v35 = vld [vmem:[#allocation2 + $0xe0] sm:$0xff]  ;;  %v8870_v33 = vld [vmem:[#allocation2 + $0xd8] sm:$0xff] }
 0x6fe   :  { %6489 = vmatmul.msk.bf16.gmra.mxu3 %vm2914_vm2, %v8852_v17  ;;  %9554 = vst [vmem:[#allocation17_spill] sm:$0xff] %v8868_v35 }
 0x700   :  { %v3794_v50 = vpop.f32.mrf.mxu2 }
 0x701   :  { %v3977_v44 = vpop.f32.mrf.mxu3 }
 0x702   :  { %v8860_v21 = vadd.f32 %v3977_v44, %v3852_v49  ;;  %v3598_v58 = vpop.f32.mrf.mxu1 }
 0x703   :  { %v3662_v52 = vadd.f32 %v3598_v58, %v8647_v20 }
 0x704   :  { %9552 = vst [vmem:[#allocation15_spill] sm:$0xff] %v8860_v21 }
 0x705   :  { %v3855_v36 = vadd.f32 %v3791_v48, %v3662_v52 }
 0x708   :  { %v3796_v16 = vpop.f32.mrf.mxu2 }
 0x709   :  { %v3979_v51 = vpop.f32.mrf.mxu3 }
 0x70a   :  { %v8863_v38 = vadd.f32 %v3979_v51, %v3853_v5  ;;  %v3601_v32 = vpop.f32.mrf.mxu1 }
 0x70b   :  { %v3663_v62 = vadd.f32 %v3601_v32, %v8668_v46 }
 0x70c   :  { %9553 = vst [vmem:[#allocation22_spill] sm:$0xff] %v8863_v38 }
 0x70d   :  { %6395 = vmatmul.msk.bf16.gmra.mxu1 %vm2914_vm2, %v8866_v3  ;;  %6444 = vmatmul.msk.bf16.gmra.mxu2 %vm2914_vm2, %v8868_v35  ;;  %v3856_v20 = vadd.f32 %v3794_v50, %v3663_v62  ;;  %v8884_v35 = vld [vmem:[#allocation2 + $0xd8] sm:$0xff]  ;;  %v8886_v62 = vld [vmem:[#allocation2 + $0xe0] sm:$0xff] }
 0x70e   :  { %6490 = vmatmul.msk.bf16.gmra.mxu3 %vm2914_vm2, %v8870_v33 }
 0x710   :  { %v3799_v49 = vpop.f32.mrf.mxu2 }
 0x711   :  { %v3982_v5 = vpop.f32.mrf.mxu3 }
 0x712   :  { %v8878_v48 = vadd.f32 %v3982_v5, %v3854_v22  ;;  %v3603_v46 = vpop.f32.mrf.mxu1 }
 0x713   :  { %v3664_v32 = vadd.f32 %v3603_v46, %v8670_v28 }
 0x714   :  { %9555 = vst [vmem:[#allocation24_spill] sm:$0xff] %v8878_v48  ;;  %v8900_v48 = vld [vmem:[#allocation2 + $0xe8] sm:$0xff] }
 0x715   :  { %v3857_v44 = vadd.f32 %v3796_v16, %v3664_v32 }
 0x718   :  { %v3801_v58 = vpop.f32.mrf.mxu2 }
 0x719   :  { %v3984_v52 = vpop.f32.mrf.mxu3 }
 0x71a   :  { %v8881_v51 = vadd.f32 %v3984_v52, %v3855_v36  ;;  %v3606_v38 = vpop.f32.mrf.mxu1 }
 0x71b   :  { %v3665_v21 = vadd.f32 %v3606_v38, %v8680_v2 }
 0x71c   :  { %9556 = vst [vmem:[#allocation19_spill] sm:$0xff] %v8881_v51 }
 0x71d   :  { %6396 = vmatmul.msk.bf16.gmra.mxu1 %vm2914_vm2, %v8884_v35  ;;  %6573 = vmatmul.msk.bf16.vlgmr.msrb.gmra.mxu2 %vm2914_vm2, %v8544_v30  ;;  %v3858_v22 = vadd.f32 %v3799_v49, %v3665_v21 }
 0x71e   :  { %6491 = vmatmul.msk.bf16.gmra.mxu3 %vm2914_vm2, %v8886_v62 }
 0x720   :  { %v3804_v28 = vpop.f32.mrf.mxu2 }
 0x721   :  { %v3987_v50 = vpop.f32.mrf.mxu3 }
 0x722   :  { %v8894_v36 = vadd.f32 %v3987_v50, %v3856_v20  ;;  %v3608_v16 = vpop.f32.mrf.mxu1 }
 0x723   :  { %v3666_v2 = vadd.f32 %v3608_v16, %v8682_v60 }
 0x725   :  { %v3859_v38 = vadd.f32 %v3801_v58, %v3666_v2 }
 0x728   :  { %v3806_v5 = vpop.f32.mrf.mxu2 }
 0x729   :  { %v3989_v46 = vpop.f32.mrf.mxu3 }
 0x72a   :  { %v8897_v32 = vadd.f32 %v3989_v46, %v3857_v44  ;;  %v3611_v52 = vpop.f32.mrf.mxu1 }
 0x72b   :  { %v3667_v51 = vadd.f32 %v3611_v52, %v8690_v26 }
 0x72d   :  { %6525 = vmatmul.msk.bf16.vlgmr.msrb.gmra.mxu1 %vm2914_vm2, %v8525_v13  ;;  %6574 = vmatmul.msk.bf16.gmra.mxu2 %vm2914_vm2, %v8554_v57  ;;  %v3860_v21 = vadd.f32 %v3804_v28, %v3667_v51 }
 0x72e   :  { %6492 = vmatmul.msk.bf16.gmra.mxu3 %vm2914_vm2, %v8900_v48 }
 0x730   :  { %v3809_v60 = vpop.f32.mrf.mxu2 }
 0x731   :  { %v3992_v20 = vpop.f32.mrf.mxu3 }
 0x732   :  { %v8908_v49 = vadd.f32 %v3992_v20, %v3858_v22  ;;  %v3613_v44 = vpop.f32.mrf.mxu1 }
 0x733   :  { %v3668_v58 = vadd.f32 %v3613_v44, %v8692_v18 }
 0x735   :  { %v3861_v26 = vadd.f32 %v3806_v5, %v3668_v58 }
 0x738   :  { %v3811_v50 = vpop.f32.mrf.mxu2 }
 0x739   :  { %v3994_v16 = vpop.f32.mrf.mxu3 }
 0x73a   :  { %v8911_v2 = vadd.f32 %v3994_v16, %v3859_v38  ;;  %v3616_v13 = vpop.f32.mrf.mxu1 }
 0x73b   :  { %v3669_v46 = vadd.f32 %v3616_v13, %v8700_v45 }
 0x73d   :  { %6526 = vmatmul.msk.bf16.gmra.mxu1 %vm2914_vm2, %v8544_v30  ;;  %6575 = vmatmul.msk.bf16.gmra.mxu2 %vm2914_vm2, %v8568_v40  ;;  %v3862_v51 = vadd.f32 %v3809_v60, %v3669_v46 }
 0x73e   :  { %6621 = vmatmul.msk.bf16.vlgmr.msrb.gmra.mxu3 %vm2914_vm2, %v8556_v11 }
 0x740   :  { %v3814_v22 = vpop.f32.mrf.mxu2 }
 0x741   :  { %v3997_v18 = vpop.f32.mrf.mxu3 }
 0x742   :  { %v8920_v28 = vadd.f32 %v3997_v18, %v3860_v21  ;;  %v3618_v5 = vpop.f32.mrf.mxu1 }
 0x743   :  { %v3670_v38 = vadd.f32 %v3618_v5, %v8702_v63 }
 0x745   :  { %v3863_v52 = vadd.f32 %v3811_v50, %v3670_v38 }
 0x748   :  { %v3816_v20 = vpop.f32.mrf.mxu2 }
 0x749   :  { %v3999_v45 = vpop.f32.mrf.mxu3 }
 0x74a   :  { %v8923_v44 = vadd.f32 %v3999_v45, %v3861_v26  ;;  %v3621_v30 = vpop.f32.mrf.mxu1 }
 0x74b   :  { %v3671_v58 = vadd.f32 %v3621_v30, %v8719_v23 }
 0x74d   :  { %6527 = vmatmul.msk.bf16.gmra.mxu1 %vm2914_vm2, %v8554_v57  ;;  %6576 = vmatmul.msk.bf16.gmra.mxu2 %vm2914_vm2, %v8582_v55  ;;  %v3864_v11 = vadd.f32 %v3814_v22, %v3671_v58 }
 0x74e   :  { %6622 = vmatmul.msk.bf16.gmra.mxu3 %vm2914_vm2, %v8570_v8 }
 0x750   :  { %v3819_v21 = vpop.f32.mrf.mxu2 }
 0x751   :  { %v4002_v63 = vpop.f32.mrf.mxu3 }
 0x752   :  { %v8932_v60 = vadd.f32 %v4002_v63, %v3862_v51  ;;  %v3623_v50 = vpop.f32.mrf.mxu1 }
 0x753   :  { %v3672_v26 = vadd.f32 %v3623_v50, %v8721_v59 }
 0x755   :  { %v3865_v16 = vadd.f32 %v3816_v20, %v3672_v26 }
 0x758   :  { %v3821_v13 = vpop.f32.mrf.mxu2 }
 0x759   :  { %v4004_v23 = vpop.f32.mrf.mxu3 }
 0x75a   :  { %v8935_v46 = vadd.f32 %v4004_v23, %v3863_v52  ;;  %v3626_v57 = vpop.f32.mrf.mxu1 }
 0x75b   :  { %v3673_v18 = vadd.f32 %v3626_v57, %v8729_v7 }
 0x75d   :  { %6528 = vmatmul.msk.bf16.gmra.mxu1 %vm2914_vm2, %v8568_v40  ;;  %6577 = vmatmul.msk.bf16.gmra.mxu2 %vm2914_vm2, %v8607_v42  ;;  %v3866_v8 = vadd.f32 %v3819_v21, %v3673_v18 }
 0x75e   :  { %6623 = vmatmul.msk.bf16.gmra.mxu3 %vm2914_vm2, %v8589_v24 }
 0x760   :  { %v3824_v55 = vpop.f32.mrf.mxu2 }
 0x761   :  { %v4007_v59 = vpop.f32.mrf.mxu3 }
 0x762   :  { %v8944_v51 = vadd.f32 %v4007_v59, %v3864_v11  ;;  %v3628_v22 = vpop.f32.mrf.mxu1 }
 0x763   :  { %v3674_v5 = vadd.f32 %v3628_v22, %v8731_v47 }
 0x765   :  { %v3867_v38 = vadd.f32 %v3821_v13, %v3674_v5 }
 0x768   :  { %v3826_v52 = vpop.f32.mrf.mxu2 }
 0x769   :  { %v4009_v7 = vpop.f32.mrf.mxu3 }
 0x76a   :  { %v8947_v20 = vadd.f32 %v4009_v7, %v3865_v16  ;;  %v3631_v40 = vpop.f32.mrf.mxu1 }
 0x76b   :  { %v3675_v45 = vadd.f32 %v3631_v40, %v8739_v15 }
 0x76d   :  { %6529 = vmatmul.msk.bf16.gmra.mxu1 %vm2914_vm2, %v8584_v37  ;;  %6578 = vmatmul.msk.bf16.gmra.mxu2 %vm2914_vm2, %v8621_v19  ;;  %v3868_v24 = vadd.f32 %v3824_v55, %v3675_v45 }
 0x76e   :  { %6624 = vmatmul.msk.bf16.gmra.mxu3 %vm2914_vm2, %v8609_v29 }
 0x770   :  { %v3829_v30 = vpop.f32.mrf.mxu2 }
 0x771   :  { %v4012_v47 = vpop.f32.mrf.mxu3 }
 0x772   :  { %v8956_v58 = vadd.f32 %v4012_v47, %v3866_v8  ;;  %v3633_v11 = vpop.f32.mrf.mxu1  ;;  %v7157_v47 = vld [vmem:[%s9408_s5 + $0xb8] sm:$0xff] }
 0x773   :  { %v3676_v21 = vadd.f32 %v3633_v11, %v8741_v34  ;;  %4931 = vmatpush.bf16.msra.mxu3 %v7157_v47  ;;  %v9561_v47 = vld [vmem:[#allocation17_spill] sm:$0xff] }
 0x775   :  { %v3869_v63 = vadd.f32 %v3826_v52, %v3676_v21 }
 0x778   :  { %v3831_v50 = vpop.f32.mrf.mxu2 }
 0x779   :  { %v4014_v15 = vpop.f32.mrf.mxu3 }
 0x77a   :  { %v8959_v26 = vadd.f32 %v4014_v15, %v3867_v38  ;;  %v3636_v37 = vpop.f32.mrf.mxu1 }
 0x77b   :  { %v3677_v16 = vadd.f32 %v3636_v37, %v8749_v53 }
 0x77d   :  { %6530 = vmatmul.msk.bf16.gmra.mxu1 %vm2914_vm2, %v8607_v42  ;;  %6579 = vmatmul.msk.bf16.gmra.mxu2 %vm2914_vm2, %v8635_v25  ;;  %v3870_v29 = vadd.f32 %v3829_v30, %v3677_v16  ;;  %v7141_v30 = vld [vmem:[%s9408_s5 + $0x38] sm:$0xff] }
 0x77e   :  { %6625 = vmatmul.msk.bf16.gmra.mxu3 %vm2914_vm2, %v8623_v39  ;;  %4844 = vmatpush.bf16.msra.mxu2 %v7141_v30  ;;  %v9560_v30 = vld [vmem:[#allocation11_spill] sm:$0xff] }
 0x780   :  { %v3834_v13 = vpop.f32.mrf.mxu2 }
 0x781   :  { %v4017_v34 = vpop.f32.mrf.mxu3 }
 0x782   :  { %v8968_v23 = vadd.f32 %v4017_v34, %v3868_v24  ;;  %v3638_v57 = vpop.f32.mrf.mxu1 }
 0x783   :  { %v3678_v18 = vadd.f32 %v3638_v57, %v8751_v61 }
 0x785   :  { %v3871_v8 = vadd.f32 %v3831_v50, %v3678_v18  ;;  %v9557_v18 = vld [vmem:[#allocation12_spill] sm:$0xff] }
 0x788   :  { %v3836_v55 = vpop.f32.mrf.mxu2 }
 0x789   :  { %v4019_v53 = vpop.f32.mrf.mxu3 }
 0x78a   :  { %v8971_v59 = vadd.f32 %v4019_v53, %v3869_v63  ;;  %v3641_v42 = vpop.f32.mrf.mxu1 }
 0x78b   :  { %v3679_v22 = vadd.f32 %v3641_v42, %v8768_v27  ;;  %v7149_v27 = vld [vmem:[%s9408_s5 + $0x78] sm:$0xff] }
 0x78c   :  { %4782 = vmatpush.bf16.msra.mxu1 %v7149_v27 }
 0x78d   :  { %6531 = vmatmul.msk.bf16.gmra.mxu1 %vm2914_vm2, %v8621_v19  ;;  %6580 = vmatmul.msk.bf16.gmra.mxu2 %vm2914_vm2, %v8649_v9  ;;  %v3872_v39 = vadd.f32 %v3834_v13, %v3679_v22  ;;  %v9558_v22 = vld [vmem:[#allocation14_spill] sm:$0xff] }
 0x78e   :  { %6626 = vmatmul.msk.bf16.gmra.mxu3 %vm2914_vm2, %v8637_v54 }
 0x790   :  { %v3839_v5 = vpop.f32.mrf.mxu2 }
 0x791   :  { %v4022_v61 = vpop.f32.mrf.mxu3 }
 0x792   :  { %v8980_v38 = vadd.f32 %v4022_v61, %v3870_v29  ;;  %v3643_v52 = vpop.f32.mrf.mxu1  ;;  %v7156_v61 = vld [vmem:[%s9408_s5 + $0xb0] sm:$0xff] }
 0x793   :  { %v3680_v7 = vadd.f32 %v3643_v52, %v8770_v31  ;;  %4932 = vmatpush.bf16.msra.mxu3 %v7156_v61 }
 0x795   :  { %v3873_v40 = vadd.f32 %v3836_v55, %v3680_v7 }
 0x798   :  { %v3841_v19 = vpop.f32.mrf.mxu2 }
 0x799   :  { %v4024_v45 = vpop.f32.mrf.mxu3 }
 0x79a   :  { %v8986_v9 = vadd.f32 %v4024_v45, %v3871_v8  ;;  %v3646_v24 = vpop.f32.mrf.mxu1 }
 0x79b   :  { %v3681_v54 = vadd.f32 %v3646_v24, %v8779_v10 }
 0x79d   :  { %6532 = vmatmul.msk.bf16.gmra.mxu1 %vm2914_vm2, %v8635_v25  ;;  %6581 = vmatmul.msk.bf16.gmra.mxu2 %vm2914_vm2, %v8809_v4  ;;  %v3874_v31 = vadd.f32 %v3839_v5, %v3681_v54  ;;  %v7140_v5 = vld [vmem:[%s9408_s5 + $0x30] sm:$0xff] }
 0x79e   :  { %6627 = vmatmul.msk.bf16.gmra.mxu3 %vm2914_vm2, %v8654_v14  ;;  %4845 = vmatpush.bf16.msra.mxu2 %v7140_v5  ;;  %v7155_v5 = vld [vmem:[%s9408_s5 + $0xa8] sm:$0xff] }
 0x79f   :  { %4933 = vmatpush.bf16.msra.mxu3 %v7155_v5 }
 0x7a0   :  { %v4343_v10 = vpop.f32.mrf.mxu2 }
 0x7a1   :  { %v4027_v11 = vpop.f32.mrf.mxu3 }
 0x7a2   :  { %v9001_v21 = vadd.f32 %v4027_v11, %v3872_v39  ;;  %v3648_v63 = vpop.f32.mrf.mxu1  ;;  %v9045_v11 = vld [vmem:[%s9407_s4] ss:$0 sm:$0xff] }
 0x7a3   :  { %v3682_v25 = vadd.f32 %v3648_v63, %v8782_v6 }
 0x7a5   :  { %v3875_v50 = vadd.f32 %v3841_v19, %v3682_v25 }
 0x7a8   :  { %v4345_v15 = vpop.f32.mrf.mxu2 }
 0x7a9   :  { %v4029_v4 = vpop.f32.mrf.mxu3 }
 0x7aa   :  { %v9004_v37 = vadd.f32 %v4029_v4, %v3873_v40  ;;  %v4150_v16 = vpop.f32.mrf.mxu1  ;;  %v9559_v40 = vld [vmem:[#allocation16_spill] sm:$0xff]  ;;  %v9562_v4 = vld [vmem:[#allocation18_spill] sm:$0xff] }
 0x7ab   :  { %v4230_v14 = vadd.f32 %v4150_v16, %v8791_v1  ;;  %v7148_v1 = vld [vmem:[%s9408_s5 + $0x70] sm:$0xff] }
 0x7ac   :  { %4783 = vmatpush.bf16.msra.mxu1 %v7148_v1 }
 0x7ad   :  { %6533 = vmatmul.msk.bf16.gmra.mxu1 %vm2914_vm2, %v8832_v0  ;;  %6582 = vmatmul.msk.bf16.gmra.mxu2 %vm2914_vm2, %v8834_v43  ;;  %v4423_v29 = vadd.f32 %v4343_v10, %v4230_v14 }
 0x7ae   :  { %6628 = vmatmul.msk.bf16.gmra.mxu3 %vm2914_vm2, %v8672_v41 }
 0x7b0   :  { %v4348_v13 = vpop.f32.mrf.mxu2 }
 0x7b1   :  { %v4032_v6 = vpop.f32.mrf.mxu3 }
 0x7b2   :  { %v9013_v34 = vadd.f32 %v4032_v6, %v3874_v31  ;;  %v4152_v57 = vpop.f32.mrf.mxu1 }
 0x7b3   :  { %v4231_v8 = vadd.f32 %v4152_v57, %v9557_v18 }
 0x7b5   :  { %v4424_v55 = vadd.f32 %v4345_v15, %v4231_v8 }
 0x7b8   :  { %v4350_v0 = vpop.f32.mrf.mxu2 }
 0x7b9   :  { %v4034_v53 = vpop.f32.mrf.mxu3 }
 0x7ba   :  { %v9019_v43 = vadd.f32 %v4034_v53, %v3875_v50  ;;  %v4155_v42 = vpop.f32.mrf.mxu1 }
 0x7bb   :  { %v4232_v41 = vadd.f32 %v4155_v42, %v9558_v22 }
 0x7bd   :  { %6534 = vmatmul.msk.bf16.gmra.mxu1 %vm2914_vm2, %v8848_v56  ;;  %6583 = vmatmul.msk.bf16.gmra.mxu2 %vm2914_vm2, %v8850_v12  ;;  %v4425_v39 = vadd.f32 %v4348_v13, %v4232_v41  ;;  %v7147_v13 = vld [vmem:[%s9408_s5 + $0x68] sm:$0xff] }
 0x7be   :  { %6629 = vmatmul.msk.bf16.gmra.mxu3 %vm2914_vm2, %v8852_v17  ;;  %4784 = vmatpush.bf16.msra.mxu1 %v7147_v13 }
 0x7c0   :  { %v4353_v52 = vpop.f32.mrf.mxu2 }
 0x7c1   :  { %v4536_v7 = vpop.f32.mrf.mxu3 }
 0x7c2   :  { %v4616_v56 = vadd.f32 %v4536_v7, %v4423_v29  ;;  %v4157_v27 = vpop.f32.mrf.mxu1 }
 0x7c3   :  { %v4233_v12 = vadd.f32 %v4157_v27, %v9559_v40 }
 0x7c5   :  { %v4426_v19 = vadd.f32 %v4350_v0, %v4233_v12  ;;  %v7118_v0 = vld [vmem:[#allocation2 + $0xf8] sm:$0xff] }
 0x7c8   :  { %v4355_v45 = vpop.f32.mrf.mxu2 }
 0x7c9   :  { %v4538_v24 = vpop.f32.mrf.mxu3 }
 0x7ca   :  { %v4617_v17 = vadd.f32 %v4538_v24, %v4424_v55  ;;  %v4160_v54 = vpop.f32.mrf.mxu1  ;;  %v9563_v55 = vld [vmem:[#allocation13_spill] sm:$0xff] }
 0x7cb   :  { %v4234_v31 = vadd.f32 %v4160_v54, %v9560_v30  ;;  %v7110_v24 = vld [vmem:[#allocation2 + $0xf0] sm:$0xff] }
 0x7cc   :  { %v9061_v53 = vadd.f32 %v9045_v11, %v4617_v17  ;;  %v7119_v17 = vld [vmem:[#allocation2 + $0x100] sm:$0xff] }
 0x7cd   :  { %6535 = vmatmul.msk.bf16.gmra.mxu1 %vm2914_vm2, %v8866_v3  ;;  %6584 = vmatmul.msk.bf16.gmra.mxu2 %vm2914_vm2, %v9561_v47  ;;  %v4427_v10 = vadd.f32 %v4353_v52, %v4234_v31  ;;  %v9049_v3 = vadd.f32 %v9045_v11, %v4616_v56  ;;  %v9564_v56 = vld [vmem:[#allocation20_spill] sm:$0xff]  ;;  %v7138_v31 = vld [vmem:[%s9408_s5 + $0x20] sm:$0xff] }
 0x7ce   :  { %6630 = vmatmul.msk.bf16.gmra.mxu3 %vm2914_vm2, %v8870_v33 }
 0x7d0   :  { %v4358_v63 = vpop.f32.mrf.mxu2 }
 0x7d1   :  { %v4541_v25 = vpop.f32.mrf.mxu3 }
 0x7d2   :  { %v4618_v50 = vadd.f32 %v4541_v25, %v4425_v39  ;;  %v4162_v15 = vpop.f32.mrf.mxu1  ;;  %v7139_v39 = vld [vmem:[%s9408_s5 + $0x28] sm:$0xff] }
 0x7d3   :  { %v4235_v16 = vadd.f32 %v4162_v15, %v9562_v4  ;;  %4846 = vmatpush.bf16.msra.mxu2 %v7139_v39 }
 0x7d4   :  { %v9052_v14 = vadd.f32 %v9045_v11, %v4618_v50  ;;  %v7137_v50 = vld [vmem:[%s9408_s5 + $0x18] sm:$0xff] }
 0x7d5   :  { %v4428_v29 = vadd.f32 %v4355_v45, %v4235_v16  ;;  %v7136_v16 = vld [vmem:[%s9408_s5 + $0x10] sm:$0xff] }
 0x7d6   :  { %v4684_v33 = vmax.f32 %v9049_v3, %v9052_v14  ;;  %v7143_v3 = vld [vmem:[%s9408_s5 + $0x48] sm:$0xff] }
 0x7d7   :  { %4847 = vmatpush.bf16.msra.mxu2 %v7138_v31 }
 0x7d8   :  { %v4360_v6 = vpop.f32.mrf.mxu2 }
 0x7d9   :  { %v4543_v57 = vpop.f32.mrf.mxu3 }
 0x7da   :  { %v4619_v18 = vadd.f32 %v4543_v57, %v4426_v19  ;;  %v4165_v8 = vpop.f32.mrf.mxu1  ;;  %v7111_v57 = vld [vmem:[#allocation2 + $0xf8] sm:$0xff] }
 0x7db   :  { %v4236_v1 = vadd.f32 %v4165_v8, %v9563_v55  ;;  %4848 = vmatpush.bf16.msra.mxu2 %v7137_v50 }
 0x7dc   :  { %v9064_v42 = vadd.f32 %v9045_v11, %v4619_v18  ;;  %v7120_v18 = vld [vmem:[#allocation2 + $0x108] sm:$0xff] }
 0x7dd   :  { %6536 = vmatmul.msk.bf16.gmra.mxu1 %vm2914_vm2, %v8884_v35  ;;  %6585 = vmatmul.msk.bf16.gmra.mxu2 %vm2914_vm2, %v7118_v0  ;;  %v4429_v22 = vadd.f32 %v4358_v63, %v4236_v1  ;;  %v7126_v1 = vld [vmem:[#allocation2 + $0x100] sm:$0xff]  ;;  %v7135_v0 = vld [vmem:[%s9408_s5 + $0x8] sm:$0xff] }
 0x7de   :  { %v4685_v41 = vmax.f32 %v9061_v53, %v9064_v42  ;;  %6631 = vmatmul.msk.bf16.gmra.mxu3 %vm2914_vm2, %v8886_v62 }
 0x7df   :  { %4849 = vmatpush.bf16.msra.mxu2 %v7136_v16 }
 0x7e0   :  { %v9079_v61 = vpop.f32.mrf.mxu2 }
 0x7e1   :  { %v4546_v35 = vpop.f32.mrf.mxu3 }
 0x7e2   :  { %v4620_v52 = vadd.f32 %v4546_v35, %v4427_v10  ;;  %v4167_v7 = vpop.f32.mrf.mxu1  ;;  %v7134_v35 = vld [vmem:[%s9408_s5] sm:$0xff] }
 0x7e3   :  { %v4237_v27 = vadd.f32 %v4167_v7, %v9564_v56  ;;  %4850 = vmatpush.bf16.msra.mxu2 %v7135_v0  ;;  %v7154_v7 = vld [vmem:[%s9408_s5 + $0xa0] sm:$0xff] }
 0x7e4   :  { %v9092_v63 = vadd.f32 %v9045_v11, %v4620_v52  ;;  %4934 = vmatpush.bf16.msra.mxu3 %v7154_v7 }
 0x7e5   :  { %v4430_v40 = vadd.f32 %v4360_v6, %v4237_v27  ;;  %v7146_v6 = vld [vmem:[%s9408_s5 + $0x60] sm:$0xff] }
 0x7e6   :  { %4785 = vmatpush.bf16.msra.mxu1 %v7146_v6 }
 0x7e7   :  { %4851 = vmatpush.bf16.msra.mxu2 %v7134_v35 }
 0x7e8   :  { %v9082_v12 = vpop.f32.mrf.mxu2 }
 0x7e9   :  { %v4548_v62 = vpop.f32.mrf.mxu3 }
 0x7ea   :  { %v4621_v19 = vadd.f32 %v4548_v62, %v4428_v29  ;;  %v4170_v45 = vpop.f32.mrf.mxu1 }
 0x7ec   :  { %v9109_v8 = vadd.f32 %v9045_v11, %v4621_v19 }
 0x7ed   :  { %6537 = vmatmul.msk.bf16.gmra.mxu1 %vm2914_vm2, %v7110_v24  ;;  %6586 = vmatmul.msk.bf16.gmra.mxu2 %vm2914_vm2, %v7119_v17  ;;  %v7112_v24 = vld [vmem:[#allocation2 + $0x100] sm:$0xff]  ;;  %v7121_v17 = vld [vmem:[#allocation2 + $0x110] sm:$0xff] }
 0x7ee   :  { %6632 = vmatmul.msk.bf16.gmra.mxu3 %vm2914_vm2, %v8900_v48 }
 0x7f0   :  { %v4368_v54 = vpop.f32.mrf.mxu2 }
 0x7f1   :  { %v4551_v30 = vpop.f32.mrf.mxu3 }
 0x7f2   :  { %v4622_v47 = vadd.f32 %v4551_v30, %v4429_v22  ;;  %v4172_v10 = vpop.f32.mrf.mxu1  ;;  %v9566_v30 = vld [vmem:[#allocation24_spill] sm:$0xff] }
 0x7f4   :  { %v9095_v25 = vadd.f32 %v9045_v11, %v4622_v47  ;;  %v7127_v47 = vld [vmem:[#allocation2 + $0x108] sm:$0xff] }
 0x7f6   :  { %v4709_v48 = vmax.f32 %v9092_v63, %v9095_v25 }
 0x7f8   :  { %v4370_v15 = vpop.f32.mrf.mxu2 }
 0x7f9   :  { %v4553_v4 = vpop.f32.mrf.mxu3 }
 0x7fa   :  { %v4623_v29 = vadd.f32 %v4553_v4, %v4430_v40  ;;  %v4175_v13 = vpop.f32.mrf.mxu1  ;;  %v9565_v40 = vld [vmem:[#allocation15_spill] sm:$0xff] }
 0x7fb   :  { %v4238_v62 = vadd.f32 %v4170_v45, %v9565_v40  ;;  %v4240_v31 = vadd.f32 %v4175_v13, %v9566_v30  ;;  %v9568_v13 = vld [vmem:[#allocation19_spill] sm:$0xff] }
 0x7fc   :  { %v9112_v55 = vadd.f32 %v9045_v11, %v4623_v29 }
 0x7fd   :  { %6538 = vmatmul.msk.bf16.gmra.mxu1 %vm2914_vm2, %v7111_v57  ;;  %6587 = vmatmul.msk.bf16.gmra.mxu2 %vm2914_vm2, %v7120_v18  ;;  %v4431_v50 = vadd.f32 %v9079_v61, %v4238_v62  ;;  %v4433_v29 = vadd.f32 %v4368_v54, %v4240_v31  ;;  %v9567_v57 = vld [vmem:[#allocation22_spill] sm:$0xff] }
 0x7fe   :  { %v4710_v22 = vmax.f32 %v9109_v8, %v9112_v55  ;;  %6633 = vmatmul.msk.bf16.gmra.mxu3 %vm2914_vm2, %v7126_v1  ;;  %v4239_v45 = vadd.f32 %v4172_v10, %v9567_v57  ;;  %v7145_v61 = vld [vmem:[%s9408_s5 + $0x58] sm:$0xff] }
 0x7ff   :  { %4786 = vmatpush.bf16.msra.mxu1 %v7145_v61  ;;  %v7129_v61 = vld [vmem:[#allocation2 + $0x118] sm:$0xff] }
 0x800   :  { %v9122_v39 = vpop.f32.mrf.mxu2  ;;  %v4432_v40 = vadd.f32 %v9082_v12, %v4239_v45 }
 0x801   :  { %v4556_v5 = vpop.f32.mrf.mxu3 }
 0x802   :  { %v4177_v52 = vpop.f32.mrf.mxu1  ;;  %v4624_v4 = vadd.f32 %v4556_v5, %v4431_v50 }
 0x803   :  { %v4241_v35 = vadd.f32 %v4177_v52, %v9568_v13  ;;  %v7144_v52 = vld [vmem:[%s9408_s5 + $0x50] sm:$0xff] }
 0x804   :  { %v4660_v0 = vadd.f32 %v9045_v11, %v4624_v4  ;;  %4787 = vmatpush.bf16.msra.mxu1 %v7144_v52 }
 0x808   :  { %v9130_v56 = vpop.f32.mrf.mxu2  ;;  %4788 = vmatpush.bf16.msra.mxu1 %v7143_v3 }
 0x809   :  { %v4558_v27 = vpop.f32.mrf.mxu3 }
 0x80a   :  { %v4180_v19 = vpop.f32.mrf.mxu1  ;;  %v4625_v54 = vadd.f32 %v4558_v27, %v4432_v40  ;;  %v7128_v27 = vld [vmem:[#allocation2 + $0x110] sm:$0xff] }
 0x80b   :  { %v4242_v42 = vadd.f32 %v4180_v19, %v8894_v36 }
 0x80c   :  { %v4661_v12 = vadd.f32 %v9045_v11, %v4625_v54 }
 0x80d   :  { %6539 = vmatmul.msk.bf16.gmra.mxu1 %vm2914_vm2, %v7112_v24  ;;  %6588 = vmatmul.msk.bf16.gmra.mxu2 %vm2914_vm2, %v7121_v17  ;;  %v4434_v24 = vadd.f32 %v4370_v15, %v4241_v35 }
 0x80e   :  { %6634 = vmatmul.msk.bf16.gmra.mxu3 %vm2914_vm2, %v7127_v47  ;;  %v7113_v47 = vld [vmem:[#allocation2 + $0x108] sm:$0xff] }
 0x810   :  { %v4378_v16 = vpop.f32.mrf.mxu2 }
 0x811   :  { %v4561_v6 = vpop.f32.mrf.mxu3 }
 0x812   :  { %v4626_v18 = vadd.f32 %v4561_v6, %v4433_v29  ;;  %v4182_v1 = vpop.f32.mrf.mxu1  ;;  %v7142_v29 = vld [vmem:[%s9408_s5 + $0x40] sm:$0xff] }
 0x813   :  { %4789 = vmatpush.bf16.msra.mxu1 %v7142_v29 }
 0x814   :  { %v4662_v7 = vadd.f32 %v9045_v11, %v4626_v18 }
 0x816   :  { %v4686_v5 = vmax.f32 %v4660_v0, %v4662_v7  ;;  %v7153_v0 = vld [vmem:[%s9408_s5 + $0x98] sm:$0xff] }
 0x817   :  { %4935 = vmatpush.bf16.msra.mxu3 %v7153_v0 }
 0x818   :  { %v4688_v10 = vmax.f32 %v4684_v33, %v4686_v5  ;;  %v4380_v62 = vpop.f32.mrf.mxu2  ;;  %v4435_v5 = vadd.f32 %v9122_v39, %v4242_v42 }
 0x819   :  { %v4563_v17 = vpop.f32.mrf.mxu3 }
 0x81a   :  { %v4627_v30 = vadd.f32 %v4563_v17, %v4434_v24  ;;  %v4185_v31 = vpop.f32.mrf.mxu1  ;;  %v4690_v6 = vmax.f32 %v4688_v10, 0.0  ;;  %v4243_v17 = vadd.f32 %v4182_v1, %v8897_v32 }
 0x81b   :  { %v4244_v7 = vadd.f32 %v4185_v31, %v8908_v49 }
 0x81c   :  { %v4663_v50 = vadd.f32 %v9045_v11, %v4627_v30  ;;  %v4436_v39 = vadd.f32 %v9130_v56, %v4243_v17  ;;  %v7152_v56 = vld [vmem:[%s9408_s5 + $0x90] sm:$0xff] }
 0x81d   :  { %6540 = vmatmul.msk.bf16.gmra.mxu1 %vm2914_vm2, %v7113_v47  ;;  %v4437_v10 = vadd.f32 %v4378_v16, %v4244_v7  ;;  %4936 = vmatpush.bf16.msra.mxu3 %v7152_v56 }
 0x81e   :  { %v4687_v14 = vmax.f32 %v4661_v12, %v4663_v50  ;;  %6635 = vmatmul.msk.bf16.gmra.mxu3 %vm2914_vm2, %v7128_v27 }
 0x820   :  { %v4689_v33 = vmax.f32 %v4685_v41, %v4687_v14  ;;  %v4383_v15 = vpop.f32.mrf.mxu2 }
 0x821   :  { %v4566_v4 = vpop.f32.mrf.mxu3 }
 0x822   :  { %v4691_v57 = vmax.f32 %v4689_v33, 0.0  ;;  %v4187_v45 = vpop.f32.mrf.mxu1  ;;  %v4628_v54 = vadd.f32 %v4566_v4, %v4435_v5 }
 0x823   :  { %v4245_v49 = vadd.f32 %v4187_v45, %v8911_v2 }
 0x824   :  { %v4692_v18 = vpack.c.bf16 %v4691_v57, %v4690_v6 }
 0x825   :  { %v4438_v16 = vadd.f32 %v4380_v62, %v4245_v49 }
 0x826   :  { %4852 = vmatmul.bf16.vlgmr.msra.gmra.mxu2 %v4692_v18 }
 0x828   :  { %v4385_v13 = vpop.f32.mrf.mxu2 }
 0x829   :  { %v4568_v53 = vpop.f32.mrf.mxu3 }
 0x82a   :  { %v4190_v41 = vpop.f32.mrf.mxu1  ;;  %v4629_v50 = vadd.f32 %v4568_v53, %v4436_v39 }
 0x82b   :  { %v4246_v35 = vadd.f32 %v4190_v41, %v8920_v28  ;;  %v4664_v28 = vadd.f32 %v9045_v11, %v4628_v54 }
 0x82c   :  { %v4665_v14 = vadd.f32 %v9045_v11, %v4629_v50 }
 0x82d   :  { %v4439_v40 = vadd.f32 %v4383_v15, %v4246_v35 }
 0x82e   :  { %6636 = vmatmul.msk.bf16.gmra.mxu3 %vm2914_vm2, %v7129_v61 }
 0x830   :  { %v4388_v52 = vpop.f32.mrf.mxu2 }
 0x831   :  { %v4571_v24 = vpop.f32.mrf.mxu3 }
 0x832   :  { %v4630_v30 = vadd.f32 %v4571_v24, %v4437_v10  ;;  %v4192_v47 = vpop.f32.mrf.mxu1 }
 0x833   :  { %v4247_v36 = vadd.f32 %v4192_v47, %v8923_v44 }
 0x834   :  { %v4666_v19 = vadd.f32 %v9045_v11, %v4630_v30 }
 0x835   :  { %v4440_v31 = vadd.f32 %v4385_v13, %v4247_v36  ;;  %v7151_v36 = vld [vmem:[%s9408_s5 + $0x88] sm:$0xff] }
 0x836   :  { %v4711_v12 = vmax.f32 %v4664_v28, %v4666_v19  ;;  %4937 = vmatpush.bf16.msra.mxu3 %v7151_v36 }
 0x838   :  { %v4713_v32 = vmax.f32 %v4709_v48, %v4711_v12  ;;  %v4390_v2 = vpop.f32.mrf.mxu2 }
 0x839   :  { %v4573_v1 = vpop.f32.mrf.mxu3 }
 0x83a   :  { %v4631_v27 = vadd.f32 %v4573_v1, %v4438_v16  ;;  %v4195_v3 = vpop.f32.mrf.mxu1  ;;  %v4715_v48 = vmax.f32 %v4713_v32, 0.0 }
 0x83b   :  { %v4248_v44 = vadd.f32 %v4195_v3, %v8932_v60 }
 0x83c   :  { %v4667_v33 = vadd.f32 %v9045_v11, %v4631_v27 }
 0x83d   :  { %v4441_v15 = vadd.f32 %v4388_v52, %v4248_v44 }
 0x83e   :  { %v4712_v4 = vmax.f32 %v4665_v14, %v4667_v33 }
 0x840   :  { %v4714_v63 = vmax.f32 %v4710_v22, %v4712_v4  ;;  %v4393_v18 = vpop.f32.mrf.mxu2 }
 0x841   :  { %v4576_v25 = vpop.f32.mrf.mxu3 }
 0x842   :  { %v4716_v62 = vmax.f32 %v4714_v63, 0.0  ;;  %v4632_v60 = vadd.f32 %v4576_v25, %v4439_v40  ;;  %v4197_v29 = vpop.f32.mrf.mxu1 }
 0x843   :  { %v4249_v6 = vadd.f32 %v4197_v29, %v8935_v46  ;;  %v7165_v29 = vld [vmem:[%s9408_s5 + $0xf8] sm:$0xff] }
 0x844   :  { %v4717_v57 = vpack.c.bf16 %v4716_v62, %v4715_v48  ;;  %v9195_v61 = vadd.f32 %v9045_v11, %v4632_v60  ;;  %v7150_v62 = vld [vmem:[%s9408_s5 + $0x80] sm:$0xff]  ;;  %5020 = vmatpush.bf16.msrb.mxu1 %v7165_v29 }
 0x845   :  { %v4442_v45 = vadd.f32 %v4390_v2, %v4249_v6  ;;  %4938 = vmatpush.bf16.msra.mxu3 %v7150_v62 }
 0x846   :  { %4790 = vmatmul.bf16.vlgmr.msra.gmra.mxu1 %v4717_v57 }
 0x848   :  { %v4395_v8 = vpop.f32.mrf.mxu2 }
 0x849   :  { %v4578_v0 = vpop.f32.mrf.mxu3 }
 0x84a   :  { %v4633_v13 = vadd.f32 %v4578_v0, %v4440_v31  ;;  %v4200_v53 = vpop.f32.mrf.mxu1 }
 0x84b   :  { %v4250_v42 = vadd.f32 %v4200_v53, %v8944_v51 }
 0x84c   :  { %v9204_v52 = vadd.f32 %v9045_v11, %v4633_v13  ;;  %v7163_v13 = vld [vmem:[%s9408_s5 + $0xe8] sm:$0xff] }
 0x84d   :  { %v4443_v41 = vadd.f32 %v4393_v18, %v4250_v42 }
 0x850   :  { %v4398_v10 = vpop.f32.mrf.mxu2 }
 0x851   :  { %v4581_v55 = vpop.f32.mrf.mxu3 }
 0x852   :  { %v4634_v22 = vadd.f32 %v4581_v55, %v4441_v15  ;;  %v4202_v35 = vpop.f32.mrf.mxu1 }
 0x853   :  { %v4251_v7 = vadd.f32 %v4202_v35, %v8947_v20 }
 0x854   :  { %v9198_v46 = vadd.f32 %v9045_v11, %v4634_v22  ;;  %v7162_v22 = vld [vmem:[%s9408_s5 + $0xe0] sm:$0xff] }
 0x855   :  { %v4444_v40 = vadd.f32 %v4395_v8, %v4251_v7 }
 0x856   :  { %v4858_v5 = vmax.f32 %v9195_v61, %v9198_v46 }
 0x858   :  { %v4400_v31 = vpop.f32.mrf.mxu2 }
 0x859   :  { %v4583_v54 = vpop.f32.mrf.mxu3 }
 0x85a   :  { %v4635_v51 = vadd.f32 %v4583_v54, %v4442_v45  ;;  %v4205_v24 = vpop.f32.mrf.mxu1  ;;  %v7164_v45 = vld [vmem:[%s9408_s5 + $0xf0] sm:$0xff] }
 0x85b   :  { %v4252_v17 = vadd.f32 %v4205_v24, %v8956_v58  ;;  %5021 = vmatpush.bf16.msrb.mxu1 %v7164_v45 }
 0x85c   :  { %v9207_v20 = vadd.f32 %v9045_v11, %v4635_v51 }
 0x85d   :  { %v4445_v30 = vadd.f32 %v4398_v10, %v4252_v17  ;;  %v7161_v10 = vld [vmem:[%s9408_s5 + $0xd8] sm:$0xff] }
 0x85e   :  { %v4859_v47 = vmax.f32 %v9204_v52, %v9207_v20 }
 0x85f   :  { %5022 = vmatpush.bf16.msrb.mxu1 %v7163_v13 }
 0x860   :  { %v4403_v16 = vpop.f32.mrf.mxu2 }
 0x861   :  { %v4586_v28 = vpop.f32.mrf.mxu3 }
 0x862   :  { %v4636_v49 = vadd.f32 %v4586_v28, %v4443_v41  ;;  %v4207_v19 = vpop.f32.mrf.mxu1 }
 0x863   :  { %v4253_v58 = vadd.f32 %v4207_v19, %v8959_v26  ;;  %5023 = vmatpush.bf16.msrb.mxu1 %v7162_v22 }
 0x864   :  { %v9216_v3 = vadd.f32 %v9045_v11, %v4636_v49 }
 0x865   :  { %v4446_v39 = vadd.f32 %v4400_v31, %v4253_v58 }
 0x867   :  { %5024 = vmatpush.bf16.msrb.mxu1 %v7161_v10 }
 0x868   :  { %v4405_v15 = vpop.f32.mrf.mxu2 }
 0x869   :  { %v4588_v12 = vpop.f32.mrf.mxu3 }
 0x86a   :  { %v4637_v50 = vadd.f32 %v4588_v12, %v4444_v40  ;;  %v4210_v32 = vpop.f32.mrf.mxu1  ;;  %v7158_v12 = vld [vmem:[%s9408_s5 + $0xc0] sm:$0xff] }
 0x86b   :  { %v4254_v18 = vadd.f32 %v4210_v32, %v8968_v23 }
 0x86c   :  { %v9224_v4 = vadd.f32 %v9045_v11, %v4637_v50 }
 0x86d   :  { %v4447_v53 = vadd.f32 %v4403_v16, %v4254_v18 }
 0x870   :  { %v4408_v60 = vpop.f32.mrf.mxu2 }
 0x871   :  { %v4591_v1 = vpop.f32.mrf.mxu3 }
 0x872   :  { %v4638_v27 = vadd.f32 %v4591_v1, %v4445_v30  ;;  %v4212_v14 = vpop.f32.mrf.mxu1 }
 0x873   :  { %v4255_v35 = vadd.f32 %v4212_v14, %v8971_v59 }
 0x874   :  { %v9219_v44 = vadd.f32 %v9045_v11, %v4638_v27 }
 0x875   :  { %v4448_v51 = vadd.f32 %v4405_v15, %v4255_v35 }
 0x876   :  { %v4947_v2 = vmax.f32 %v9216_v3, %v9219_v44  ;;  %v7173_v3 = vld [vmem:[%s9411_s7 + $0x38] sm:$0xff]  ;;  %v7172_v44 = vld [vmem:[%s9411_s7 + $0x30] sm:$0xff] }
 0x877   :  { %5113 = vmatpush.bf16.msrb.mxu2 %v7173_v3 }
 0x878   :  { %v4410_v42 = vpop.f32.mrf.mxu2 }
 0x879   :  { %v4593_v33 = vpop.f32.mrf.mxu3 }
 0x87a   :  { %v4639_v26 = vadd.f32 %v4593_v33, %v4446_v39  ;;  %v4215_v25 = vpop.f32.mrf.mxu1  ;;  %v7159_v39 = vld [vmem:[%s9408_s5 + $0xc8] sm:$0xff] }
 0x87b   :  { %v4256_v0 = vadd.f32 %v4215_v25, %v8980_v38  ;;  %5114 = vmatpush.bf16.msrb.mxu2 %v7172_v44 }
 0x87c   :  { %v9227_v56 = vadd.f32 %v9045_v11, %v4639_v26 }
 0x87d   :  { %v4449_v8 = vadd.f32 %v4408_v60, %v4256_v0 }
 0x87e   :  { %v4948_v63 = vmax.f32 %v9224_v4, %v9227_v56  ;;  %v7169_v4 = vld [vmem:[%s9411_s7 + $0x18] sm:$0xff]  ;;  %v7168_v56 = vld [vmem:[%s9411_s7 + $0x10] sm:$0xff] }
 0x880   :  { %v4413_v36 = vpop.f32.mrf.mxu2 }
 0x881   :  { %v4596_v48 = vpop.f32.mrf.mxu3 }
 0x882   :  { %v4217_v6 = vpop.f32.mrf.mxu1  ;;  %v4640_v41 = vadd.f32 %v4596_v48, %v4447_v53 }
 0x883   :  { %v4257_v40 = vadd.f32 %v4217_v6, %v8986_v9  ;;  %v7160_v9 = vld [vmem:[%s9408_s5 + $0xd0] sm:$0xff] }
 0x884   :  { %v4676_v38 = vadd.f32 %v9045_v11, %v4640_v41  ;;  %5025 = vmatpush.bf16.msrb.mxu1 %v7160_v9 }
 0x885   :  { %v4450_v30 = vadd.f32 %v4410_v42, %v4257_v40  ;;  %v7180_v40 = vld [vmem:[%s9412_s9 + $0x30] sm:$0xff] }
 0x888   :  { %5026 = vmatpush.bf16.msrb.mxu1 %v7159_v39  ;;  %v4415_v16 = vpop.f32.mrf.mxu2 }
 0x889   :  { %v4598_v57 = vpop.f32.mrf.mxu3 }
 0x88a   :  { %v4220_v7 = vpop.f32.mrf.mxu1  ;;  %v4641_v17 = vadd.f32 %v4598_v57, %v4448_v51 }
 0x88b   :  { %v4258_v33 = vadd.f32 %v4220_v7, %v9001_v21 }
 0x88c   :  { %v4677_v19 = vadd.f32 %v9045_v11, %v4641_v17  ;;  %5027 = vmatpush.bf16.msrb.mxu1 %v7158_v12  ;;  %v7178_v17 = vld [vmem:[%s9412_s9 + $0x20] sm:$0xff] }
 0x88d   :  { %v4451_v52 = vadd.f32 %v4413_v36, %v4258_v33  ;;  %v7189_v33 = vld [vmem:[%s9414_s11 + $0x38] sm:$0xff] }
 0x890   :  { %v4418_v15 = vpop.f32.mrf.mxu2  ;;  %5350 = vmatpush.bf16.msra.mxu1 %v7189_v33 }
 0x891   :  { %v4601_v55 = vpop.f32.mrf.mxu3 }
 0x892   :  { %v4642_v23 = vadd.f32 %v4601_v55, %v4449_v8  ;;  %v4222_v31 = vpop.f32.mrf.mxu1 }
 0x893   :  { %v4259_v62 = vadd.f32 %v4222_v31, %v9004_v37 }
 0x894   :  { %v4678_v54 = vadd.f32 %v9045_v11, %v4642_v23  ;;  %v7166_v23 = vld [vmem:[%s9411_s7] sm:$0xff] }
 0x895   :  { %v4452_v45 = vadd.f32 %v4415_v16, %v4259_v62  ;;  %v7177_v16 = vld [vmem:[%s9412_s9 + $0x18] sm:$0xff] }
 0x896   :  { %v4860_v24 = vmax.f32 %v4676_v38, %v4678_v54  ;;  %v7181_v38 = vld [vmem:[%s9412_s9 + $0x38] sm:$0xff]  ;;  %v7179_v54 = vld [vmem:[%s9412_s9 + $0x28] sm:$0xff] }
 0x897   :  { %5198 = vmatpush.bf16.msrb.mxu3 %v7181_v38  ;;  %v7185_v62 = vld [vmem:[%s9414_s11 + $0x18] sm:$0xff] }
 0x898   :  { %v4862_v59 = vmax.f32 %v4858_v5, %v4860_v24  ;;  %v4420_v21 = vpop.f32.mrf.mxu2 }
 0x899   :  { %v4603_v28 = vpop.f32.mrf.mxu3 }
 0x89a   :  { %v4643_v49 = vadd.f32 %v4603_v28, %v4450_v30  ;;  %v4864_v50 = vmax.f32 %v4862_v59, 0.0  ;;  %v4225_v27 = vpop.f32.mrf.mxu1 }
 0x89b   :  { %v4260_v26 = vadd.f32 %v4225_v27, %v9013_v34  ;;  %5199 = vmatpush.bf16.msrb.mxu3 %v7180_v40  ;;  %v7175_v27 = vld [vmem:[%s9412_s9 + $0x8] sm:$0xff] }
 0x89c   :  { %v4679_v58 = vadd.f32 %v9045_v11, %v4643_v49 }
 0x89e   :  { %v4861_v61 = vmax.f32 %v4677_v19, %v4679_v58  ;;  %v7203_v58 = vld [vmem:[%s9409_s6] ss:$0 sm:$0xff] }
 0x89f   :  { %5200 = vmatpush.bf16.msrb.mxu3 %v7179_v54 }
 0x8a0   :  { %v4863_v46 = vmax.f32 %v4859_v47, %v4861_v61  ;;  %v4453_v47 = vadd.f32 %v4418_v15, %v4260_v26  ;;  %v7197_v26 = vld [vmem:[%s9414_s11 + $0x78] sm:$0xff]  ;;  %v7188_v15 = vld [vmem:[%s9414_s11 + $0x30] sm:$0xff] }
 0x8a1   :  { %v4606_v5 = vpop.f32.mrf.mxu3  ;;  %5351 = vmatpush.bf16.msra.mxu1 %v7188_v15 }
 0x8a2   :  { %v4865_v32 = vmax.f32 %v4863_v46, 0.0  ;;  %v4644_v20 = vadd.f32 %v4606_v5, %v4451_v52  ;;  %v4227_v25 = vpop.f32.mrf.mxu1  ;;  %v7196_v52 = vld [vmem:[%s9414_s11 + $0x70] sm:$0xff] }
 0x8a3   :  { %v4261_v6 = vadd.f32 %v4227_v25, %v9019_v43  ;;  %5201 = vmatpush.bf16.msrb.mxu3 %v7178_v17  ;;  %v7186_v25 = vld [vmem:[%s9414_s11 + $0x20] sm:$0xff] }
 0x8a4   :  { %v4866_v1 = vpack.c.bf16 %v4865_v32, %v4864_v50  ;;  %v4680_v29 = vadd.f32 %v9045_v11, %v4644_v20  ;;  %v7187_v20 = vld [vmem:[%s9414_s11 + $0x28] sm:$0xff] }
 0x8a5   :  { %v4454_v13 = vadd.f32 %v4420_v21, %v4261_v6  ;;  %5352 = vmatpush.bf16.msra.mxu1 %v7187_v20  ;;  %v7204_v6 = vld [vmem:[%s9410_s8] ss:$0 sm:$0xff] }
 0x8a6   :  { %4939 = vmatmul.bf16.vlgmr.msra.gmra.mxu3 %v4866_v1  ;;  %v7176_v1 = vld [vmem:[%s9412_s9 + $0x10] sm:$0xff] }
 0x8a7   :  { %5202 = vmatpush.bf16.msrb.mxu3 %v7177_v16 }
 0x8a9   :  { %v4608_v14 = vpop.f32.mrf.mxu3  ;;  %v4853_v51 = vpop.f32.mrf.mxu2  ;;  %5353 = vmatpush.bf16.msra.mxu1 %v7186_v25 }
 0x8aa   :  { %v4645_v0 = vadd.f32 %v4608_v14, %v4452_v45  ;;  %v7174_v14 = vld [vmem:[%s9412_s9] sm:$0xff] }
 0x8ab   :  { %5203 = vmatpush.bf16.msrb.mxu3 %v7176_v1 }
 0x8ac   :  { %v4681_v37 = vadd.f32 %v9045_v11, %v4645_v0 }
 0x8ad   :  { %5354 = vmatpush.bf16.msra.mxu1 %v7185_v62 }
 0x8af   :  { %5204 = vmatpush.bf16.msrb.mxu3 %v7175_v27 }
 0x8b1   :  { %v4611_v48 = vpop.f32.mrf.mxu3  ;;  %v4855_v28 = vpop.f32.mrf.mxu2 }
 0x8b2   :  { %v4646_v60 = vadd.f32 %v4611_v48, %v4453_v47  ;;  %v7195_v47 = vld [vmem:[%s9414_s11 + $0x68] sm:$0xff]  ;;  %v7194_v48 = vld [vmem:[%s9414_s11 + $0x60] sm:$0xff] }
 0x8b3   :  { %5205 = vmatpush.bf16.msrb.mxu3 %v7174_v14 }
 0x8b4   :  { %v4682_v57 = vadd.f32 %v9045_v11, %v4646_v60 }
 0x8b6   :  { %v4949_v18 = vmax.f32 %v4680_v29, %v4682_v57  ;;  %v7184_v29 = vld [vmem:[%s9414_s11 + $0x10] sm:$0xff] }
 0x8b7   :  { %5355 = vmatpush.bf16.msra.mxu1 %v7184_v29 }
 0x8b8   :  { %v4951_v34 = vmax.f32 %v4947_v2, %v4949_v18  ;;  %v7170_v2 = vld [vmem:[%s9411_s7 + $0x20] sm:$0xff] }
 0x8b9   :  { %v4613_v53 = vpop.f32.mrf.mxu3 }
 0x8ba   :  { %v4647_v42 = vadd.f32 %v4613_v53, %v4454_v13  ;;  %v4953_v55 = vmax.f32 %v4951_v34, 0.0  ;;  %v7183_v13 = vld [vmem:[%s9414_s11 + $0x8] sm:$0xff]  ;;  %v7193_v53 = vld [vmem:[%s9414_s11 + $0x58] sm:$0xff] }
 0x8bb   :  { %5356 = vmatpush.bf16.msra.mxu1 %v7183_v13 }
 0x8bc   :  { %v4683_v41 = vadd.f32 %v9045_v11, %v4647_v42  ;;  %v7171_v11 = vld [vmem:[%s9411_s7 + $0x28] sm:$0xff]  ;;  %v7182_v42 = vld [vmem:[%s9414_s11] sm:$0xff] }
 0x8bd   :  { %5115 = vmatpush.bf16.msrb.mxu2 %v7171_v11 }
 0x8be   :  { %v4950_v8 = vmax.f32 %v4681_v37, %v4683_v41  ;;  %v7192_v37 = vld [vmem:[%s9414_s11 + $0x50] sm:$0xff]  ;;  %v7191_v41 = vld [vmem:[%s9414_s11 + $0x48] sm:$0xff] }
 0x8bf   :  { %5357 = vmatpush.bf16.msra.mxu1 %v7182_v42 }
 0x8c0   :  { %v4952_v43 = vmax.f32 %v4948_v63, %v4950_v8  ;;  %v7167_v63 = vld [vmem:[%s9411_s7 + $0x8] sm:$0xff]  ;;  %v7190_v8 = vld [vmem:[%s9414_s11 + $0x40] sm:$0xff] }
 0x8c1   :  { %5116 = vmatpush.bf16.msrb.mxu2 %v7170_v2 }
 0x8c2   :  { %v4954_v22 = vmax.f32 %v4952_v43, 0.0  ;;  %v7205_v43 = vld [vmem:[%s9413_s10] ss:$0 sm:$0xff] }
 0x8c3   :  { %v4791_v7 = vpop.f32.mrf.mxu1 }
 0x8c4   :  { %v4955_v35 = vpack.c.bf16 %v4954_v22, %v4953_v55  ;;  %v4854_v30 = vadd.f32 %v4853_v51, %v4791_v7 }
 0x8c5   :  { %5117 = vmatpush.bf16.msrb.mxu2 %v7169_v4 }
 0x8c6   :  { %5028 = vmatmul.bf16.vlgmr.msrb.gmra.mxu1 %v4955_v35 }
 0x8c9   :  { %5118 = vmatpush.bf16.msrb.mxu2 %v7168_v56 }
 0x8cb   :  { %v4793_v10 = vpop.f32.mrf.mxu1 }
 0x8cc   :  { %v4856_v49 = vadd.f32 %v4855_v28, %v4793_v10 }
 0x8cd   :  { %5119 = vmatpush.bf16.msrb.mxu2 %v7167_v63 }
 0x8d1   :  { %5120 = vmatpush.bf16.msrb.mxu2 %v7166_v23  ;;  %v7206_v23 = vld [vmem:[%s9415_s12] ss:$0 sm:$0xff] }
 0x8d5   :  { %5363 = vmatpush.bf16.msra.mxu2 %v7197_v26 }
 0x8d9   :  { %5364 = vmatpush.bf16.msra.mxu2 %v7196_v52 }
 0x8dd   :  { %5365 = vmatpush.bf16.msra.mxu2 %v7195_v47 }
 0x8e1   :  { %5366 = vmatpush.bf16.msra.mxu2 %v7194_v48 }
 0x8e5   :  { %5367 = vmatpush.bf16.msra.mxu2 %v7193_v53 }
 0x8e9   :  { %5368 = vmatpush.bf16.msra.mxu2 %v7192_v37 }
 0x8ed   :  { %5369 = vmatpush.bf16.msra.mxu2 %v7191_v41 }
 0x8f1   :  { %5370 = vmatpush.bf16.msra.mxu2 %v7190_v8 }
 0x929   :  { %v4940_v24 = vpop.f32.mrf.mxu3 }
 0x92a   :  { %v4945_v36 = vadd.f32 %v4940_v24, %v4854_v30 }
 0x931   :  { %v4942_v9 = vpop.f32.mrf.mxu3 }
 0x932   :  { %v4946_v31 = vadd.f32 %v4942_v9, %v4856_v49 }
 0x943   :  { %v5029_v59 = vpop.f32.mrf.mxu1 }
 0x944   :  { %v5034_v19 = vadd.f32 %v5029_v59, %v4945_v36 }
 0x946   :  { %v5040_v61 = vadd.f32 %v7203_v58, %v5034_v19 }
 0x948   :  { %v5042_v12 = vmax.f32 %v5040_v61, 0.0 }
 0x94b   :  { %v5031_v39 = vpop.f32.mrf.mxu1 }
 0x94c   :  { %v5035_v46 = vadd.f32 %v5031_v39, %v4946_v31 }
 0x94e   :  { %v5041_v5 = vadd.f32 %v7203_v58, %v5035_v46 }
 0x950   :  { %v5043_v50 = vmax.f32 %v5041_v5, 0.0 }
 0x952   :  { %v5044_v32 = vpack.c.bf16 %v5043_v50, %v5042_v12 }
 0x954   :  { %5121 = vmatmul.bf16.vlgmr.msrb.gmra.mxu2 %v5044_v32 }
 0x9d7   :  { %v5122_v60 = vpop.f32.mrf.mxu2 }
 0x9d8   :  { %v5123_v57 = vadd.f32 %v7204_v6, %v5122_v60 }
 0x9da   :  { %v5127_v21 = vmax.f32 %v5123_v57, 0.0 }
 0x9df   :  { %v5124_v45 = vpop.f32.mrf.mxu2 }
 0x9e0   :  { %v5125_v18 = vadd.f32 %v7204_v6, %v5124_v45 }
 0x9e2   :  { %v5128_v0 = vmax.f32 %v5125_v18, 0.0 }
 0x9e4   :  { %v5129_v34 = vpack.c.bf16 %v5128_v0, %v5127_v21 }
 0x9e6   :  { %5206 = vmatmul.bf16.vlgmr.msrb.gmra.mxu3 %v5129_v34 }
 0xa69   :  { %v5207_v55 = vpop.f32.mrf.mxu3 }
 0xa6a   :  { %v5208_v22 = vadd.f32 %v7205_v43, %v5207_v55 }
 0xa6c   :  { %v5212_v35 = vmax.f32 %v5208_v22, 0.0 }
 0xa6e   :  { %5214 = vst [vmem:[%s9416_s14] sm:$0xff] %v5212_v35  ;;  %v5216_v3 = vpack.c.bf16 %v5212_v35, %v5212_v35 }
 0xa70   :  { %5358 = vmatmul.bf16.vlgmr.msra.gmra.mxu1 %v5216_v3 }
 0xa71   :  { %v5209_v44 = vpop.f32.mrf.mxu3 }
 0xa72   :  { %v5210_v11 = vadd.f32 %v7205_v43, %v5209_v44 }
 0xa74   :  { %v5213_v2 = vmax.f32 %v5210_v11, 0.0 }
 0xa76   :  { %5215 = vst [vmem:[%s9416_s14 + $0x8] sm:$0xff] %v5213_v2  ;;  %v5217_v4 = vpack.c.bf16 %v5213_v2, %v5213_v2 }
 0xa78   :  { %5371 = vmatmul.bf16.vlgmr.msra.gmra.mxu2 %v5217_v4 }
 0xaed   :  { %v5359_v56 = vpop.f32.mrf.mxu1 }
 0xaee   :  { %v5360_v7 = vadd.f32 %v7206_v23, %v5359_v56 }
 0xaf5   :  { %v5361_v63 = vpop.f32.mrf.mxu1 }
 0xafb   :  { %v5372_v38 = vpop.f32.mrf.mxu2 }
 0xafc   :  { %v5373_v40 = vadd.f32 %v5372_v38, %v5360_v7 }
 0xafe   :  { %5376 = vst [vmem:[%s9417_s13] sm:$0xff] %v5373_v40 }
 0xb03   :  { %v5374_v54 = vpop.f32.mrf.mxu2 }

</bundles_post_ra>
